<compile_context>
chip_gen: v7x
topology: tpu7x:2x2x1
jax: 0.10.0
libtpu: 0.0.40
codegen_flags: <defaults>
</compile_context>

<pallas_src>
import numpy as np
import jax
import jax.numpy as jnp
from jax import lax
from jax.experimental import pallas as pl
from jax.experimental.pallas import tpu as pltpu


# ------------------------------------------------------------------ fused kernel

def _cae_fused_kernel(x_ref,
                      A1, b1, E1, S1,
                      A2, b2, E2, S2,
                      A3, b3, E3, S3,
                      B1, d1, Rs1,
                      B2, d2, Rs2,
                      B3, d3,
                      out_ref):
    f32 = jnp.float32

    def conv_relu_pool(xp, A, bias, E, S):
        # xp  : (R_in, (W+2)*Cin)   stacked, zero-padded rows (ref or value)
        # A   : (3, (W+2)*Cin, W*Cout)  f32 banded conv matrices (kw & Cin folded in K)
        # bias: (1, W*Cout)             f32
        # E   : (2, R_next, R_in-2)     bf16 row-pool selectors (next-layer row pad folded in)
        # S   : (2, W*Cout, cols_next)  bf16 col-pool selectors (next-layer col pad folded in)
        Rc = xp.shape[0] - 2
        acc = jnp.dot(xp[0:Rc, :], A[0], preferred_element_type=f32)
        acc = acc + jnp.dot(xp[1:Rc + 1, :], A[1], preferred_element_type=f32)
        acc = acc + jnp.dot(xp[2:Rc + 2, :], A[2], preferred_element_type=f32)
        r = jnp.maximum(acc + bias[...], 0.0)                         # bias + ReLU
        rm = jnp.maximum(jnp.dot(E[0].astype(f32), r, preferred_element_type=f32),
                         jnp.dot(E[1].astype(f32), r, preferred_element_type=f32))
        return jnp.maximum(jnp.dot(rm, S[0].astype(f32), preferred_element_type=f32),
                           jnp.dot(rm, S[1].astype(f32), preferred_element_type=f32))

    def deconv_expand(z, B, bias, Rsel):
        # ConvTranspose2d(k=2, s=2) + ReLU: column doubling is inside B; row doubling is
        # two 0/1 row-expansion GEMMs (exact placement -- the other parity contributes 0).
        t0 = jnp.dot(z, B[0], preferred_element_type=f32)
        t1 = jnp.dot(z, B[1], preferred_element_type=f32)
        y = (jnp.dot(Rsel[0].astype(f32), t0, preferred_element_type=f32)
             + jnp.dot(Rsel[1].astype(f32), t1, preferred_element_type=f32)
             + bias[...])
        return jnp.maximum(y, 0.0)

    # -------- encoder: each stage emits the next stage's padded, stacked input --------
    p1 = conv_relu_pool(x_ref, A1, b1, E1, S1)     # (N*(H/2+2), (W/2+2)*32)
    p2 = conv_relu_pool(p1,    A2, b2, E2, S2)     # (N*(H/4+2), (W/4+2)*16)
    z = conv_relu_pool(p2,     A3, b3, E3, S3)     # (N*H/8,      W/8*8)   latent

    # -------- decoder --------
    y = deconv_expand(z, B1, d1, Rs1)              # (N*H/4, W/4*16)
    y = deconv_expand(y, B2, d2, Rs2)              # (N*H/2, W/2*32)

    # last deconv + sigmoid: keep even/odd output rows as the two lane halves of a
    # lane-dense (N*H/2, 2*W*Cin) block; the wrapper reshape undoes the pairing.
    t0 = jnp.dot(y, B3[0], preferred_element_type=f32) + d3[...]
    t1 = jnp.dot(y, B3[1], preferred_element_type=f32) + d3[...]
    out_ref[...] = jnp.concatenate([1.0 / (1.0 + jnp.exp(-t0)),
                                    1.0 / (1.0 + jnp.exp(-t1))], axis=-1)


# ------------------------------------------------------------------ weight packing

def _build_conv_mats(w, b, H, W, N, pad_next):
    """Conv2d(Cin,Cout,3,padding=1)+ReLU+MaxPool2d(2) for the batch-stacked
    (rows = N*(H+2), cols = (W+2)*C) layout."""
    Cout, Cin, _, _ = np.shape(w)
    Wp, Ho, Wo = W + 2, H // 2, W // 2
    wt = jnp.transpose(w, (2, 3, 1, 0))                      # (kh, kw, Cin, Cout)

    sel = np.zeros((3, Wp, W), np.float32)                   # sel[kw, w+kw, w] = 1
    for kw in range(3):
        sel[kw, np.arange(W) + kw, np.arange(W)] = 1.0
    # A[kh, (wp,ci), (w,co)] = wt[kh, wp-w, ci, co]  for 0 <= wp-w <= 2, else 0
    A = jnp.einsum('kpw,hkio->hpiwo', jnp.asarray(sel), wt).reshape(3, Wp * Cin, W * Cout)

    bias_row = jnp.tile(b, (W,)).reshape(1, W * Cout)

    # Row (2x1) max-pool selectors over the stacked conv output.  They also place the
    # pooled rows into the *next* layer's vertically zero-padded, stacked row layout
    # (when pad_next), and skip the garbage rows between the stacked images.
    Rc = N * (H + 2) - 2                                     # stacked conv-output rows
    Rn = N * (Ho + 2) if pad_next else N * Ho
    E = np.zeros((2, Rn, Rc), np.float32)
    for a in range(2):
        for n in range(N):
            for i in range(Ho):
                ro = n * (Ho + 2) + 1 + i if pad_next else n * Ho + i
                E[a, ro, n * (H + 2) + 2 * i + a] = 1.0

    # Column (1x2) max-pool selectors; they also add the next layer's horizontal pad.
    off = Cout if pad_next else 0
    ncols = (Wo + 2) * Cout if pad_next else Wo * Cout
    S = np.zeros((2, W * Cout, ncols), np.float32)
    for bb in range(2):
        for wo in range(Wo):
            for c in range(Cout):
                S[bb, (2 * wo + bb) * Cout + c, off + wo * Cout + c] = 1.0

    return (A, bias_row,
            jnp.asarray(E, dtype=jnp.bfloat16),              # 0/1: exact in bf16
            jnp.asarray(S, dtype=jnp.bfloat16))


def _build_deconv_mats(w, b, W):
    """ConvTranspose2d(Cin,Cout,2,stride=2) in the (rows, cols=W*C) layout (W = input width)."""
    Cin, Cout, _, _ = np.shape(w)
    T = np.zeros((W, 2 * W, 2), np.float32)                  # T[w, 2w+b, b] = 1
    for bb in range(2):
        T[np.arange(W), 2 * np.arange(W) + bb, bb] = 1.0
    # B[a, (w,ci), (v,co)] = w[ci, co, a, v-2w]  for v in {2w, 2w+1}
    B = jnp.einsum('wvb,ioab->awivo', jnp.asarray(T), w).reshape(2, W * Cin, 2 * W * Cout)
    bias_row = jnp.tile(b, (2 * W,)).reshape(1, 2 * W * Cout)
    return B, bias_row


def _build_row_expand(rows_in):
    """0/1 selectors placing input row r at output row 2r+a (deconv row doubling)."""
    R = np.zeros((2, 2 * rows_in, rows_in), np.float32)
    for a in range(2):
        R[a, 2 * np.arange(rows_in) + a, np.arange(rows_in)] = 1.0
    return jnp.asarray(R, dtype=jnp.bfloat16)


# ------------------------------------------------------------------ forward

def conv_autoencoder_forward(x_nchw, params):
    # preprocess(): identity (float input, no channel centering configured).
    N, Cin, H, W = x_nchw.shape

    # ---- fold PyTorch weights into GEMM operands (tiny; constant-folded by XLA) ----
    enc_ops, h, w = [], H, W
    n_enc = len(params["enc"])
    for li, (wgt, bias) in enumerate(params["enc"]):
        enc_ops.append(_build_conv_mats(wgt, bias, h, w, N, pad_next=(li < n_enc - 1)))
        h, w = h // 2, w // 2
    dec_ops = []
    for (wgt, bias) in params["dec"]:
        dec_ops.append(_build_deconv_mats(wgt, bias, w))
        h, w = 2 * h, 2 * w
    # decoder row-expansion selectors for all but the last stage (the last stage keeps
    # its two row parities as the lane halves of the output block).
    row_exp = [_build_row_expand(N * (H // 8) * (1 << s)) for s in range(len(dec_ops) - 1)]

    # ---- input -> stacked (N*(H+2), (W+2)*Cin): per-image zero pad, channels on lanes ----
    x = jnp.transpose(x_nchw, (0, 2, 3, 1)).astype(jnp.float32).reshape(N, H, W * Cin)
    x = jnp.pad(x, ((0, 0), (1, 1), (Cin, Cin))).reshape(N * (H + 2), (W + 2) * Cin)

    flat_in = [x]
    for (A, b, E, S) in enc_ops:
        flat_in += [A, b, E, S]
    for si, (B, d) in enumerate(dec_ops):
        flat_in += [B, d]
        if si < len(dec_ops) - 1:
            flat_in.append(row_exp[si])

    def _full_spec(a):
        nd = a.ndim
        return pl.BlockSpec(a.shape, lambda i, _nd=nd: (0,) * _nd)

    in_specs = [_full_spec(a) for a in flat_in]

    out_rows, out_cols = N * H // 2, 2 * W * Cin             # lane-dense (16, 128) block

    # ---- advisory cost estimate ----
    flops = 0
    for (A, b, E, S) in enc_ops:
        Rc, Rn = E.shape[2], E.shape[1]
        flops += 2 * 3 * Rc * A.shape[1] * A.shape[2]        # banded conv GEMMs
        flops += 2 * 2 * Rn * Rc * A.shape[2]                # row-pool selector GEMMs
        flops += 2 * 2 * Rn * S.shape[1] * S.shape[2]        # col-pool selector GEMMs
    rows = N * H // 8
    for si, (B, d) in enumerate(dec_ops):
        flops += 2 * 2 * rows * B.shape[1] * B.shape[2]      # deconv GEMMs
        if si < len(dec_ops) - 1:
            flops += 2 * 2 * (2 * rows) * rows * B.shape[2]  # row-expansion GEMMs
        rows *= 2
    bytes_accessed = (sum(int(a.size) * a.dtype.itemsize for a in flat_in)
                      + out_rows * out_cols * 4)

    out = pl.pallas_call(
        _cae_fused_kernel,
        grid=(1,),
        in_specs=in_specs,
        out_specs=pl.BlockSpec((out_rows, out_cols), lambda i: (0, 0)),
        out_shape=jax.ShapeDtypeStruct((out_rows, out_cols), jnp.float32),
        compiler_params=pltpu.CompilerParams(dimension_semantics=("arbitrary",)),
        cost_estimate=pl.CostEstimate(flops=int(flops),
                                      transcendentals=int(out_rows * out_cols),
                                      bytes_accessed=int(bytes_accessed)),
    )(*flat_in)

    # undo the even/odd lane pairing of the final block and restore NCHW
    out = out.reshape(N, H // 2, 2, W, Cin).reshape(N, H, W, Cin)
    return jnp.transpose(out, (0, 3, 1, 2))


# ------------------------------------------------------------------ params

def init_params(key, n_input_channels):
    enc_dims = [(n_input_channels, 32), (32, 16), (16, 8)]
    dec_dims = [(8, 16), (16, 32), (32, n_input_channels)]
    keys = jax.random.split(key, 2 * (len(enc_dims) + len(dec_dims)))
    enc, dec = [], []
    k = 0
    for cin, cout in enc_dims:
        w = 0.1 * jax.random.normal(keys[k], (cout, cin, 3, 3), jnp.float32); k += 1
        b = 0.05 * jax.random.normal(keys[k], (cout,), jnp.float32); k += 1
        enc.append((w, b))
    for cin, cout in dec_dims:
        w = 0.1 * jax.random.normal(keys[k], (cin, cout, 2, 2), jnp.float32); k += 1
        b = 0.05 * jax.random.normal(keys[k], (cout,), jnp.float32); k += 1
        dec.append((w, b))
    return {"enc": enc, "dec": dec}


# ------------------------------------------------------------------ reference (for checking)

def ref_forward(x_nchw, params):
    x = jnp.transpose(x_nchw, (0, 2, 3, 1)).astype(jnp.float32)
    for w, b in params["enc"]:
        wf = jnp.transpose(w, (2, 3, 1, 0))  # OIHW -> HWIO
        y = lax.conv_general_dilated(x, wf, (1, 1), "SAME",
                                     dimension_numbers=("NHWC", "HWIO", "NHWC"))
        x = jax.nn.relu(y + b)
        x = lax.reduce_window(x, -jnp.inf, lax.max,
                              (1, 2, 2, 1), (1, 2, 2, 1), "VALID")
    x = np.asarray(x)
    dec = params["dec"]
    for idx, (w, b) in enumerate(dec):
        wnp = np.asarray(w); bnp = np.asarray(b)
        N, H, W, Ci = x.shape
        Co = wnp.shape[1]
        out = np.broadcast_to(bnp, (N, 2 * H, 2 * W, Co)).astype(np.float32).copy()
        for i in range(H):
            for j in range(W):
                for a in range(2):
                    for bb in range(2):
                        out[:, 2 * i + a, 2 * j + bb, :] += x[:, i, j, :] @ wnp[:, :, a, bb]
        if idx == len(dec) - 1:
            x = 1.0 / (1.0 + np.exp(-out))
        else:
            x = np.maximum(out, 0.0)
    return np.transpose(x, (0, 3, 1, 2))


# ------------------------------------------------------------------ main

if __name__ == "__main__":
    n_input_channels = 4
    key = jax.random.PRNGKey(0)
    pkey, xkey = jax.random.split(key)

    params = init_params(pkey, n_input_channels)
    x = jax.random.uniform(xkey, (2, n_input_channels, 16, 16), dtype=jnp.float32)

    fwd = jax.jit(lambda inp: conv_autoencoder_forward(inp, params))
    out = jax.block_until_ready(fwd(x))

    assert out.shape == (2, n_input_channels, 16, 16)
    ref = ref_forward(x, params)
    np.testing.assert_allclose(np.asarray(out), ref, rtol=1e-4, atol=5e-5)

    print("KERNEL_OK")
</pallas_src>

<mosaic_0001>
module attributes {stable_mosaic.version = 11 : i64} {
  func.func @_cae_fused_kernel(%arg0: i32, %arg1: memref<36x72xf32, #tpu.memory_space<vmem>>, %arg2: memref<3x72x512xf32, #tpu.memory_space<vmem>>, %arg3: memref<1x512xf32, #tpu.memory_space<vmem>>, %arg4: memref<2x20x34xbf16, #tpu.memory_space<vmem>>, %arg5: memref<2x512x320xbf16, #tpu.memory_space<vmem>>, %arg6: memref<3x320x128xf32, #tpu.memory_space<vmem>>, %arg7: memref<1x128xf32, #tpu.memory_space<vmem>>, %arg8: memref<2x12x18xbf16, #tpu.memory_space<vmem>>, %arg9: memref<2x128x96xbf16, #tpu.memory_space<vmem>>, %arg10: memref<3x96x32xf32, #tpu.memory_space<vmem>>, %arg11: memref<1x32xf32, #tpu.memory_space<vmem>>, %arg12: memref<2x4x10xbf16, #tpu.memory_space<vmem>>, %arg13: memref<2x32x16xbf16, #tpu.memory_space<vmem>>, %arg14: memref<2x16x64xf32, #tpu.memory_space<vmem>>, %arg15: memref<1x64xf32, #tpu.memory_space<vmem>>, %arg16: memref<2x8x4xbf16, #tpu.memory_space<vmem>>, %arg17: memref<2x64x256xf32, #tpu.memory_space<vmem>>, %arg18: memref<1x256xf32, #tpu.memory_space<vmem>>, %arg19: memref<2x16x8xbf16, #tpu.memory_space<vmem>>, %arg20: memref<2x256x64xf32, #tpu.memory_space<vmem>>, %arg21: memref<1x64xf32, #tpu.memory_space<vmem>>, %arg22: memref<16x128xf32, #tpu.memory_space<vmem>>) attributes {dimension_semantics = [#tpu.dimension_semantics<arbitrary>], iteration_bounds = array<i64: 1>, scalar_prefetch = 0 : i64, scratch_operands = 0 : i64, tpu.core_type = #tpu.core_type<tc>, window_params = [{pipeline_mode = #tpu.pipeline_mode<synchronous>, transform_indices = @transform_0, window_bounds = array<i64: 36, 72>}, {pipeline_mode = #tpu.pipeline_mode<synchronous>, transform_indices = @transform_1, window_bounds = array<i64: 3, 72, 512>}, {pipeline_mode = #tpu.pipeline_mode<synchronous>, transform_indices = @transform_2, window_bounds = array<i64: 1, 512>}, {pipeline_mode = #tpu.pipeline_mode<synchronous>, transform_indices = @transform_3, window_bounds = array<i64: 2, 20, 34>}, {pipeline_mode = #tpu.pipeline_mode<synchronous>, transform_indices = @transform_4, window_bounds = array<i64: 2, 512, 320>}, {pipeline_mode = #tpu.pipeline_mode<synchronous>, transform_indices = @transform_5, window_bounds = array<i64: 3, 320, 128>}, {pipeline_mode = #tpu.pipeline_mode<synchronous>, transform_indices = @transform_6, window_bounds = array<i64: 1, 128>}, {pipeline_mode = #tpu.pipeline_mode<synchronous>, transform_indices = @transform_7, window_bounds = array<i64: 2, 12, 18>}, {pipeline_mode = #tpu.pipeline_mode<synchronous>, transform_indices = @transform_8, window_bounds = array<i64: 2, 128, 96>}, {pipeline_mode = #tpu.pipeline_mode<synchronous>, transform_indices = @transform_9, window_bounds = array<i64: 3, 96, 32>}, {pipeline_mode = #tpu.pipeline_mode<synchronous>, transform_indices = @transform_10, window_bounds = array<i64: 1, 32>}, {pipeline_mode = #tpu.pipeline_mode<synchronous>, transform_indices = @transform_11, window_bounds = array<i64: 2, 4, 10>}, {pipeline_mode = #tpu.pipeline_mode<synchronous>, transform_indices = @transform_12, window_bounds = array<i64: 2, 32, 16>}, {pipeline_mode = #tpu.pipeline_mode<synchronous>, transform_indices = @transform_13, window_bounds = array<i64: 2, 16, 64>}, {pipeline_mode = #tpu.pipeline_mode<synchronous>, transform_indices = @transform_14, window_bounds = array<i64: 1, 64>}, {pipeline_mode = #tpu.pipeline_mode<synchronous>, transform_indices = @transform_15, window_bounds = array<i64: 2, 8, 4>}, {pipeline_mode = #tpu.pipeline_mode<synchronous>, transform_indices = @transform_16, window_bounds = array<i64: 2, 64, 256>}, {pipeline_mode = #tpu.pipeline_mode<synchronous>, transform_indices = @transform_17, window_bounds = array<i64: 1, 256>}, {pipeline_mode = #tpu.pipeline_mode<synchronous>, transform_indices = @transform_18, window_bounds = array<i64: 2, 16, 8>}, {pipeline_mode = #tpu.pipeline_mode<synchronous>, transform_indices = @transform_19, window_bounds = array<i64: 2, 256, 64>}, {pipeline_mode = #tpu.pipeline_mode<synchronous>, transform_indices = @transform_20, window_bounds = array<i64: 1, 64>}, {pipeline_mode = #tpu.pipeline_mode<synchronous>, transform_indices = @transform_21, window_bounds = array<i64: 16, 128>}]} {
    %c0 = arith.constant 0 : index
    %c0_0 = arith.constant 0 : index
    %0 = vector.load %arg1[%c0, %c0_0] : memref<36x72xf32, #tpu.memory_space<vmem>>, vector<34x72xf32>
    %c0_1 = arith.constant 0 : index
    %c0_2 = arith.constant 0 : index
    %c0_3 = arith.constant 0 : index
    %1 = vector.load %arg2[%c0_1, %c0_2, %c0_3] : memref<3x72x512xf32, #tpu.memory_space<vmem>>, vector<1x72x512xf32>
    %2 = vector.shape_cast %1 : vector<1x72x512xf32> to vector<72x512xf32>
    %cst = arith.constant dense<0.000000e+00> : vector<34x512xf32>
    %3 = tpu.matmul %0, %2, %cst {dimension_numbers = #tpu.dot_dimension_numbers<[1], [0], [0], [1], [0, 0, 1, 1], [], []>} : vector<34x72xf32>, vector<72x512xf32>, vector<34x512xf32> -> vector<34x512xf32>
    %c1 = arith.constant 1 : index
    %c0_4 = arith.constant 0 : index
    %4 = vector.load %arg1[%c1, %c0_4] : memref<36x72xf32, #tpu.memory_space<vmem>>, vector<34x72xf32>
    %c1_5 = arith.constant 1 : index
    %c0_6 = arith.constant 0 : index
    %c0_7 = arith.constant 0 : index
    %5 = vector.load %arg2[%c1_5, %c0_6, %c0_7] : memref<3x72x512xf32, #tpu.memory_space<vmem>>, vector<1x72x512xf32>
    %6 = vector.shape_cast %5 : vector<1x72x512xf32> to vector<72x512xf32>
    %cst_8 = arith.constant dense<0.000000e+00> : vector<34x512xf32>
    %7 = tpu.matmul %4, %6, %cst_8 {dimension_numbers = #tpu.dot_dimension_numbers<[1], [0], [0], [1], [0, 0, 1, 1], [], []>} : vector<34x72xf32>, vector<72x512xf32>, vector<34x512xf32> -> vector<34x512xf32>
    %8 = arith.addf %3, %7 : vector<34x512xf32>
    %c2 = arith.constant 2 : index
    %c0_9 = arith.constant 0 : index
    %9 = vector.load %arg1[%c2, %c0_9] : memref<36x72xf32, #tpu.memory_space<vmem>>, vector<34x72xf32>
    %c2_10 = arith.constant 2 : index
    %c0_11 = arith.constant 0 : index
    %c0_12 = arith.constant 0 : index
    %10 = vector.load %arg2[%c2_10, %c0_11, %c0_12] : memref<3x72x512xf32, #tpu.memory_space<vmem>>, vector<1x72x512xf32>
    %11 = vector.shape_cast %10 : vector<1x72x512xf32> to vector<72x512xf32>
    %cst_13 = arith.constant dense<0.000000e+00> : vector<34x512xf32>
    %12 = tpu.matmul %9, %11, %cst_13 {dimension_numbers = #tpu.dot_dimension_numbers<[1], [0], [0], [1], [0, 0, 1, 1], [], []>} : vector<34x72xf32>, vector<72x512xf32>, vector<34x512xf32> -> vector<34x512xf32>
    %13 = arith.addf %8, %12 : vector<34x512xf32>
    %c0_14 = arith.constant 0 : index
    %c0_15 = arith.constant 0 : index
    %14 = vector.load %arg3[%c0_14, %c0_15] : memref<1x512xf32, #tpu.memory_space<vmem>>, vector<1x512xf32>
    %15 = vector.broadcast %14 : vector<1x512xf32> to vector<34x512xf32>
    %16 = arith.addf %13, %15 : vector<34x512xf32>
    %cst_16 = arith.constant 0.000000e+00 : f32
    %17 = vector.broadcast %cst_16 : f32 to vector<34x512xf32>
    %18 = arith.maximumf %16, %17 : vector<34x512xf32>
    %c0_17 = arith.constant 0 : index
    %c0_18 = arith.constant 0 : index
    %c0_19 = arith.constant 0 : index
    %19 = vector.load %arg4[%c0_17, %c0_18, %c0_19] : memref<2x20x34xbf16, #tpu.memory_space<vmem>>, vector<1x20x34xbf16>
    %20 = vector.shape_cast %19 : vector<1x20x34xbf16> to vector<20x34xbf16>
    %21 = arith.extf %20 : vector<20x34xbf16> to vector<20x34xf32>
    %cst_20 = arith.constant dense<0.000000e+00> : vector<20x512xf32>
    %22 = tpu.matmul %21, %18, %cst_20 {dimension_numbers = #tpu.dot_dimension_numbers<[1], [0], [0], [1], [0, 0, 1, 1], [], []>} : vector<20x34xf32>, vector<34x512xf32>, vector<20x512xf32> -> vector<20x512xf32>
    %c1_21 = arith.constant 1 : index
    %c0_22 = arith.constant 0 : index
    %c0_23 = arith.constant 0 : index
    %23 = vector.load %arg4[%c1_21, %c0_22, %c0_23] : memref<2x20x34xbf16, #tpu.memory_space<vmem>>, vector<1x20x34xbf16>
    %24 = vector.shape_cast %23 : vector<1x20x34xbf16> to vector<20x34xbf16>
    %25 = arith.extf %24 : vector<20x34xbf16> to vector<20x34xf32>
    %cst_24 = arith.constant dense<0.000000e+00> : vector<20x512xf32>
    %26 = tpu.matmul %25, %18, %cst_24 {dimension_numbers = #tpu.dot_dimension_numbers<[1], [0], [0], [1], [0, 0, 1, 1], [], []>} : vector<20x34xf32>, vector<34x512xf32>, vector<20x512xf32> -> vector<20x512xf32>
    %27 = arith.maximumf %22, %26 : vector<20x512xf32>
    %c0_25 = arith.constant 0 : index
    %c0_26 = arith.constant 0 : index
    %c0_27 = arith.constant 0 : index
    %28 = vector.load %arg5[%c0_25, %c0_26, %c0_27] : memref<2x512x320xbf16, #tpu.memory_space<vmem>>, vector<1x512x320xbf16>
    %29 = vector.shape_cast %28 : vector<1x512x320xbf16> to vector<512x320xbf16>
    %30 = arith.extf %29 : vector<512x320xbf16> to vector<512x320xf32>
    %cst_28 = arith.constant dense<0.000000e+00> : vector<20x320xf32>
    %31 = tpu.matmul %27, %30, %cst_28 {dimension_numbers = #tpu.dot_dimension_numbers<[1], [0], [0], [1], [0, 0, 1, 1], [], []>} : vector<20x512xf32>, vector<512x320xf32>, vector<20x320xf32> -> vector<20x320xf32>
    %c1_29 = arith.constant 1 : index
    %c0_30 = arith.constant 0 : index
    %c0_31 = arith.constant 0 : index
    %32 = vector.load %arg5[%c1_29, %c0_30, %c0_31] : memref<2x512x320xbf16, #tpu.memory_space<vmem>>, vector<1x512x320xbf16>
    %33 = vector.shape_cast %32 : vector<1x512x320xbf16> to vector<512x320xbf16>
    %34 = arith.extf %33 : vector<512x320xbf16> to vector<512x320xf32>
    %cst_32 = arith.constant dense<0.000000e+00> : vector<20x320xf32>
    %35 = tpu.matmul %27, %34, %cst_32 {dimension_numbers = #tpu.dot_dimension_numbers<[1], [0], [0], [1], [0, 0, 1, 1], [], []>} : vector<20x512xf32>, vector<512x320xf32>, vector<20x320xf32> -> vector<20x320xf32>
    %36 = arith.maximumf %31, %35 : vector<20x320xf32>
    %37 = vector.extract_strided_slice %36 {offsets = [0, 0], sizes = [18, 320], strides = [1, 1]} : vector<20x320xf32> to vector<18x320xf32>
    %c0_33 = arith.constant 0 : index
    %c0_34 = arith.constant 0 : index
    %c0_35 = arith.constant 0 : index
    %38 = vector.load %arg6[%c0_33, %c0_34, %c0_35] : memref<3x320x128xf32, #tpu.memory_space<vmem>>, vector<1x320x128xf32>
    %39 = vector.shape_cast %38 : vector<1x320x128xf32> to vector<320x128xf32>
    %cst_36 = arith.constant dense<0.000000e+00> : vector<18x128xf32>
    %40 = tpu.matmul %37, %39, %cst_36 {dimension_numbers = #tpu.dot_dimension_numbers<[1], [0], [0], [1], [0, 0, 1, 1], [], []>} : vector<18x320xf32>, vector<320x128xf32>, vector<18x128xf32> -> vector<18x128xf32>
    %41 = vector.extract_strided_slice %36 {offsets = [1, 0], sizes = [18, 320], strides = [1, 1]} : vector<20x320xf32> to vector<18x320xf32>
    %c1_37 = arith.constant 1 : index
    %c0_38 = arith.constant 0 : index
    %c0_39 = arith.constant 0 : index
    %42 = vector.load %arg6[%c1_37, %c0_38, %c0_39] : memref<3x320x128xf32, #tpu.memory_space<vmem>>, vector<1x320x128xf32>
    %43 = vector.shape_cast %42 : vector<1x320x128xf32> to vector<320x128xf32>
    %cst_40 = arith.constant dense<0.000000e+00> : vector<18x128xf32>
    %44 = tpu.matmul %41, %43, %cst_40 {dimension_numbers = #tpu.dot_dimension_numbers<[1], [0], [0], [1], [0, 0, 1, 1], [], []>} : vector<18x320xf32>, vector<320x128xf32>, vector<18x128xf32> -> vector<18x128xf32>
    %45 = arith.addf %40, %44 : vector<18x128xf32>
    %46 = vector.extract_strided_slice %36 {offsets = [2, 0], sizes = [18, 320], strides = [1, 1]} : vector<20x320xf32> to vector<18x320xf32>
    %c2_41 = arith.constant 2 : index
    %c0_42 = arith.constant 0 : index
    %c0_43 = arith.constant 0 : index
    %47 = vector.load %arg6[%c2_41, %c0_42, %c0_43] : memref<3x320x128xf32, #tpu.memory_space<vmem>>, vector<1x320x128xf32>
    %48 = vector.shape_cast %47 : vector<1x320x128xf32> to vector<320x128xf32>
    %cst_44 = arith.constant dense<0.000000e+00> : vector<18x128xf32>
    %49 = tpu.matmul %46, %48, %cst_44 {dimension_numbers = #tpu.dot_dimension_numbers<[1], [0], [0], [1], [0, 0, 1, 1], [], []>} : vector<18x320xf32>, vector<320x128xf32>, vector<18x128xf32> -> vector<18x128xf32>
    %50 = arith.addf %45, %49 : vector<18x128xf32>
    %c0_45 = arith.constant 0 : index
    %c0_46 = arith.constant 0 : index
    %51 = vector.load %arg7[%c0_45, %c0_46] : memref<1x128xf32, #tpu.memory_space<vmem>>, vector<1x128xf32>
    %52 = vector.broadcast %51 : vector<1x128xf32> to vector<18x128xf32>
    %53 = arith.addf %50, %52 : vector<18x128xf32>
    %cst_47 = arith.constant 0.000000e+00 : f32
    %54 = vector.broadcast %cst_47 : f32 to vector<18x128xf32>
    %55 = arith.maximumf %53, %54 : vector<18x128xf32>
    %c0_48 = arith.constant 0 : index
    %c0_49 = arith.constant 0 : index
    %c0_50 = arith.constant 0 : index
    %56 = vector.load %arg8[%c0_48, %c0_49, %c0_50] : memref<2x12x18xbf16, #tpu.memory_space<vmem>>, vector<1x12x18xbf16>
    %57 = vector.shape_cast %56 : vector<1x12x18xbf16> to vector<12x18xbf16>
    %58 = arith.extf %57 : vector<12x18xbf16> to vector<12x18xf32>
    %cst_51 = arith.constant dense<0.000000e+00> : vector<12x128xf32>
    %59 = tpu.matmul %58, %55, %cst_51 {dimension_numbers = #tpu.dot_dimension_numbers<[1], [0], [0], [1], [0, 0, 1, 1], [], []>} : vector<12x18xf32>, vector<18x128xf32>, vector<12x128xf32> -> vector<12x128xf32>
    %c1_52 = arith.constant 1 : index
    %c0_53 = arith.constant 0 : index
    %c0_54 = arith.constant 0 : index
    %60 = vector.load %arg8[%c1_52, %c0_53, %c0_54] : memref<2x12x18xbf16, #tpu.memory_space<vmem>>, vector<1x12x18xbf16>
    %61 = vector.shape_cast %60 : vector<1x12x18xbf16> to vector<12x18xbf16>
    %62 = arith.extf %61 : vector<12x18xbf16> to vector<12x18xf32>
    %cst_55 = arith.constant dense<0.000000e+00> : vector<12x128xf32>
    %63 = tpu.matmul %62, %55, %cst_55 {dimension_numbers = #tpu.dot_dimension_numbers<[1], [0], [0], [1], [0, 0, 1, 1], [], []>} : vector<12x18xf32>, vector<18x128xf32>, vector<12x128xf32> -> vector<12x128xf32>
    %64 = arith.maximumf %59, %63 : vector<12x128xf32>
    %c0_56 = arith.constant 0 : index
    %c0_57 = arith.constant 0 : index
    %c0_58 = arith.constant 0 : index
    %65 = vector.load %arg9[%c0_56, %c0_57, %c0_58] : memref<2x128x96xbf16, #tpu.memory_space<vmem>>, vector<1x128x96xbf16>
    %66 = vector.shape_cast %65 : vector<1x128x96xbf16> to vector<128x96xbf16>
    %67 = arith.extf %66 : vector<128x96xbf16> to vector<128x96xf32>
    %cst_59 = arith.constant dense<0.000000e+00> : vector<12x96xf32>
    %68 = tpu.matmul %64, %67, %cst_59 {dimension_numbers = #tpu.dot_dimension_numbers<[1], [0], [0], [1], [0, 0, 1, 1], [], []>} : vector<12x128xf32>, vector<128x96xf32>, vector<12x96xf32> -> vector<12x96xf32>
    %c1_60 = arith.constant 1 : index
    %c0_61 = arith.constant 0 : index
    %c0_62 = arith.constant 0 : index
    %69 = vector.load %arg9[%c1_60, %c0_61, %c0_62] : memref<2x128x96xbf16, #tpu.memory_space<vmem>>, vector<1x128x96xbf16>
    %70 = vector.shape_cast %69 : vector<1x128x96xbf16> to vector<128x96xbf16>
    %71 = arith.extf %70 : vector<128x96xbf16> to vector<128x96xf32>
    %cst_63 = arith.constant dense<0.000000e+00> : vector<12x96xf32>
    %72 = tpu.matmul %64, %71, %cst_63 {dimension_numbers = #tpu.dot_dimension_numbers<[1], [0], [0], [1], [0, 0, 1, 1], [], []>} : vector<12x128xf32>, vector<128x96xf32>, vector<12x96xf32> -> vector<12x96xf32>
    %73 = arith.maximumf %68, %72 : vector<12x96xf32>
    %74 = vector.extract_strided_slice %73 {offsets = [0, 0], sizes = [10, 96], strides = [1, 1]} : vector<12x96xf32> to vector<10x96xf32>
    %c0_64 = arith.constant 0 : index
    %c0_65 = arith.constant 0 : index
    %c0_66 = arith.constant 0 : index
    %75 = vector.load %arg10[%c0_64, %c0_65, %c0_66] : memref<3x96x32xf32, #tpu.memory_space<vmem>>, vector<1x96x32xf32>
    %76 = vector.shape_cast %75 : vector<1x96x32xf32> to vector<96x32xf32>
    %cst_67 = arith.constant dense<0.000000e+00> : vector<10x32xf32>
    %77 = tpu.matmul %74, %76, %cst_67 {dimension_numbers = #tpu.dot_dimension_numbers<[1], [0], [0], [1], [0, 0, 1, 1], [], []>} : vector<10x96xf32>, vector<96x32xf32>, vector<10x32xf32> -> vector<10x32xf32>
    %78 = vector.extract_strided_slice %73 {offsets = [1, 0], sizes = [10, 96], strides = [1, 1]} : vector<12x96xf32> to vector<10x96xf32>
    %c1_68 = arith.constant 1 : index
    %c0_69 = arith.constant 0 : index
    %c0_70 = arith.constant 0 : index
    %79 = vector.load %arg10[%c1_68, %c0_69, %c0_70] : memref<3x96x32xf32, #tpu.memory_space<vmem>>, vector<1x96x32xf32>
    %80 = vector.shape_cast %79 : vector<1x96x32xf32> to vector<96x32xf32>
    %cst_71 = arith.constant dense<0.000000e+00> : vector<10x32xf32>
    %81 = tpu.matmul %78, %80, %cst_71 {dimension_numbers = #tpu.dot_dimension_numbers<[1], [0], [0], [1], [0, 0, 1, 1], [], []>} : vector<10x96xf32>, vector<96x32xf32>, vector<10x32xf32> -> vector<10x32xf32>
    %82 = arith.addf %77, %81 : vector<10x32xf32>
    %83 = vector.extract_strided_slice %73 {offsets = [2, 0], sizes = [10, 96], strides = [1, 1]} : vector<12x96xf32> to vector<10x96xf32>
    %c2_72 = arith.constant 2 : index
    %c0_73 = arith.constant 0 : index
    %c0_74 = arith.constant 0 : index
    %84 = vector.load %arg10[%c2_72, %c0_73, %c0_74] : memref<3x96x32xf32, #tpu.memory_space<vmem>>, vector<1x96x32xf32>
    %85 = vector.shape_cast %84 : vector<1x96x32xf32> to vector<96x32xf32>
    %cst_75 = arith.constant dense<0.000000e+00> : vector<10x32xf32>
    %86 = tpu.matmul %83, %85, %cst_75 {dimension_numbers = #tpu.dot_dimension_numbers<[1], [0], [0], [1], [0, 0, 1, 1], [], []>} : vector<10x96xf32>, vector<96x32xf32>, vector<10x32xf32> -> vector<10x32xf32>
    %87 = arith.addf %82, %86 : vector<10x32xf32>
    %c0_76 = arith.constant 0 : index
    %c0_77 = arith.constant 0 : index
    %88 = vector.load %arg11[%c0_76, %c0_77] : memref<1x32xf32, #tpu.memory_space<vmem>>, vector<1x32xf32>
    %89 = vector.broadcast %88 : vector<1x32xf32> to vector<10x32xf32>
    %90 = arith.addf %87, %89 : vector<10x32xf32>
    %cst_78 = arith.constant 0.000000e+00 : f32
    %91 = vector.broadcast %cst_78 : f32 to vector<10x32xf32>
    %92 = arith.maximumf %90, %91 : vector<10x32xf32>
    %c0_79 = arith.constant 0 : index
    %c0_80 = arith.constant 0 : index
    %c0_81 = arith.constant 0 : index
    %93 = vector.load %arg12[%c0_79, %c0_80, %c0_81] : memref<2x4x10xbf16, #tpu.memory_space<vmem>>, vector<1x4x10xbf16>
    %94 = vector.shape_cast %93 : vector<1x4x10xbf16> to vector<4x10xbf16>
    %95 = arith.extf %94 : vector<4x10xbf16> to vector<4x10xf32>
    %cst_82 = arith.constant dense<0.000000e+00> : vector<4x32xf32>
    %96 = tpu.matmul %95, %92, %cst_82 {dimension_numbers = #tpu.dot_dimension_numbers<[1], [0], [0], [1], [0, 0, 1, 1], [], []>} : vector<4x10xf32>, vector<10x32xf32>, vector<4x32xf32> -> vector<4x32xf32>
    %c1_83 = arith.constant 1 : index
    %c0_84 = arith.constant 0 : index
    %c0_85 = arith.constant 0 : index
    %97 = vector.load %arg12[%c1_83, %c0_84, %c0_85] : memref<2x4x10xbf16, #tpu.memory_space<vmem>>, vector<1x4x10xbf16>
    %98 = vector.shape_cast %97 : vector<1x4x10xbf16> to vector<4x10xbf16>
    %99 = arith.extf %98 : vector<4x10xbf16> to vector<4x10xf32>
    %cst_86 = arith.constant dense<0.000000e+00> : vector<4x32xf32>
    %100 = tpu.matmul %99, %92, %cst_86 {dimension_numbers = #tpu.dot_dimension_numbers<[1], [0], [0], [1], [0, 0, 1, 1], [], []>} : vector<4x10xf32>, vector<10x32xf32>, vector<4x32xf32> -> vector<4x32xf32>
    %101 = arith.maximumf %96, %100 : vector<4x32xf32>
    %c0_87 = arith.constant 0 : index
    %c0_88 = arith.constant 0 : index
    %c0_89 = arith.constant 0 : index
    %102 = vector.load %arg13[%c0_87, %c0_88, %c0_89] : memref<2x32x16xbf16, #tpu.memory_space<vmem>>, vector<1x32x16xbf16>
    %103 = vector.shape_cast %102 : vector<1x32x16xbf16> to vector<32x16xbf16>
    %104 = arith.extf %103 : vector<32x16xbf16> to vector<32x16xf32>
    %cst_90 = arith.constant dense<0.000000e+00> : vector<4x16xf32>
    %105 = tpu.matmul %101, %104, %cst_90 {dimension_numbers = #tpu.dot_dimension_numbers<[1], [0], [0], [1], [0, 0, 1, 1], [], []>} : vector<4x32xf32>, vector<32x16xf32>, vector<4x16xf32> -> vector<4x16xf32>
    %c1_91 = arith.constant 1 : index
    %c0_92 = arith.constant 0 : index
    %c0_93 = arith.constant 0 : index
    %106 = vector.load %arg13[%c1_91, %c0_92, %c0_93] : memref<2x32x16xbf16, #tpu.memory_space<vmem>>, vector<1x32x16xbf16>
    %107 = vector.shape_cast %106 : vector<1x32x16xbf16> to vector<32x16xbf16>
    %108 = arith.extf %107 : vector<32x16xbf16> to vector<32x16xf32>
    %cst_94 = arith.constant dense<0.000000e+00> : vector<4x16xf32>
    %109 = tpu.matmul %101, %108, %cst_94 {dimension_numbers = #tpu.dot_dimension_numbers<[1], [0], [0], [1], [0, 0, 1, 1], [], []>} : vector<4x32xf32>, vector<32x16xf32>, vector<4x16xf32> -> vector<4x16xf32>
    %110 = arith.maximumf %105, %109 : vector<4x16xf32>
    %c0_95 = arith.constant 0 : index
    %c0_96 = arith.constant 0 : index
    %c0_97 = arith.constant 0 : index
    %111 = vector.load %arg14[%c0_95, %c0_96, %c0_97] : memref<2x16x64xf32, #tpu.memory_space<vmem>>, vector<1x16x64xf32>
    %112 = vector.shape_cast %111 : vector<1x16x64xf32> to vector<16x64xf32>
    %cst_98 = arith.constant dense<0.000000e+00> : vector<4x64xf32>
    %113 = tpu.matmul %110, %112, %cst_98 {dimension_numbers = #tpu.dot_dimension_numbers<[1], [0], [0], [1], [0, 0, 1, 1], [], []>} : vector<4x16xf32>, vector<16x64xf32>, vector<4x64xf32> -> vector<4x64xf32>
    %c1_99 = arith.constant 1 : index
    %c0_100 = arith.constant 0 : index
    %c0_101 = arith.constant 0 : index
    %114 = vector.load %arg14[%c1_99, %c0_100, %c0_101] : memref<2x16x64xf32, #tpu.memory_space<vmem>>, vector<1x16x64xf32>
    %115 = vector.shape_cast %114 : vector<1x16x64xf32> to vector<16x64xf32>
    %cst_102 = arith.constant dense<0.000000e+00> : vector<4x64xf32>
    %116 = tpu.matmul %110, %115, %cst_102 {dimension_numbers = #tpu.dot_dimension_numbers<[1], [0], [0], [1], [0, 0, 1, 1], [], []>} : vector<4x16xf32>, vector<16x64xf32>, vector<4x64xf32> -> vector<4x64xf32>
    %c0_103 = arith.constant 0 : index
    %c0_104 = arith.constant 0 : index
    %c0_105 = arith.constant 0 : index
    %117 = vector.load %arg16[%c0_103, %c0_104, %c0_105] : memref<2x8x4xbf16, #tpu.memory_space<vmem>>, vector<1x8x4xbf16>
    %118 = vector.shape_cast %117 : vector<1x8x4xbf16> to vector<8x4xbf16>
    %119 = arith.extf %118 : vector<8x4xbf16> to vector<8x4xf32>
    %cst_106 = arith.constant dense<0.000000e+00> : vector<8x64xf32>
    %120 = tpu.matmul %119, %113, %cst_106 {dimension_numbers = #tpu.dot_dimension_numbers<[1], [0], [0], [1], [0, 0, 1, 1], [], []>} : vector<8x4xf32>, vector<4x64xf32>, vector<8x64xf32> -> vector<8x64xf32>
    %c1_107 = arith.constant 1 : index
    %c0_108 = arith.constant 0 : index
    %c0_109 = arith.constant 0 : index
    %121 = vector.load %arg16[%c1_107, %c0_108, %c0_109] : memref<2x8x4xbf16, #tpu.memory_space<vmem>>, vector<1x8x4xbf16>
    %122 = vector.shape_cast %121 : vector<1x8x4xbf16> to vector<8x4xbf16>
    %123 = arith.extf %122 : vector<8x4xbf16> to vector<8x4xf32>
    %cst_110 = arith.constant dense<0.000000e+00> : vector<8x64xf32>
    %124 = tpu.matmul %123, %116, %cst_110 {dimension_numbers = #tpu.dot_dimension_numbers<[1], [0], [0], [1], [0, 0, 1, 1], [], []>} : vector<8x4xf32>, vector<4x64xf32>, vector<8x64xf32> -> vector<8x64xf32>
    %125 = arith.addf %120, %124 : vector<8x64xf32>
    %c0_111 = arith.constant 0 : index
    %c0_112 = arith.constant 0 : index
    %126 = vector.load %arg15[%c0_111, %c0_112] : memref<1x64xf32, #tpu.memory_space<vmem>>, vector<1x64xf32>
    %127 = vector.broadcast %126 : vector<1x64xf32> to vector<8x64xf32>
    %128 = arith.addf %125, %127 : vector<8x64xf32>
    %cst_113 = arith.constant 0.000000e+00 : f32
    %129 = vector.broadcast %cst_113 : f32 to vector<8x64xf32>
    %130 = arith.maximumf %128, %129 : vector<8x64xf32>
    %c0_114 = arith.constant 0 : index
    %c0_115 = arith.constant 0 : index
    %c0_116 = arith.constant 0 : index
    %131 = vector.load %arg17[%c0_114, %c0_115, %c0_116] : memref<2x64x256xf32, #tpu.memory_space<vmem>>, vector<1x64x256xf32>
    %132 = vector.shape_cast %131 : vector<1x64x256xf32> to vector<64x256xf32>
    %cst_117 = arith.constant dense<0.000000e+00> : vector<8x256xf32>
    %133 = tpu.matmul %130, %132, %cst_117 {dimension_numbers = #tpu.dot_dimension_numbers<[1], [0], [0], [1], [0, 0, 1, 1], [], []>} : vector<8x64xf32>, vector<64x256xf32>, vector<8x256xf32> -> vector<8x256xf32>
    %c1_118 = arith.constant 1 : index
    %c0_119 = arith.constant 0 : index
    %c0_120 = arith.constant 0 : index
    %134 = vector.load %arg17[%c1_118, %c0_119, %c0_120] : memref<2x64x256xf32, #tpu.memory_space<vmem>>, vector<1x64x256xf32>
    %135 = vector.shape_cast %134 : vector<1x64x256xf32> to vector<64x256xf32>
    %cst_121 = arith.constant dense<0.000000e+00> : vector<8x256xf32>
    %136 = tpu.matmul %130, %135, %cst_121 {dimension_numbers = #tpu.dot_dimension_numbers<[1], [0], [0], [1], [0, 0, 1, 1], [], []>} : vector<8x64xf32>, vector<64x256xf32>, vector<8x256xf32> -> vector<8x256xf32>
    %c0_122 = arith.constant 0 : index
    %c0_123 = arith.constant 0 : index
    %c0_124 = arith.constant 0 : index
    %137 = vector.load %arg19[%c0_122, %c0_123, %c0_124] : memref<2x16x8xbf16, #tpu.memory_space<vmem>>, vector<1x16x8xbf16>
    %138 = vector.shape_cast %137 : vector<1x16x8xbf16> to vector<16x8xbf16>
    %139 = arith.extf %138 : vector<16x8xbf16> to vector<16x8xf32>
    %cst_125 = arith.constant dense<0.000000e+00> : vector<16x256xf32>
    %140 = tpu.matmul %139, %133, %cst_125 {dimension_numbers = #tpu.dot_dimension_numbers<[1], [0], [0], [1], [0, 0, 1, 1], [], []>} : vector<16x8xf32>, vector<8x256xf32>, vector<16x256xf32> -> vector<16x256xf32>
    %c1_126 = arith.constant 1 : index
    %c0_127 = arith.constant 0 : index
    %c0_128 = arith.constant 0 : index
    %141 = vector.load %arg19[%c1_126, %c0_127, %c0_128] : memref<2x16x8xbf16, #tpu.memory_space<vmem>>, vector<1x16x8xbf16>
    %142 = vector.shape_cast %141 : vector<1x16x8xbf16> to vector<16x8xbf16>
    %143 = arith.extf %142 : vector<16x8xbf16> to vector<16x8xf32>
    %cst_129 = arith.constant dense<0.000000e+00> : vector<16x256xf32>
    %144 = tpu.matmul %143, %136, %cst_129 {dimension_numbers = #tpu.dot_dimension_numbers<[1], [0], [0], [1], [0, 0, 1, 1], [], []>} : vector<16x8xf32>, vector<8x256xf32>, vector<16x256xf32> -> vector<16x256xf32>
    %145 = arith.addf %140, %144 : vector<16x256xf32>
    %c0_130 = arith.constant 0 : index
    %c0_131 = arith.constant 0 : index
    %146 = vector.load %arg18[%c0_130, %c0_131] : memref<1x256xf32, #tpu.memory_space<vmem>>, vector<1x256xf32>
    %147 = vector.broadcast %146 : vector<1x256xf32> to vector<16x256xf32>
    %148 = arith.addf %145, %147 : vector<16x256xf32>
    %cst_132 = arith.constant 0.000000e+00 : f32
    %149 = vector.broadcast %cst_132 : f32 to vector<16x256xf32>
    %150 = arith.maximumf %148, %149 : vector<16x256xf32>
    %c0_133 = arith.constant 0 : index
    %c0_134 = arith.constant 0 : index
    %c0_135 = arith.constant 0 : index
    %151 = vector.load %arg20[%c0_133, %c0_134, %c0_135] : memref<2x256x64xf32, #tpu.memory_space<vmem>>, vector<1x256x64xf32>
    %152 = vector.shape_cast %151 : vector<1x256x64xf32> to vector<256x64xf32>
    %cst_136 = arith.constant dense<0.000000e+00> : vector<16x64xf32>
    %153 = tpu.matmul %150, %152, %cst_136 {dimension_numbers = #tpu.dot_dimension_numbers<[1], [0], [0], [1], [0, 0, 1, 1], [], []>} : vector<16x256xf32>, vector<256x64xf32>, vector<16x64xf32> -> vector<16x64xf32>
    %c0_137 = arith.constant 0 : index
    %c0_138 = arith.constant 0 : index
    %154 = vector.load %arg21[%c0_137, %c0_138] : memref<1x64xf32, #tpu.memory_space<vmem>>, vector<1x64xf32>
    %155 = vector.broadcast %154 : vector<1x64xf32> to vector<16x64xf32>
    %156 = arith.addf %153, %155 : vector<16x64xf32>
    %c1_139 = arith.constant 1 : index
    %c0_140 = arith.constant 0 : index
    %c0_141 = arith.constant 0 : index
    %157 = vector.load %arg20[%c1_139, %c0_140, %c0_141] : memref<2x256x64xf32, #tpu.memory_space<vmem>>, vector<1x256x64xf32>
    %158 = vector.shape_cast %157 : vector<1x256x64xf32> to vector<256x64xf32>
    %cst_142 = arith.constant dense<0.000000e+00> : vector<16x64xf32>
    %159 = tpu.matmul %150, %158, %cst_142 {dimension_numbers = #tpu.dot_dimension_numbers<[1], [0], [0], [1], [0, 0, 1, 1], [], []>} : vector<16x256xf32>, vector<256x64xf32>, vector<16x64xf32> -> vector<16x64xf32>
    %c0_143 = arith.constant 0 : index
    %c0_144 = arith.constant 0 : index
    %160 = vector.load %arg21[%c0_143, %c0_144] : memref<1x64xf32, #tpu.memory_space<vmem>>, vector<1x64xf32>
    %161 = vector.broadcast %160 : vector<1x64xf32> to vector<16x64xf32>
    %162 = arith.addf %159, %161 : vector<16x64xf32>
    %cst_145 = arith.constant 0.000000e+00 : f32
    %163 = vector.broadcast %cst_145 : f32 to vector<16x64xf32>
    %164 = arith.subf %163, %156 : vector<16x64xf32>
    %165 = math.exp %164 : vector<16x64xf32>
    %cst_146 = arith.constant 1.000000e+00 : f32
    %166 = vector.broadcast %cst_146 : f32 to vector<16x64xf32>
    %167 = arith.addf %166, %165 : vector<16x64xf32>
    %cst_147 = arith.constant 1.000000e+00 : f32
    %168 = vector.broadcast %cst_147 : f32 to vector<16x64xf32>
    %169 = arith.divf %168, %167 : vector<16x64xf32>
    %cst_148 = arith.constant 0.000000e+00 : f32
    %170 = vector.broadcast %cst_148 : f32 to vector<16x64xf32>
    %171 = arith.subf %170, %162 : vector<16x64xf32>
    %172 = math.exp %171 : vector<16x64xf32>
    %cst_149 = arith.constant 1.000000e+00 : f32
    %173 = vector.broadcast %cst_149 : f32 to vector<16x64xf32>
    %174 = arith.addf %173, %172 : vector<16x64xf32>
    %cst_150 = arith.constant 1.000000e+00 : f32
    %175 = vector.broadcast %cst_150 : f32 to vector<16x64xf32>
    %176 = arith.divf %175, %174 : vector<16x64xf32>
    %177 = tpu.concatenate %169, %176 in 1 : vector<16x64xf32>, vector<16x64xf32> -> vector<16x128xf32>
    %c0_151 = arith.constant 0 : index
    %c0_152 = arith.constant 0 : index
    %178 = vector.load %arg22[%c0_151, %c0_152] : memref<16x128xf32, #tpu.memory_space<vmem>>, vector<16x128xf32>
    tpu.vector_store %arg22[%c0_151, %c0_152], %177 {strides = array<i32>} : memref<16x128xf32, #tpu.memory_space<vmem>>, vector<16x128xf32>,
    return
  }
  func.func @transform_0(%arg0: i32) -> (i32, i32) {
    %c0_i32 = arith.constant 0 : i32
    %c0_i32_0 = arith.constant 0 : i32
    %c0_i32_1 = arith.constant 0 : i32
    return %c0_i32, %c0_i32_0 : i32, i32
  }
  func.func @transform_1(%arg0: i32) -> (i32, i32, i32) {
    %c0_i32 = arith.constant 0 : i32
    %c0_i32_0 = arith.constant 0 : i32
    %c0_i32_1 = arith.constant 0 : i32
    %c0_i32_2 = arith.constant 0 : i32
    return %c0_i32, %c0_i32_0, %c0_i32_1 : i32, i32, i32
  }
  func.func @transform_2(%arg0: i32) -> (i32, i32) {
    %c0_i32 = arith.constant 0 : i32
    %c0_i32_0 = arith.constant 0 : i32
    %c0_i32_1 = arith.constant 0 : i32
    return %c0_i32, %c0_i32_0 : i32, i32
  }
  func.func @transform_3(%arg0: i32) -> (i32, i32, i32) {
    %c0_i32 = arith.constant 0 : i32
    %c0_i32_0 = arith.constant 0 : i32
    %c0_i32_1 = arith.constant 0 : i32
    %c0_i32_2 = arith.constant 0 : i32
    return %c0_i32, %c0_i32_0, %c0_i32_1 : i32, i32, i32
  }
  func.func @transform_4(%arg0: i32) -> (i32, i32, i32) {
    %c0_i32 = arith.constant 0 : i32
    %c0_i32_0 = arith.constant 0 : i32
    %c0_i32_1 = arith.constant 0 : i32
    %c0_i32_2 = arith.constant 0 : i32
    return %c0_i32, %c0_i32_0, %c0_i32_1 : i32, i32, i32
  }
  func.func @transform_5(%arg0: i32) -> (i32, i32, i32) {
    %c0_i32 = arith.constant 0 : i32
    %c0_i32_0 = arith.constant 0 : i32
    %c0_i32_1 = arith.constant 0 : i32
    %c0_i32_2 = arith.constant 0 : i32
    return %c0_i32, %c0_i32_0, %c0_i32_1 : i32, i32, i32
  }
  func.func @transform_6(%arg0: i32) -> (i32, i32) {
    %c0_i32 = arith.constant 0 : i32
    %c0_i32_0 = arith.constant 0 : i32
    %c0_i32_1 = arith.constant 0 : i32
    return %c0_i32, %c0_i32_0 : i32, i32
  }
  func.func @transform_7(%arg0: i32) -> (i32, i32, i32) {
    %c0_i32 = arith.constant 0 : i32
    %c0_i32_0 = arith.constant 0 : i32
    %c0_i32_1 = arith.constant 0 : i32
    %c0_i32_2 = arith.constant 0 : i32
    return %c0_i32, %c0_i32_0, %c0_i32_1 : i32, i32, i32
  }
  func.func @transform_8(%arg0: i32) -> (i32, i32, i32) {
    %c0_i32 = arith.constant 0 : i32
    %c0_i32_0 = arith.constant 0 : i32
    %c0_i32_1 = arith.constant 0 : i32
    %c0_i32_2 = arith.constant 0 : i32
    return %c0_i32, %c0_i32_0, %c0_i32_1 : i32, i32, i32
  }
  func.func @transform_9(%arg0: i32) -> (i32, i32, i32) {
    %c0_i32 = arith.constant 0 : i32
    %c0_i32_0 = arith.constant 0 : i32
    %c0_i32_1 = arith.constant 0 : i32
    %c0_i32_2 = arith.constant 0 : i32
    return %c0_i32, %c0_i32_0, %c0_i32_1 : i32, i32, i32
  }
  func.func @transform_10(%arg0: i32) -> (i32, i32) {
    %c0_i32 = arith.constant 0 : i32
    %c0_i32_0 = arith.constant 0 : i32
    %c0_i32_1 = arith.constant 0 : i32
    return %c0_i32, %c0_i32_0 : i32, i32
  }
  func.func @transform_11(%arg0: i32) -> (i32, i32, i32) {
    %c0_i32 = arith.constant 0 : i32
    %c0_i32_0 = arith.constant 0 : i32
    %c0_i32_1 = arith.constant 0 : i32
    %c0_i32_2 = arith.constant 0 : i32
    return %c0_i32, %c0_i32_0, %c0_i32_1 : i32, i32, i32
  }
  func.func @transform_12(%arg0: i32) -> (i32, i32, i32) {
    %c0_i32 = arith.constant 0 : i32
    %c0_i32_0 = arith.constant 0 : i32
    %c0_i32_1 = arith.constant 0 : i32
    %c0_i32_2 = arith.constant 0 : i32
    return %c0_i32, %c0_i32_0, %c0_i32_1 : i32, i32, i32
  }
  func.func @transform_13(%arg0: i32) -> (i32, i32, i32) {
    %c0_i32 = arith.constant 0 : i32
    %c0_i32_0 = arith.constant 0 : i32
    %c0_i32_1 = arith.constant 0 : i32
    %c0_i32_2 = arith.constant 0 : i32
    return %c0_i32, %c0_i32_0, %c0_i32_1 : i32, i32, i32
  }
  func.func @transform_14(%arg0: i32) -> (i32, i32) {
    %c0_i32 = arith.constant 0 : i32
    %c0_i32_0 = arith.constant 0 : i32
    %c0_i32_1 = arith.constant 0 : i32
    return %c0_i32, %c0_i32_0 : i32, i32
  }
  func.func @transform_15(%arg0: i32) -> (i32, i32, i32) {
    %c0_i32 = arith.constant 0 : i32
    %c0_i32_0 = arith.constant 0 : i32
    %c0_i32_1 = arith.constant 0 : i32
    %c0_i32_2 = arith.constant 0 : i32
    return %c0_i32, %c0_i32_0, %c0_i32_1 : i32, i32, i32
  }
  func.func @transform_16(%arg0: i32) -> (i32, i32, i32) {
    %c0_i32 = arith.constant 0 : i32
    %c0_i32_0 = arith.constant 0 : i32
    %c0_i32_1 = arith.constant 0 : i32
    %c0_i32_2 = arith.constant 0 : i32
    return %c0_i32, %c0_i32_0, %c0_i32_1 : i32, i32, i32
  }
  func.func @transform_17(%arg0: i32) -> (i32, i32) {
    %c0_i32 = arith.constant 0 : i32
    %c0_i32_0 = arith.constant 0 : i32
    %c0_i32_1 = arith.constant 0 : i32
    return %c0_i32, %c0_i32_0 : i32, i32
  }
  func.func @transform_18(%arg0: i32) -> (i32, i32, i32) {
    %c0_i32 = arith.constant 0 : i32
    %c0_i32_0 = arith.constant 0 : i32
    %c0_i32_1 = arith.constant 0 : i32
    %c0_i32_2 = arith.constant 0 : i32
    return %c0_i32, %c0_i32_0, %c0_i32_1 : i32, i32, i32
  }
  func.func @transform_19(%arg0: i32) -> (i32, i32, i32) {
    %c0_i32 = arith.constant 0 : i32
    %c0_i32_0 = arith.constant 0 : i32
    %c0_i32_1 = arith.constant 0 : i32
    %c0_i32_2 = arith.constant 0 : i32
    return %c0_i32, %c0_i32_0, %c0_i32_1 : i32, i32, i32
  }
  func.func @transform_20(%arg0: i32) -> (i32, i32) {
    %c0_i32 = arith.constant 0 : i32
    %c0_i32_0 = arith.constant 0 : i32
    %c0_i32_1 = arith.constant 0 : i32
    return %c0_i32, %c0_i32_0 : i32, i32
  }
  func.func @transform_21(%arg0: i32) -> (i32, i32) {
    %c0_i32 = arith.constant 0 : i32
    %c0_i32_0 = arith.constant 0 : i32
    %c0_i32_1 = arith.constant 0 : i32
    return %c0_i32, %c0_i32_0 : i32, i32
  }
}

</mosaic_0001>

<bundles_post_ra>
// kernel: tile.34
= control target key start
LH: loop header
LB: loop body
LE: loop exit
PB: predicated region body
PF: predicated region fallthrough
CT: control target
= control target key end

     0   :  { %s22_s0 = inlined_call_operand.vmem [shape: f32[8], index: 0, kind: input, shape index: {}]   ;;  %s23_s1 = inlined_call_operand.vmem [shape: f32[4,8], index: 1, kind: output, shape index: {}]  }
   0x1   :  { %v4_v0 = vld [vmem:[%s22_s0] ss:$0 sm:$0xff] }
   0x2   :  { %5 = vst [vmem:[%s23_s1] sm:$0xf] %v4_v0 }

// kernel: tile.38
= control target key start
LH: loop header
LB: loop body
LE: loop exit
PB: predicated region body
PF: predicated region fallthrough
CT: control target
= control target key end

     0   :  { %s22_s0 = inlined_call_operand.vmem [shape: f32[16], index: 0, kind: input, shape index: {}]   ;;  %s23_s1 = inlined_call_operand.vmem [shape: f32[4,16], index: 1, kind: output, shape index: {}]  }
   0x1   :  { %v4_v0 = vld [vmem:[%s22_s0] ss:$0 sm:$0xff] }
   0x2   :  { %5 = vst [vmem:[%s23_s1] sm:$0xf] %v4_v0 }

// kernel: tile.35
= control target key start
LH: loop header
LB: loop body
LE: loop exit
PB: predicated region body
PF: predicated region fallthrough
CT: control target
= control target key end

     0   :  { %vm7_vm0 = vcmask 64512   ;;  %s37_s8 = smov 8   ;;  %s38_s9 = smov 16   ;;  %vm13_vm1 = vcmask 261312   ;;  %vm19_vm2 = vcmask 195712   ;;  %vm25_vm3 = vcmask 130112   ;;  %s55_s0 = inlined_call_operand.vmem [shape: f32[4,8], index: 0, kind: input, shape index: {}]   ;;  %s56_s1 = inlined_call_operand.vmem [shape: f32[1,32], index: 1, kind: output, shape index: {}]  }
   0x1   :  { %v4_v0 = vld [vmem:[%s55_s0] sm:$0xf]  ;;  %s36_s0 = smov 24  }
   0x2   :  { %5 = vst [vmem:[#allocation1] sm:$0xf] %v4_v0 }
   0x9   :  { %v10_v1 = vld [vmem:[#allocation1 + $0x3] sm:$0x1]   ;;  %v22_v2 = vld [vmem:[#allocation1 + $0x1] sm:$0x1]   ;;  %v6_v3 = vld [vmem:[#allocation1] sm:$0x1]  }
   0xa   :  { %11 = vrot.lane.b32.xlu0 %v10_v1, %s36_s0  ;;  %23 = vrot.lane.b32.xlu1 %v22_v2, %s37_s8  ;;  %v16_v4 = vld [vmem:[#allocation1 + $0x2] sm:$0x1]   ;;  %8 = vst.msk [vmem:[#allocation0] sm:$0x1] %vm7_vm0, %v6_v3  }
   0xe   :  { %17 = vrot.lane.b32.xlu0 %v16_v4, %s38_s9 }
  0x7c   :  { %v12_v5 = vpop.permute.xlu0 %11   ;;  %v24_v6 = vpop.permute.xlu1 %23  }
  0x7d   :  { %14 = vst.msk [vmem:[#allocation0] sm:$0x1] %vm13_vm1, %v12_v5  }
  0x80   :  { %v18_v7 = vpop.permute.xlu0 %17  }
  0x81   :  { %20 = vst.msk [vmem:[#allocation0] sm:$0x1] %vm19_vm2, %v18_v7  }
  0x82   :  { %26 = vst.msk [vmem:[#allocation0] sm:$0x1] %vm25_vm3, %v24_v6  }
  0x89   :  { %v30_v8 = vld [vmem:[#allocation0] sm:$0x1] }
  0x8a   :  { %32 = vst [vmem:[%s56_s1] sm:$0x1] %v30_v8 }

// kernel: tile.39
= control target key start
LH: loop header
LB: loop body
LE: loop exit
PB: predicated region body
PF: predicated region fallthrough
CT: control target
= control target key end

     0   :  { %vm7_vm0 = vcmask 130048   ;;  %s37_s8 = smov 16   ;;  %s38_s9 = smov 32   ;;  %vm13_vm1 = vcmask 523648   ;;  %vm19_vm2 = vcmask 392448   ;;  %vm25_vm3 = vcmask 261248   ;;  %s55_s0 = inlined_call_operand.vmem [shape: f32[4,16], index: 0, kind: input, shape index: {}]   ;;  %s56_s1 = inlined_call_operand.vmem [shape: f32[1,64], index: 1, kind: output, shape index: {}]  }
   0x1   :  { %v4_v0 = vld [vmem:[%s55_s0] sm:$0xf]  ;;  %s36_s0 = smov 48  }
   0x2   :  { %5 = vst [vmem:[#allocation1] sm:$0xf] %v4_v0 }
   0x9   :  { %v10_v1 = vld [vmem:[#allocation1 + $0x3] sm:$0x1]   ;;  %v22_v2 = vld [vmem:[#allocation1 + $0x1] sm:$0x1]   ;;  %v6_v3 = vld [vmem:[#allocation1] sm:$0x1]  }
   0xa   :  { %11 = vrot.lane.b32.xlu0 %v10_v1, %s36_s0  ;;  %23 = vrot.lane.b32.xlu1 %v22_v2, %s37_s8  ;;  %v16_v4 = vld [vmem:[#allocation1 + $0x2] sm:$0x1]   ;;  %8 = vst.msk [vmem:[#allocation0] sm:$0x1] %vm7_vm0, %v6_v3  }
   0xe   :  { %17 = vrot.lane.b32.xlu0 %v16_v4, %s38_s9 }
  0x7c   :  { %v12_v5 = vpop.permute.xlu0 %11   ;;  %v24_v6 = vpop.permute.xlu1 %23  }
  0x7d   :  { %14 = vst.msk [vmem:[#allocation0] sm:$0x1] %vm13_vm1, %v12_v5  }
  0x80   :  { %v18_v7 = vpop.permute.xlu0 %17  }
  0x81   :  { %20 = vst.msk [vmem:[#allocation0] sm:$0x1] %vm19_vm2, %v18_v7  }
  0x82   :  { %26 = vst.msk [vmem:[#allocation0] sm:$0x1] %vm25_vm3, %v24_v6  }
  0x89   :  { %v30_v8 = vld [vmem:[#allocation0] sm:$0x1] }
  0x8a   :  { %32 = vst [vmem:[%s56_s1] sm:$0x1] %v30_v8 }

// kernel: tile.30
= control target key start
LH: loop header
LB: loop body
LE: loop exit
PB: predicated region body
PF: predicated region fallthrough
CT: control target
= control target key end

     0   :  { %s22_s0 = inlined_call_operand.vmem [shape: f32[16], index: 0, kind: input, shape index: {}]   ;;  %s23_s1 = inlined_call_operand.vmem [shape: f32[8,16], index: 1, kind: output, shape index: {}]  }
   0x1   :  { %v4_v0 = vld [vmem:[%s22_s0] ss:$0 sm:$0xff] }
   0x2   :  { %5 = vst [vmem:[%s23_s1] sm:$0xff] %v4_v0 }

// kernel: tile.42
= control target key start
LH: loop header
LB: loop body
LE: loop exit
PB: predicated region body
PF: predicated region fallthrough
CT: control target
= control target key end

     0   :  { %s22_s0 = inlined_call_operand.vmem [shape: f32[32], index: 0, kind: input, shape index: {}]   ;;  %s23_s1 = inlined_call_operand.vmem [shape: f32[8,32], index: 1, kind: output, shape index: {}]  }
   0x1   :  { %v4_v0 = vld [vmem:[%s22_s0] ss:$0 sm:$0xff] }
   0x2   :  { %5 = vst [vmem:[%s23_s1] sm:$0xff] %v4_v0 }

// kernel: tile.31
= control target key start
LH: loop header
LB: loop body
LE: loop exit
PB: predicated region body
PF: predicated region fallthrough
CT: control target
= control target key end

     0   :  { %s67_s10 = smov 112   ;;  %s68_s11 = smov 80   ;;  %vm3_vm0 = vcmask 130048   ;;  %vm9_vm1 = vcmask 1048448   ;;  %vm15_vm2 = vcmask 917248   ;;  %vm21_vm3 = vcmask 786048   ;;  %s111_s0 = inlined_call_operand.vmem [shape: f32[8,16], index: 0, kind: input, shape index: {}]   ;;  %s112_s1 = inlined_call_operand.vmem [shape: f32[1,128], index: 1, kind: output, shape index: {}]  }
   0x1   :  { %v53_v0 = vld [vmem:[%s111_s0 + $0x7] sm:$0x1]   ;;  %v55_v1 = vld [vmem:[%s111_s0 + $0x5] sm:$0x1]   ;;  %v54_v2 = vld [vmem:[%s111_s0 + $0x6] sm:$0x1]  }
   0x2   :  { %7 = vrot.lane.b32.xlu0 %v53_v0, %s67_s10  ;;  %19 = vrot.lane.b32.xlu1 %v55_v1, %s68_s11  ;;  %v56_v3 = vld [vmem:[%s111_s0 + $0x4] sm:$0x1]   ;;  %v2_v4 = vld [vmem:[%s111_s0] sm:$0x1]   ;;  %s69_s18 = smov 96   ;;  %s70_s19 = smov 64  }
   0x3   :  { %4 = vst.msk [vmem:[#allocation0] sm:$0x1] %vm3_vm0, %v2_v4   ;;  %v57_v5 = vld [vmem:[%s111_s0 + $0x3] sm:$0x1]   ;;  %v58_v6 = vld [vmem:[%s111_s0 + $0x2] sm:$0x1]  }
   0x4   :  { %s71_s24 = smov 48   ;;  %s72_s25 = smov 32   ;;  %v59_v7 = vld [vmem:[%s111_s0 + $0x1] sm:$0x1]   ;;  %vm27_vm4 = vcmask 654848   ;;  %vm33_vm5 = vcmask 523648  }
   0x5   :  { %s73_s0 = smov 16   ;;  %vm39_vm6 = vcmask 392448   ;;  %vm45_vm7 = vcmask 261248  }
   0x6   :  { %13 = vrot.lane.b32.xlu0 %v54_v2, %s69_s18  ;;  %25 = vrot.lane.b32.xlu1 %v56_v3, %s70_s19 }
   0xa   :  { %31 = vrot.lane.b32.xlu0 %v57_v5, %s71_s24  ;;  %37 = vrot.lane.b32.xlu1 %v58_v6, %s72_s25 }
   0xe   :  { %43 = vrot.lane.b32.xlu0 %v59_v7, %s73_s0 }
  0x74   :  { %v8_v8 = vpop.permute.xlu0 %7   ;;  %v20_v9 = vpop.permute.xlu1 %19  }
  0x75   :  { %10 = vst.msk [vmem:[#allocation0] sm:$0x1] %vm9_vm1, %v8_v8  }
  0x78   :  { %v14_v10 = vpop.permute.xlu0 %13   ;;  %v26_v11 = vpop.permute.xlu1 %25  }
  0x79   :  { %16 = vst.msk [vmem:[#allocation0] sm:$0x1] %vm15_vm2, %v14_v10  }
  0x7a   :  { %22 = vst.msk [vmem:[#allocation0] sm:$0x1] %vm21_vm3, %v20_v9  }
  0x7b   :  { %28 = vst.msk [vmem:[#allocation0] sm:$0x1] %vm27_vm4, %v26_v11  }
  0x7c   :  { %v32_v12 = vpop.permute.xlu0 %31   ;;  %v38_v13 = vpop.permute.xlu1 %37  }
  0x7d   :  { %34 = vst.msk [vmem:[#allocation0] sm:$0x1] %vm33_vm5, %v32_v12  }
  0x7e   :  { %40 = vst.msk [vmem:[#allocation0] sm:$0x1] %vm39_vm6, %v38_v13  }
  0x80   :  { %v44_v14 = vpop.permute.xlu0 %43  }
  0x81   :  { %46 = vst.msk [vmem:[#allocation0] sm:$0x1] %vm45_vm7, %v44_v14  }
  0x88   :  { %v50_v15 = vld [vmem:[#allocation0] sm:$0x1] }
  0x89   :  { %52 = vst [vmem:[%s112_s1] sm:$0x1] %v50_v15 }

// kernel: tile.43
= control target key start
LH: loop header
LB: loop body
LE: loop exit
PB: predicated region body
PF: predicated region fallthrough
CT: control target
= control target key end

     0   :  { %s7_s6 = smov 3  ;;  %s14_s9 = smov 3  ;;  %vm4_vm0 = vcmask 261120   ;;  %vm11_vm1 = vcmask 1048320   ;;  %vm18_vm2 = vcmask 785920   ;;  %vm25_vm3 = vcmask 523520   ;;  %s76_s0 = inlined_call_operand.vmem [shape: f32[8,32], index: 0, kind: input, shape index: {}]   ;;  %s77_s1 = inlined_call_operand.vmem [shape: f32[1,256], index: 1, kind: output, shape index: {}]  }
   0x1   :  { %v38_v0 = vld [vmem:[%s76_s0 + $0x3] ss:$4 sm:%s7_s6]   ;;  %s45_s10 = smov 96   ;;  %s21_s11 = smov 3  ;;  %v39_v1 = vld [vmem:[%s76_s0 + $0x2] ss:$4 sm:%s14_s9]  }
   0x2   :  { %9 = vrot.lane.b32.xlu0 %v38_v0, %s45_s10  ;;  %v40_v2 = vld [vmem:[%s76_s0 + $0x1] ss:$4 sm:%s21_s11]   ;;  %s2_s16 = smov 3  ;;  %s46_s17 = smov 32  }
   0x3   :  { %23 = vrot.lane.b32.xlu1 %v40_v2, %s46_s17  ;;  %v3_v3 = vld [vmem:[%s76_s0] ss:$4 sm:%s2_s16]   ;;  %s47_s0 = smov 64  }
   0x4   :  { %5 = vst.msk [vmem:[#allocation0] ss:$8 sm:$0x3] %vm4_vm0, %v3_v3  }
   0x6   :  { %16 = vrot.lane.b32.xlu0 %v39_v1, %s47_s0 }
  0x74   :  { %v10_v4 = vpop.permute.xlu0 %9  }
  0x75   :  { %12 = vst.msk [vmem:[#allocation0] ss:$8 sm:$0x3] %vm11_vm1, %v10_v4   ;;  %v24_v5 = vpop.permute.xlu1 %23  }
  0x78   :  { %v17_v6 = vpop.permute.xlu0 %16  }
  0x79   :  { %19 = vst.msk [vmem:[#allocation0] ss:$8 sm:$0x3] %vm18_vm2, %v17_v6  }
  0x7a   :  { %26 = vst.msk [vmem:[#allocation0] ss:$8 sm:$0x3] %vm25_vm3, %v24_v5  }
  0x81   :  { %v30_v7 = vld [vmem:[#allocation0] sm:$0x1]  ;;  %v34_v8 = vld [vmem:[#allocation0 + $0x8] sm:$0x1] }
  0x82   :  { %32 = vst [vmem:[%s77_s1] sm:$0x1] %v30_v7  ;;  %41 = vst [vmem:[%s77_s1 + $0x1] sm:$0x1] %v34_v8 }

// kernel: tile.27
= control target key start
LH: loop header
LB: loop body
LE: loop exit
PB: predicated region body
PF: predicated region fallthrough
CT: control target
= control target key end

     0   :  { %s57_s8 = smov 96   ;;  %vm3_vm0 = vcmask 261120   ;;  %s59_s15 = smov 64   ;;  %vm9_vm1 = vcmask 1048320   ;;  %vm15_vm2 = vcmask 785920   ;;  %vm21_vm3 = vcmask 523520   ;;  %s94_s0 = inlined_call_operand.vmem [shape: f32[16,32], index: 0, kind: input, shape index: {}]   ;;  %s95_s1 = inlined_call_operand.vmem [shape: f32[1,512], index: 1, kind: output, shape index: {}]  }
   0x1   :  { %v48_v0 = vld [vmem:[%s94_s0 + $0x3] ss:$4 sm:$0xf]   ;;  %v49_v1 = vld [vmem:[%s94_s0 + $0x2] ss:$4 sm:$0xf]  }
   0x2   :  { %7 = vrot.lane.b32.xlu0 %v48_v0, %s57_s8  ;;  %v50_v2 = vld [vmem:[%s94_s0 + $0x1] ss:$4 sm:$0xf]   ;;  %v2_v3 = vld [vmem:[%s94_s0] ss:$4 sm:$0xf]  }
   0x3   :  { %s58_s0 = smov 32   ;;  %4 = vst.msk [vmem:[#allocation0] ss:$8 sm:$0xf] %vm3_vm0, %v2_v3  }
   0x4   :  { %19 = vrot.lane.b32.xlu1 %v50_v2, %s58_s0 }
   0x6   :  { %13 = vrot.lane.b32.xlu0 %v49_v1, %s59_s15 }
  0x74   :  { %v8_v4 = vpop.permute.xlu0 %7  }
  0x75   :  { %10 = vst.msk [vmem:[#allocation0] ss:$8 sm:$0xf] %vm9_vm1, %v8_v4  }
  0x76   :  { %v20_v5 = vpop.permute.xlu1 %19  }
  0x78   :  { %v14_v6 = vpop.permute.xlu0 %13  }
  0x79   :  { %16 = vst.msk [vmem:[#allocation0] ss:$8 sm:$0xf] %vm15_vm2, %v14_v6  }
  0x7a   :  { %22 = vst.msk [vmem:[#allocation0] ss:$8 sm:$0xf] %vm21_vm3, %v20_v5  }
  0x81   :  { %v26_v7 = vld [vmem:[#allocation0] sm:$0x1]  ;;  %v30_v8 = vld [vmem:[#allocation0 + $0x8] sm:$0x1]  ;;  %v35_v9 = vld [vmem:[#allocation0 + $0x10] sm:$0x1] }
  0x82   :  { %28 = vst [vmem:[%s95_s1] sm:$0x1] %v26_v7  ;;  %51 = vst [vmem:[%s95_s1 + $0x1] sm:$0x1] %v30_v8  ;;  %v41_v10 = vld [vmem:[#allocation0 + $0x18] sm:$0x1] }
  0x83   :  { %52 = vst [vmem:[%s95_s1 + $0x2] sm:$0x1] %v35_v9  ;;  %53 = vst [vmem:[%s95_s1 + $0x3] sm:$0x1] %v41_v10 }

// kernel: tile.47
= control target key start
LH: loop header
LB: loop body
LE: loop exit
PB: predicated region body
PF: predicated region fallthrough
CT: control target
= control target key end

     0   :  { %s131_s10 = smov 60   ;;  %s132_s11 = smov 52   ;;  %vm3_vm0 = vcmask 31744   ;;  %vm9_vm1 = vcmask 523744   ;;  %vm15_vm2 = vcmask 490944   ;;  %vm21_vm3 = vcmask 458144   ;;  %s207_s0 = inlined_call_operand.vmem [shape: f32[16,4], index: 0, kind: input, shape index: {}]   ;;  %s208_s1 = inlined_call_operand.vmem [shape: f32[1,64], index: 1, kind: output, shape index: {}]  }
   0x1   :  { %v101_v0 = vld [vmem:[%s207_s0 + $0xf] sm:$0x1]   ;;  %v103_v1 = vld [vmem:[%s207_s0 + $0xd] sm:$0x1]   ;;  %v102_v2 = vld [vmem:[%s207_s0 + $0xe] sm:$0x1]  }
   0x2   :  { %7 = vrot.lane.b32.xlu0 %v101_v0, %s131_s10  ;;  %19 = vrot.lane.b32.xlu1 %v103_v1, %s132_s11  ;;  %v104_v3 = vld [vmem:[%s207_s0 + $0xc] sm:$0x1]   ;;  %s133_s16 = smov 56   ;;  %s134_s17 = smov 48   ;;  %v105_v4 = vld [vmem:[%s207_s0 + $0xb] sm:$0x1]  }
   0x3   :  { %v106_v5 = vld [vmem:[%s207_s0 + $0xa] sm:$0x1]   ;;  %v2_v6 = vld [vmem:[%s207_s0] sm:$0x1]   ;;  %s135_s24 = smov 44   ;;  %s136_s25 = smov 40  }
   0x4   :  { %4 = vst.msk [vmem:[#allocation0] sm:$0x1] %vm3_vm0, %v2_v6   ;;  %v107_v7 = vld [vmem:[%s207_s0 + $0x9] sm:$0x1]   ;;  %v108_v8 = vld [vmem:[%s207_s0 + $0x8] sm:$0x1]  }
   0x5   :  { %s137_s30 = smov 36   ;;  %s138_s2 = smov 32   ;;  %v109_v9 = vld [vmem:[%s207_s0 + $0x7] sm:$0x1]   ;;  %v110_v10 = vld [vmem:[%s207_s0 + $0x6] sm:$0x1]  }
   0x6   :  { %13 = vrot.lane.b32.xlu0 %v102_v2, %s133_s16  ;;  %25 = vrot.lane.b32.xlu1 %v104_v3, %s134_s17  ;;  %s139_s7 = smov 28   ;;  %s140_s8 = smov 24   ;;  %v111_v11 = vld [vmem:[%s207_s0 + $0x5] sm:$0x1]   ;;  %v112_v12 = vld [vmem:[%s207_s0 + $0x4] sm:$0x1]  }
   0x7   :  { %s141_s13 = smov 20   ;;  %s142_s14 = smov 16   ;;  %v113_v13 = vld [vmem:[%s207_s0 + $0x3] sm:$0x1]   ;;  %v114_v14 = vld [vmem:[%s207_s0 + $0x2] sm:$0x1]  }
   0x8   :  { %s143_s19 = smov 12   ;;  %s144_s20 = smov 8   ;;  %v115_v15 = vld [vmem:[%s207_s0 + $0x1] sm:$0x1]   ;;  %vm27_vm4 = vcmask 425344   ;;  %vm33_vm5 = vcmask 392544  }
   0x9   :  { %s145_s0 = smov 4   ;;  %vm39_vm6 = vcmask 359744   ;;  %vm45_vm7 = vcmask 326944   ;;  %vm51_vm8 = vcmask 294144   ;;  %vm57_vm9 = vcmask 261344  }
   0xa   :  { %31 = vrot.lane.b32.xlu0 %v105_v4, %s135_s24  ;;  %37 = vrot.lane.b32.xlu1 %v106_v5, %s136_s25  ;;  %vm63_vm10 = vcmask 228544   ;;  %vm69_vm11 = vcmask 195744   ;;  %vm75_vm12 = vcmask 162944   ;;  %vm81_vm13 = vcmask 130144  }
   0xb   :  { %vm87_vm14 = vcmask 97344   ;;  %vm93_vm15 = vcmask 64544  }
   0xe   :  { %43 = vrot.lane.b32.xlu0 %v107_v7, %s137_s30  ;;  %49 = vrot.lane.b32.xlu1 %v108_v8, %s138_s2 }
  0x12   :  { %55 = vrot.lane.b32.xlu0 %v109_v9, %s139_s7  ;;  %61 = vrot.lane.b32.xlu1 %v110_v10, %s140_s8 }
  0x16   :  { %67 = vrot.lane.b32.xlu0 %v111_v11, %s141_s13  ;;  %73 = vrot.lane.b32.xlu1 %v112_v12, %s142_s14 }
  0x1a   :  { %79 = vrot.lane.b32.xlu0 %v113_v13, %s143_s19  ;;  %85 = vrot.lane.b32.xlu1 %v114_v14, %s144_s20 }
  0x1e   :  { %91 = vrot.lane.b32.xlu0 %v115_v15, %s145_s0 }
  0x74   :  { %v8_v16 = vpop.permute.xlu0 %7   ;;  %v20_v17 = vpop.permute.xlu1 %19  }
  0x75   :  { %10 = vst.msk [vmem:[#allocation0] sm:$0x1] %vm9_vm1, %v8_v16  }
  0x78   :  { %v14_v18 = vpop.permute.xlu0 %13   ;;  %v26_v19 = vpop.permute.xlu1 %25  }
  0x79   :  { %16 = vst.msk [vmem:[#allocation0] sm:$0x1] %vm15_vm2, %v14_v18  }
  0x7a   :  { %22 = vst.msk [vmem:[#allocation0] sm:$0x1] %vm21_vm3, %v20_v17  }
  0x7b   :  { %28 = vst.msk [vmem:[#allocation0] sm:$0x1] %vm27_vm4, %v26_v19  }
  0x7c   :  { %v32_v20 = vpop.permute.xlu0 %31   ;;  %v38_v21 = vpop.permute.xlu1 %37  }
  0x7d   :  { %34 = vst.msk [vmem:[#allocation0] sm:$0x1] %vm33_vm5, %v32_v20  }
  0x7e   :  { %40 = vst.msk [vmem:[#allocation0] sm:$0x1] %vm39_vm6, %v38_v21  }
  0x80   :  { %v44_v22 = vpop.permute.xlu0 %43   ;;  %v50_v23 = vpop.permute.xlu1 %49  }
  0x81   :  { %46 = vst.msk [vmem:[#allocation0] sm:$0x1] %vm45_vm7, %v44_v22  }
  0x82   :  { %52 = vst.msk [vmem:[#allocation0] sm:$0x1] %vm51_vm8, %v50_v23  }
  0x84   :  { %v56_v24 = vpop.permute.xlu0 %55   ;;  %v62_v25 = vpop.permute.xlu1 %61  }
  0x85   :  { %58 = vst.msk [vmem:[#allocation0] sm:$0x1] %vm57_vm9, %v56_v24  }
  0x86   :  { %64 = vst.msk [vmem:[#allocation0] sm:$0x1] %vm63_vm10, %v62_v25  }
  0x88   :  { %v68_v26 = vpop.permute.xlu0 %67   ;;  %v74_v27 = vpop.permute.xlu1 %73  }
  0x89   :  { %70 = vst.msk [vmem:[#allocation0] sm:$0x1] %vm69_vm11, %v68_v26  }
  0x8a   :  { %76 = vst.msk [vmem:[#allocation0] sm:$0x1] %vm75_vm12, %v74_v27  }
  0x8c   :  { %v80_v28 = vpop.permute.xlu0 %79   ;;  %v86_v29 = vpop.permute.xlu1 %85  }
  0x8d   :  { %82 = vst.msk [vmem:[#allocation0] sm:$0x1] %vm81_vm13, %v80_v28  }
  0x8e   :  { %88 = vst.msk [vmem:[#allocation0] sm:$0x1] %vm87_vm14, %v86_v29  }
  0x90   :  { %v92_v30 = vpop.permute.xlu0 %91  }
  0x91   :  { %94 = vst.msk [vmem:[#allocation0] sm:$0x1] %vm93_vm15, %v92_v30  }
  0x98   :  { %v98_v31 = vld [vmem:[#allocation0] sm:$0x1] }
  0x99   :  { %100 = vst [vmem:[%s208_s1] sm:$0x1] %v98_v31 }

// kernel: tile.46
= control target key start
LH: loop header
LB: loop body
LE: loop exit
PB: predicated region body
PF: predicated region fallthrough
CT: control target
= control target key end

     0   :  { %s28_s0 = inlined_call_operand.vmem [shape: f32[4], index: 0, kind: input, shape index: {}]   ;;  %s29_s1 = inlined_call_operand.vmem [shape: f32[16,4], index: 1, kind: output, shape index: {}]  }
   0x1   :  { %v4_v0 = vld [vmem:[%s28_s0] ss:$0 sm:$0xff] }
   0x2   :  { %5 = vst [vmem:[%s29_s1] sm:$0xff] %v4_v0  ;;  %8 = vst [vmem:[%s29_s1 + $0x8] sm:$0xff] %v4_v0 }

// kernel: tile.26
= control target key start
LH: loop header
LB: loop body
LE: loop exit
PB: predicated region body
PF: predicated region fallthrough
CT: control target
= control target key end

     0   :  { %s28_s0 = inlined_call_operand.vmem [shape: f32[32], index: 0, kind: input, shape index: {}]   ;;  %s29_s1 = inlined_call_operand.vmem [shape: f32[16,32], index: 1, kind: output, shape index: {}]  }
   0x1   :  { %v4_v0 = vld [vmem:[%s28_s0] ss:$0 sm:$0xff] }
   0x2   :  { %5 = vst [vmem:[%s29_s1] sm:$0xff] %v4_v0  ;;  %8 = vst [vmem:[%s29_s1 + $0x8] sm:$0xff] %v4_v0 }

// kernel: _lambda_.1
= control target key start
LH: loop header
LB: loop body
LE: loop exit
PB: predicated region body
PF: predicated region fallthrough
CT: control target
= control target key end

     0   :  { %v8078_v3 = vmov 0.0   ;;  %vm151_vm0 = vcmask 588800   ;;  %vm907_vm1 = vcmask 1041408   ;;  %vm897_vm2 = vcmask 277504   ;;  %s10451_s1 = inlined_call_operand.vmem [shape: f32[3,72,512], index: 1, kind: input, shape index: {}]   ;;  %s10452_s0 = inlined_call_operand.vmem [shape: f32[36,72], index: 0, kind: input, shape index: {}]   ;;  %s10453_s4 = inlined_call_operand.vmem [shape: bf16[2,512,320], index: 4, kind: input, shape index: {}]   ;;  %s10454_s2 = inlined_call_operand.vmem [shape: f32[1,512], index: 2, kind: input, shape index: {}]   ;;  %s10455_s3 = inlined_call_operand.vmem [shape: bf16[2,20,34], index: 3, kind: input, shape index: {}]   ;;  %s10456_s5 = inlined_call_operand.vmem [shape: f32[3,320,128], index: 5, kind: input, shape index: {}]   ;;  %s10457_s7 = inlined_call_operand.vmem [shape: bf16[2,12,18], index: 7, kind: input, shape index: {}]   ;;  %s10458_s8 = inlined_call_operand.vmem [shape: bf16[2,128,96], index: 8, kind: input, shape index: {}]   ;;  %s10459_s6 = inlined_call_operand.vmem [shape: f32[1,128], index: 6, kind: input, shape index: {}]   ;;  %s10460_s9 = inlined_call_operand.vmem [shape: f32[3,96,32], index: 9, kind: input, shape index: {}]   ;;  %s10461_s10 = inlined_call_operand.vmem [shape: f32[1,32], index: 10, kind: input, shape index: {}]   ;;  %s10462_s11 = inlined_call_operand.vmem [shape: bf16[2,4,10], index: 11, kind: input, shape index: {}]   ;;  %s10463_s12 = inlined_call_operand.vmem [shape: bf16[2,32,16], index: 12, kind: input, shape index: {}]   ;;  %s10464_s13 = inlined_call_operand.vmem [shape: f32[2,16,64], index: 13, kind: input, shape index: {}]   ;;  %s10465_s15 = inlined_call_operand.vmem [shape: bf16[2,8,4], index: 15, kind: input, shape index: {}]   ;;  %s10466_s16 = inlined_call_operand.vmem [shape: f32[2,64,256], index: 16, kind: input, shape index: {}]   ;;  %s10467_s14 = inlined_call_operand.vmem [shape: f32[1,64], index: 14, kind: input, shape index: {}]   ;;  %s10468_s18 = inlined_call_operand.vmem [shape: bf16[2,16,8], index: 18, kind: input, shape index: {}]   ;;  %s10469_s19 = inlined_call_operand.vmem [shape: f32[2,256,64], index: 19, kind: input, shape index: {}]   ;;  %s10470_s17 = inlined_call_operand.vmem [shape: f32[1,256], index: 17, kind: input, shape index: {}]   ;;  %s10471_s20 = inlined_call_operand.vmem [shape: f32[1,64], index: 20, kind: input, shape index: {}]   ;;  %s10472_s21 = inlined_call_operand.vmem [shape: f32[16,128], index: 21, kind: output, shape index: {}]  }
   0x1   :  { %10478 = sst [smem:[#allocation2_spill]] %s10451_s1  ;;  %231 = vmatprep.mubr.f32.mxu0 %v8078_v3  ;;  %326 = vmatprep.mubr.f32.mxu1 %v8078_v3  ;;  %vm8080_vm3 = vmmov 0   ;;  %vm2672_vm4 = vcmask 1046528   ;;  %vm2694_vm5 = vcmask 523264   ;;  %vm3068_vm6 = vcmask 1045504  }
   0x2   :  { %10479 = sst [smem:[#allocation3_spill]] %s10452_s0  ;;  %s10484_s26 = sld [smem:[#allocation2_spill]]  ;;  %vm3276_vm7 = vcmask 146432   ;;  %vm3696_vm8 = vcmask 785408   ;;  %vm8081_vm9 = vmmov 1   ;;  %vm3965_vm11 = vcmask 80896  }
   0x3   :  { %10480 = sst [smem:[#allocation4_spill]] %s10453_s4  ;;  %s10485_s27 = sld [smem:[#allocation3_spill]]  ;;  %vm7429_vm10 = vmpackc.low %vm907_vm1, %vm8081_vm9  ;;  %vm4127_vm12 = vcmask 261120   ;;  %vm4283_vm13 = vcmask 130048   ;;  %vm4439_vm14 = vcmask 1043456   ;;  %vm4435_vm15 = vcmask 31744  }
   0x4   :  { %10481 = sst [smem:[#allocation5_spill]] %s10454_s2  ;;  %s10488_s2 = sld [smem:[#allocation4_spill]] }
   0x5   :  { %10482 = sst [smem:[#allocation6_spill]] %s10455_s3  ;;  %s10486_s30 = sld [smem:[#allocation5_spill]] }
   0x6   :  { %10483 = sst [smem:[#allocation7_spill]] %s10456_s5  ;;  %s10487_s22 = sld [smem:[#allocation6_spill]] }
   0x7   :  { %s10489_s0 = sld [smem:[#allocation7_spill]] }
   0x8   :  { %v5235_v0 = vld [vmem:[%s10484_s26 + $0x128] sm:$0xff]  ;;  %v5237_v2 = vld [vmem:[%s10484_s26 + $0x138] sm:$0xff]  ;;  %v5234_v6 = vld [vmem:[%s10484_s26 + $0x120] sm:$0xff] }
   0x9   :  { %v5239_v1 = vld [vmem:[%s10484_s26 + $0x148] sm:$0xff]  ;;  %v5241_v5 = vld [vmem:[%s10484_s26 + $0x158] sm:$0xff]  ;;  %v5238_v7 = vld [vmem:[%s10484_s26 + $0x140] sm:$0xff] }
   0xa   :  { %v6639_v4 = vpack.c.bf16 %v5239_v1, %v5235_v0  ;;  %v6655_v8 = vpack.c.bf16 %v5241_v5, %v5237_v2  ;;  %v6641_v9 = vpack.c.bf16 %v5238_v7, %v5234_v6  ;;  %v5236_v10 = vld [vmem:[%s10484_s26 + $0x130] sm:$0xff]  ;;  %v5243_v12 = vld [vmem:[%s10484_s26 + $0x168] sm:$0xff]  ;;  %v5245_v15 = vld [vmem:[%s10484_s26 + $0x178] sm:$0xff] }
   0xb   :  { %v5240_v11 = vld [vmem:[%s10484_s26 + $0x150] sm:$0xff]  ;;  %v5247_v14 = vld [vmem:[%s10484_s26 + $0x188] sm:$0xff]  ;;  %v5249_v16 = vld [vmem:[%s10484_s26 + $0x198] sm:$0xff] }
   0xc   :  { %6640 = vmatprep.subr.bf16.mxu0 %v6639_v4  ;;  %v6657_v13 = vpack.c.bf16 %v5240_v11, %v5236_v10  ;;  %6656 = vmatprep.subr.bf16.mxu1 %v6655_v8  ;;  %v6643_v17 = vpack.c.bf16 %v5247_v14, %v5243_v12  ;;  %v6659_v18 = vpack.c.bf16 %v5249_v16, %v5245_v15  ;;  %v5242_v19 = vld [vmem:[%s10484_s26 + $0x160] sm:$0xff]  ;;  %v5244_v21 = vld [vmem:[%s10484_s26 + $0x170] sm:$0xff]  ;;  %v5251_v24 = vld [vmem:[%s10484_s26 + $0x1a8] sm:$0xff] }
   0xd   :  { %6642 = vmatpush1.bf16.msra.mxu0 %v6641_v9  ;;  %v5246_v20 = vld [vmem:[%s10484_s26 + $0x180] sm:$0xff]  ;;  %v5248_v23 = vld [vmem:[%s10484_s26 + $0x190] sm:$0xff]  ;;  %v5255_v25 = vld [vmem:[%s10484_s26 + $0x1c8] sm:$0xff] }
   0xe   :  { %6658 = vmatpush1.bf16.msra.mxu1 %v6657_v13  ;;  %v6645_v22 = vpack.c.bf16 %v5246_v20, %v5242_v19  ;;  %6644 = vmatprep.subr.bf16.mxu0 %v6643_v17  ;;  %v6661_v26 = vpack.c.bf16 %v5248_v23, %v5244_v21  ;;  %v6647_v27 = vpack.c.bf16 %v5255_v25, %v5251_v24  ;;  %v5253_v28 = vld [vmem:[%s10484_s26 + $0x1b8] sm:$0xff]  ;;  %v5250_v30 = vld [vmem:[%s10484_s26 + $0x1a0] sm:$0xff]  ;;  %v5252_v33 = vld [vmem:[%s10484_s26 + $0x1b0] sm:$0xff] }
   0xf   :  { %6660 = vmatprep.subr.bf16.mxu1 %v6659_v18  ;;  %v5257_v29 = vld [vmem:[%s10484_s26 + $0x1d8] sm:$0xff]  ;;  %v5254_v32 = vld [vmem:[%s10484_s26 + $0x1c0] sm:$0xff]  ;;  %v5256_v34 = vld [vmem:[%s10484_s26 + $0x1d0] sm:$0xff] }
  0x10   :  { %v6663_v31 = vpack.c.bf16 %v5257_v29, %v5253_v28  ;;  %v6649_v35 = vpack.c.bf16 %v5254_v32, %v5250_v30  ;;  %v5259_v36 = vld [vmem:[%s10484_s26 + $0x1e8] sm:$0xff]  ;;  %v5261_v38 = vld [vmem:[%s10484_s26 + $0x1f8] sm:$0xff]  ;;  %v6665_v39 = vpack.c.bf16 %v5256_v34, %v5252_v33  ;;  %v5258_v42 = vld [vmem:[%s10484_s26 + $0x1e0] sm:$0xff] }
  0x11   :  { %6646 = vmatpush1.bf16.msra.mxu0 %v6645_v22  ;;  %v5263_v37 = vld [vmem:[%s10484_s26 + $0x208] sm:$0xff]  ;;  %v5265_v41 = vld [vmem:[%s10484_s26 + $0x218] sm:$0xff]  ;;  %v5262_v43 = vld [vmem:[%s10484_s26 + $0x200] sm:$0xff] }
  0x12   :  { %6662 = vmatpush1.bf16.msra.mxu1 %v6661_v26  ;;  %6648 = vmatprep.subr.bf16.mxu0 %v6647_v27  ;;  %v6651_v40 = vpack.c.bf16 %v5263_v37, %v5259_v36  ;;  %v6667_v44 = vpack.c.bf16 %v5265_v41, %v5261_v38  ;;  %v5260_v45 = vld [vmem:[%s10484_s26 + $0x1f0] sm:$0xff]  ;;  %v6653_v47 = vpack.c.bf16 %v5262_v43, %v5258_v42  ;;  %v5267_v49 = vld [vmem:[%s10484_s26 + $0x228] sm:$0xff]  ;;  %v5269_v50 = vld [vmem:[%s10484_s26 + $0x238] sm:$0xff] }
  0x13   :  { %6664 = vmatprep.subr.bf16.mxu1 %v6663_v31  ;;  %v5264_v46 = vld [vmem:[%s10484_s26 + $0x210] sm:$0xff]  ;;  %v74_v51 = vld [vmem:[%s10484_s26 + $0x8] sm:$0xff]  ;;  %v5266_v53 = vld [vmem:[%s10484_s26 + $0x220] sm:$0xff] }
  0x14   :  { %v6669_v48 = vpack.c.bf16 %v5264_v46, %v5260_v45  ;;  %v78_v52 = vld [vmem:[%s10484_s26 + $0x28] sm:$0xff]  ;;  %v76_v54 = vld [vmem:[%s10484_s26 + $0x18] sm:$0xff]  ;;  %v5268_v56 = vld [vmem:[%s10484_s26 + $0x230] sm:$0xff] }
  0x15   :  { %6650 = vmatpush1.bf16.msra.mxu0 %v6649_v35  ;;  %v80_v55 = vld [vmem:[%s10484_s26 + $0x38] sm:$0xff]  ;;  %v73_v57 = vld [vmem:[%s10484_s26] sm:$0xff]  ;;  %v6671_v60 = vpack.c.bf16 %v78_v52, %v74_v51  ;;  %v75_v61 = vld [vmem:[%s10484_s26 + $0x10] sm:$0xff] }
  0x16   :  { %6666 = vmatpush1.bf16.msra.mxu1 %v6665_v39  ;;  %6652 = vmatprep.subr.bf16.mxu0 %v6651_v40  ;;  %v77_v58 = vld [vmem:[%s10484_s26 + $0x20] sm:$0xff]  ;;  %v79_v62 = vld [vmem:[%s10484_s26 + $0x30] sm:$0xff]  ;;  %v6687_v63 = vpack.c.bf16 %v80_v55, %v76_v54  ;;  %v82_v0 = vld [vmem:[%s10484_s26 + $0x48] sm:$0xff] }
  0x17   :  { %6668 = vmatprep.subr.bf16.mxu1 %v6667_v44  ;;  %v109_v59 = vld [vmem:[%s10485_s27 + $0x1] sm:$0xff]  ;;  %v6673_v2 = vpack.c.bf16 %v77_v58, %v73_v57  ;;  %v84_v4 = vld [vmem:[%s10484_s26 + $0x58] sm:$0xff]  ;;  %v6689_v6 = vpack.c.bf16 %v79_v62, %v75_v61  ;;  %v110_v9 = vld [vmem:[%s10485_s27 + $0x9] sm:$0xff] }
  0x18   :  { %v86_v1 = vld [vmem:[%s10484_s26 + $0x68] sm:$0xff]  ;;  %v88_v5 = vld [vmem:[%s10484_s26 + $0x78] sm:$0xff]  ;;  %v81_v7 = vld [vmem:[%s10484_s26 + $0x40] sm:$0xff] }
  0x19   :  { %6654 = vmatpush1.bf16.msra.mxu0 %v6653_v47  ;;  %v85_v8 = vld [vmem:[%s10484_s26 + $0x60] sm:$0xff]  ;;  %v6675_v10 = vpack.c.bf16 %v86_v1, %v82_v0  ;;  %v83_v11 = vld [vmem:[%s10484_s26 + $0x50] sm:$0xff]  ;;  %v6691_v13 = vpack.c.bf16 %v88_v5, %v84_v4  ;;  %v90_v14 = vld [vmem:[%s10484_s26 + $0x88] sm:$0xff] }
  0x1a   :  { %6670 = vmatpush1.bf16.msra.mxu1 %v6669_v48  ;;  %183 = vmatprep.subr.mxu0 %v5267_v49  ;;  %v87_v12 = vld [vmem:[%s10484_s26 + $0x70] sm:$0xff]  ;;  %v94_v15 = vld [vmem:[%s10484_s26 + $0xa8] sm:$0xff]  ;;  %v6677_v16 = vpack.c.bf16 %v85_v8, %v81_v7  ;;  %v92_v17 = vld [vmem:[%s10484_s26 + $0x98] sm:$0xff] }
  0x1b   :  { %278 = vmatprep.subr.mxu1 %v5269_v50  ;;  %v96_v18 = vld [vmem:[%s10484_s26 + $0xb8] sm:$0xff]  ;;  %v6693_v19 = vpack.c.bf16 %v87_v12, %v83_v11  ;;  %v89_v20 = vld [vmem:[%s10484_s26 + $0x80] sm:$0xff]  ;;  %v6679_v23 = vpack.c.bf16 %v94_v15, %v90_v14  ;;  %v91_v24 = vld [vmem:[%s10484_s26 + $0x90] sm:$0xff] }
  0x1c   :  { %v93_v21 = vld [vmem:[%s10484_s26 + $0xa0] sm:$0xff]  ;;  %v111_v22 = vld [vmem:[%s10485_s27 + $0x11] sm:$0xff]  ;;  %v6695_v26 = vpack.c.bf16 %v96_v18, %v92_v17  ;;  %v98_v27 = vld [vmem:[%s10484_s26 + $0xc8] sm:$0xff] }
  0x1d   :  { %184 = vmatpush1.msra.mxu0 %v5266_v53  ;;  %v95_v25 = vld [vmem:[%s10484_s26 + $0xb0] sm:$0xff]  ;;  %v102_v28 = vld [vmem:[%s10484_s26 + $0xe8] sm:$0xff]  ;;  %v6681_v29 = vpack.c.bf16 %v93_v21, %v89_v20  ;;  %v100_v30 = vld [vmem:[%s10484_s26 + $0xd8] sm:$0xff] }
  0x1e   :  { %279 = vmatpush1.msra.mxu1 %v5268_v56  ;;  %5270 = vmatmul.mubr.msk.f32.vlgmr.msra.gmra.mrb[0].mxu0 %vm151_vm0, %v109_v59  ;;  %v104_v31 = vld [vmem:[%s10484_s26 + $0xf8] sm:$0xff]  ;;  %v6697_v32 = vpack.c.bf16 %v95_v25, %v91_v24  ;;  %v97_v33 = vld [vmem:[%s10484_s26 + $0xc0] sm:$0xff]  ;;  %v6683_v36 = vpack.c.bf16 %v102_v28, %v98_v27  ;;  %v99_v37 = vld [vmem:[%s10484_s26 + $0xd0] sm:$0xff] }
  0x1f   :  { %5275 = vmatmul.mubr.msk.f32.vlgmr.msra.gmra.mrb[0].mxu1 %vm151_vm0, %v109_v59  ;;  %6672 = vmatprep.subr.bf16.mxu0 %v6671_v60  ;;  %v101_v34 = vld [vmem:[%s10484_s26 + $0xe0] sm:$0xff]  ;;  %v103_v38 = vld [vmem:[%s10484_s26 + $0xf0] sm:$0xff]  ;;  %v6699_v39 = vpack.c.bf16 %v104_v31, %v100_v30  ;;  %v106_v43 = vld [vmem:[%s10484_s26 + $0x108] sm:$0xff] }
  0x20   :  { %6688 = vmatprep.subr.bf16.mxu1 %v6687_v63  ;;  %237 = vmatprep.mubr.f32.mxu0 %v8078_v3  ;;  %v112_v35 = vld [vmem:[%s10485_s27 + $0x19] sm:$0xff]  ;;  %v6685_v40 = vpack.c.bf16 %v101_v34, %v97_v33  ;;  %v6701_v41 = vpack.c.bf16 %v103_v38, %v99_v37  ;;  %v113_v42 = vld [vmem:[%s10485_s27 + $0x21] sm:$0x3]  ;;  %v5291_v45 = vld [vmem:[%s10484_s26 + $0x248] sm:$0xff] }
  0x21   :  { %332 = vmatprep.mubr.f32.mxu1 %v8078_v3  ;;  %6674 = vmatpush1.bf16.msra.mxu0 %v6673_v2  ;;  %v108_v44 = vld [vmem:[%s10484_s26 + $0x118] sm:$0xff]  ;;  %v5295_v46 = vld [vmem:[%s10484_s26 + $0x268] sm:$0xff]  ;;  %v105_v47 = vld [vmem:[%s10484_s26 + $0x100] sm:$0xff] }
  0x22   :  { %6690 = vmatpush1.bf16.msra.mxu1 %v6689_v6  ;;  %5271 = vmatmul.mubr.msk.f32.gmra.mrb[2].mxu0 %vm151_vm0, %v110_v9  ;;  %v5293_v48 = vld [vmem:[%s10484_s26 + $0x258] sm:$0xff]  ;;  %v107_v50 = vld [vmem:[%s10484_s26 + $0x110] sm:$0xff]  ;;  %v5290_v51 = vld [vmem:[%s10484_s26 + $0x240] sm:$0xff]  ;;  %v6703_v54 = vpack.c.bf16 %v5295_v46, %v5291_v45  ;;  %v831_v46 = vlaneseq }
  0x23   :  { %5276 = vmatmul.mubr.msk.f32.gmra.mrb[2].mxu1 %vm151_vm0, %v110_v9  ;;  %6676 = vmatprep.subr.bf16.mxu0 %v6675_v10  ;;  %v5297_v49 = vld [vmem:[%s10484_s26 + $0x278] sm:$0xff]  ;;  %v5294_v52 = vld [vmem:[%s10484_s26 + $0x260] sm:$0xff]  ;;  %v5292_v55 = vld [vmem:[%s10484_s26 + $0x250] sm:$0xff] }
  0x24   :  { %6692 = vmatprep.subr.bf16.mxu1 %v6691_v13  ;;  %243 = vmatprep.mubr.f32.mxu0 %v8078_v3  ;;  %v68_v53 = vld [vmem:[%s10485_s27] sm:$0xff]  ;;  %v5296_v56 = vld [vmem:[%s10484_s26 + $0x270] sm:$0xff]  ;;  %v6719_v57 = vpack.c.bf16 %v5297_v49, %v5293_v48  ;;  %v5299_v58 = vld [vmem:[%s10484_s26 + $0x288] sm:$0xff]  ;;  %v6705_v60 = vpack.c.bf16 %v5294_v52, %v5290_v51 }
  0x25   :  { %338 = vmatprep.mubr.f32.mxu1 %v8078_v3  ;;  %6678 = vmatpush1.bf16.msra.mxu0 %v6677_v16  ;;  %v5303_v59 = vld [vmem:[%s10484_s26 + $0x2a8] sm:$0xff]  ;;  %v5301_v61 = vld [vmem:[%s10484_s26 + $0x298] sm:$0xff]  ;;  %v6721_v63 = vpack.c.bf16 %v5296_v56, %v5292_v55  ;;  %v5298_v0 = vld [vmem:[%s10484_s26 + $0x280] sm:$0xff] }
  0x26   :  { %6694 = vmatpush1.bf16.msra.mxu1 %v6693_v19  ;;  %5272 = vmatmul.mubr.msk.f32.gmra.mrb[4].mxu0 %vm151_vm0, %v111_v22  ;;  %v5305_v62 = vld [vmem:[%s10484_s26 + $0x2b8] sm:$0xff]  ;;  %v5302_v1 = vld [vmem:[%s10484_s26 + $0x2a0] sm:$0xff]  ;;  %v69_v2 = vld [vmem:[%s10485_s27 + $0x8] sm:$0xff]  ;;  %v6707_v4 = vpack.c.bf16 %v5303_v59, %v5299_v58 }
  0x27   :  { %5277 = vmatmul.mubr.msk.f32.gmra.mrb[4].mxu1 %vm151_vm0, %v111_v22  ;;  %6680 = vmatprep.subr.bf16.mxu0 %v6679_v23  ;;  %v5300_v5 = vld [vmem:[%s10484_s26 + $0x290] sm:$0xff]  ;;  %v6723_v7 = vpack.c.bf16 %v5305_v62, %v5301_v61  ;;  %v5307_v8 = vld [vmem:[%s10484_s26 + $0x2c8] sm:$0xff]  ;;  %v6709_v10 = vpack.c.bf16 %v5302_v1, %v5298_v0  ;;  %v5309_v11 = vld [vmem:[%s10484_s26 + $0x2d8] sm:$0xff] }
  0x28   :  { %6696 = vmatprep.subr.bf16.mxu1 %v6695_v26  ;;  %249 = vmatprep.mubr.f32.mxu0 %v8078_v3  ;;  %v5304_v6 = vld [vmem:[%s10484_s26 + $0x2b0] sm:$0xff]  ;;  %v5311_v9 = vld [vmem:[%s10484_s26 + $0x2e8] sm:$0xff]  ;;  %v5313_v12 = vld [vmem:[%s10484_s26 + $0x2f8] sm:$0xff] }
  0x29   :  { %344 = vmatprep.mubr.f32.mxu1 %v8078_v3  ;;  %6682 = vmatpush1.bf16.msra.mxu0 %v6681_v29  ;;  %v6725_v13 = vpack.c.bf16 %v5304_v6, %v5300_v5  ;;  %v5306_v14 = vld [vmem:[%s10484_s26 + $0x2c0] sm:$0xff]  ;;  %v70_v16 = vld [vmem:[%s10485_s27 + $0x10] sm:$0xff]  ;;  %v6711_v17 = vpack.c.bf16 %v5311_v9, %v5307_v8  ;;  %v6727_v20 = vpack.c.bf16 %v5313_v12, %v5309_v11  ;;  %v5315_v21 = vld [vmem:[%s10484_s26 + $0x308] sm:$0xff] }
  0x2a   :  { %6698 = vmatpush1.bf16.msra.mxu1 %v6697_v32  ;;  %5273 = vmatmul.mubr.msk.f32.gmra.mrb[6].mxu0 %vm151_vm0, %v112_v35  ;;  %v5310_v15 = vld [vmem:[%s10484_s26 + $0x2e0] sm:$0xff]  ;;  %v5308_v18 = vld [vmem:[%s10484_s26 + $0x2d0] sm:$0xff]  ;;  %v5319_v22 = vld [vmem:[%s10484_s26 + $0x328] sm:$0xff] }
  0x2b   :  { %5278 = vmatmul.mubr.msk.f32.gmra.mrb[6].mxu1 %vm151_vm0, %v112_v35  ;;  %6684 = vmatprep.subr.bf16.mxu0 %v6683_v36  ;;  %v5312_v19 = vld [vmem:[%s10484_s26 + $0x2f0] sm:$0xff]  ;;  %v6713_v23 = vpack.c.bf16 %v5310_v15, %v5306_v14  ;;  %v5317_v24 = vld [vmem:[%s10484_s26 + $0x318] sm:$0xff]  ;;  %v5314_v27 = vld [vmem:[%s10484_s26 + $0x300] sm:$0xff]  ;;  %v6715_v30 = vpack.c.bf16 %v5319_v22, %v5315_v21 }
  0x2c   :  { %6700 = vmatprep.subr.bf16.mxu1 %v6699_v39  ;;  %255 = vmatprep.mubr.f32.mxu0 %v8078_v3  ;;  %v5321_v25 = vld [vmem:[%s10484_s26 + $0x338] sm:$0xff]  ;;  %v6729_v26 = vpack.c.bf16 %v5312_v19, %v5308_v18  ;;  %v5318_v28 = vld [vmem:[%s10484_s26 + $0x320] sm:$0xff]  ;;  %v5316_v31 = vld [vmem:[%s10484_s26 + $0x310] sm:$0xff] }
  0x2d   :  { %350 = vmatprep.mubr.f32.mxu1 %v8078_v3  ;;  %6686 = vmatpush1.bf16.msra.mxu0 %v6685_v40  ;;  %v71_v29 = vld [vmem:[%s10485_s27 + $0x18] sm:$0xff]  ;;  %v5320_v32 = vld [vmem:[%s10484_s26 + $0x330] sm:$0xff]  ;;  %v6731_v33 = vpack.c.bf16 %v5321_v25, %v5317_v24  ;;  %v6717_v34 = vpack.c.bf16 %v5318_v28, %v5314_v27  ;;  %v72_v36 = vld [vmem:[%s10485_s27 + $0x20] sm:$0x3] }
  0x2e   :  { %6702 = vmatpush1.bf16.msra.mxu1 %v6701_v41  ;;  %5274 = vmatmul.mubr.msk.f32.gmra.mrb[8].mxu0 %vm151_vm0, %v113_v42  ;;  %v6733_v35 = vpack.c.bf16 %v5320_v32, %v5316_v31  ;;  %v5323_v37 = vld [vmem:[%s10484_s26 + $0x348] sm:$0xff]  ;;  %v5325_v38 = vld [vmem:[%s10484_s26 + $0x358] sm:$0xff]  ;;  %v5322_v39 = vld [vmem:[%s10484_s26 + $0x340] sm:$0xff] }
  0x2f   :  { %5279 = vmatmul.mubr.msk.f32.gmra.mrb[8].mxu1 %vm151_vm0, %v113_v42  ;;  %388 = vmatprep.subr.mxu0 %v106_v43  ;;  %v5324_v40 = vld [vmem:[%s10484_s26 + $0x350] sm:$0xff]  ;;  %v562_v41 = vld [vmem:[%s10485_s27 + $0x2] sm:$0xff] }
  0x30   :  { %483 = vmatprep.subr.mxu1 %v108_v44  ;;  %436 = vmatprep.mubr.f32.mxu0 %v8078_v3  ;;  %v563_v42 = vld [vmem:[%s10485_s27 + $0xa] sm:$0xff]  ;;  %v564_v43 = vld [vmem:[%s10485_s27 + $0x12] sm:$0xff]  ;;  %v565_v44 = vld [vmem:[%s10485_s27 + $0x1a] sm:$0xff] }
  0x31   :  { %389 = vmatpush1.msra.mxu0 %v105_v47  ;;  %531 = vmatprep.mubr.f32.mxu1 %v8078_v3  ;;  %v566_v45 = vld [vmem:[%s10485_s27 + $0x22] sm:$0x3]  ;;  %v8624_v47 = vshrl.u32 %v831_v46, 7 }
  0x32   :  { %484 = vmatpush1.msra.mxu1 %v107_v50  ;;  %5280 = vmatmul.mubr.msk.f32.vlgmr.msra.gmra.mrb[0].mxu0 %vm151_vm0, %v68_v53  ;;  %v829_v48 = vld [vmem:[%s10486_s30] sm:$0xf] }
  0x33   :  { %5285 = vmatmul.mubr.msk.f32.vlgmr.msra.gmra.mrb[0].mxu1 %vm151_vm0, %v68_v53  ;;  %6704 = vmatprep.subr.bf16.mxu0 %v6703_v54  ;;  %v833_v49 = vsub.s32 0, %v8624_v47  ;;  %v841_v50 = vsub.s32 2, %v8624_v47  ;;  %v837_v51 = vsub.s32 1, %v8624_v47  ;;  %v845_v52 = vsub.s32 3, %v8624_v47 }
  0x34   :  { %6720 = vmatprep.subr.bf16.mxu1 %v6719_v57  ;;  %442 = vmatprep.mubr.f32.mxu0 %v8078_v3 }
  0x35   :  { %537 = vmatprep.mubr.f32.mxu1 %v8078_v3  ;;  %6706 = vmatpush1.bf16.msra.mxu0 %v6705_v60  ;;  %v8635_v53 = vrot.slane %v829_v48, %v833_v49  ;;  %v8637_v54 = vrot.slane %v829_v48, %v841_v50  ;;  %v8641_v55 = vrot.slane %v829_v48, %v837_v51 }
  0x36   :  { %6722 = vmatpush1.bf16.msra.mxu1 %v6721_v63  ;;  %5281 = vmatmul.mubr.msk.f32.gmra.mrb[2].mxu0 %vm151_vm0, %v69_v2  ;;  %v8643_v56 = vrot.slane %v829_v48, %v845_v52 }
  0x37   :  { %5286 = vmatmul.mubr.msk.f32.gmra.mrb[2].mxu1 %vm151_vm0, %v69_v2  ;;  %6708 = vmatprep.subr.bf16.mxu0 %v6707_v4 }
  0x38   :  { %6724 = vmatprep.subr.bf16.mxu1 %v6723_v7  ;;  %448 = vmatprep.mubr.f32.mxu0 %v8078_v3 }
  0x39   :  { %543 = vmatprep.mubr.f32.mxu1 %v8078_v3  ;;  %6710 = vmatpush1.bf16.msra.mxu0 %v6709_v10 }
  0x3a   :  { %6726 = vmatpush1.bf16.msra.mxu1 %v6725_v13  ;;  %5282 = vmatmul.mubr.msk.f32.gmra.mrb[4].mxu0 %vm151_vm0, %v70_v16 }
  0x3b   :  { %5287 = vmatmul.mubr.msk.f32.gmra.mrb[4].mxu1 %vm151_vm0, %v70_v16  ;;  %6712 = vmatprep.subr.bf16.mxu0 %v6711_v17 }
  0x3c   :  { %6728 = vmatprep.subr.bf16.mxu1 %v6727_v20  ;;  %454 = vmatprep.mubr.f32.mxu0 %v8078_v3 }
  0x3d   :  { %549 = vmatprep.mubr.f32.mxu1 %v8078_v3  ;;  %6714 = vmatpush1.bf16.msra.mxu0 %v6713_v23 }
  0x3e   :  { %6730 = vmatpush1.bf16.msra.mxu1 %v6729_v26  ;;  %5283 = vmatmul.mubr.msk.f32.gmra.mrb[6].mxu0 %vm151_vm0, %v71_v29 }
  0x3f   :  { %5288 = vmatmul.mubr.msk.f32.gmra.mrb[6].mxu1 %vm151_vm0, %v71_v29  ;;  %6716 = vmatprep.subr.bf16.mxu0 %v6715_v30 }
  0x40   :  { %6732 = vmatprep.subr.bf16.mxu1 %v6731_v33  ;;  %460 = vmatprep.mubr.f32.mxu0 %v8078_v3 }
  0x41   :  { %555 = vmatprep.mubr.f32.mxu1 %v8078_v3  ;;  %6718 = vmatpush1.bf16.msra.mxu0 %v6717_v34 }
  0x42   :  { %6734 = vmatpush1.bf16.msra.mxu1 %v6733_v35  ;;  %5284 = vmatmul.mubr.msk.f32.gmra.mrb[8].mxu0 %vm151_vm0, %v72_v36 }
  0x43   :  { %5289 = vmatmul.mubr.msk.f32.gmra.mrb[8].mxu1 %vm151_vm0, %v72_v36  ;;  %635 = vmatprep.subr.mxu0 %v5323_v37 }
  0x44   :  { %730 = vmatprep.subr.mxu1 %v5325_v38  ;;  %683 = vmatprep.mubr.f32.mxu0 %v8078_v3 }
  0x45   :  { %636 = vmatpush1.msra.mxu0 %v5322_v39  ;;  %778 = vmatprep.mubr.f32.mxu1 %v8078_v3 }
  0x46   :  { %731 = vmatpush1.msra.mxu1 %v5324_v40  ;;  %5326 = vmatmul.mubr.msk.f32.vlgmr.msra.gmra.mrb[0].mxu0 %vm151_vm0, %v562_v41 }
  0x47   :  { %5331 = vmatmul.mubr.msk.f32.vlgmr.msra.gmra.mrb[0].mxu1 %vm151_vm0, %v562_v41  ;;  %689 = vmatprep.mubr.f32.mxu0 %v8078_v3 }
  0x48   :  { %784 = vmatprep.mubr.f32.mxu1 %v8078_v3 }
  0x4a   :  { %5327 = vmatmul.mubr.msk.f32.gmra.mrb[2].mxu0 %vm151_vm0, %v563_v42 }
  0x4b   :  { %5332 = vmatmul.mubr.msk.f32.gmra.mrb[2].mxu1 %vm151_vm0, %v563_v42  ;;  %695 = vmatprep.mubr.f32.mxu0 %v8078_v3 }
  0x4c   :  { %790 = vmatprep.mubr.f32.mxu1 %v8078_v3 }
  0x4e   :  { %5328 = vmatmul.mubr.msk.f32.gmra.mrb[4].mxu0 %vm151_vm0, %v564_v43 }
  0x4f   :  { %5333 = vmatmul.mubr.msk.f32.gmra.mrb[4].mxu1 %vm151_vm0, %v564_v43  ;;  %701 = vmatprep.mubr.f32.mxu0 %v8078_v3 }
  0x50   :  { %796 = vmatprep.mubr.f32.mxu1 %v8078_v3 }
  0x52   :  { %5329 = vmatmul.mubr.msk.f32.gmra.mrb[6].mxu0 %vm151_vm0, %v565_v44 }
  0x53   :  { %5334 = vmatmul.mubr.msk.f32.gmra.mrb[6].mxu1 %vm151_vm0, %v565_v44  ;;  %707 = vmatprep.mubr.f32.mxu0 %v8078_v3 }
  0x54   :  { %802 = vmatprep.mubr.f32.mxu1 %v8078_v3 }
  0x56   :  { %5330 = vmatmul.mubr.msk.f32.gmra.mrb[8].mxu0 %vm151_vm0, %v566_v45 }
  0x57   :  { %5335 = vmatmul.mubr.msk.f32.gmra.mrb[8].mxu1 %vm151_vm0, %v566_v45  ;;  %984 = vmatprep.mubr.f32.mxu0 %v8078_v3  ;;  %vm4785_vm0 = vcmask 64512  }
  0x58   :  { %1067 = vmatprep.mubr.f32.mxu1 %v8078_v3 }
 0x119   :  { %v685_v57 = vpop.f32.mrb[0].mxu0 }
 0x11a   :  { %v851_v58 = vadd.f32 %v8635_v53, %v685_v57  ;;  %v780_v59 = vpop.f32.mrb[0].mxu1  ;;  %v687_v60 = vpop.f32.mrb[1].mxu0  ;;  %v5711_v57 = vld [vmem:[%s10487_s22] sm:$0xff]  }
 0x11b   :  { %v853_v61 = vadd.f32 %v8637_v54, %v780_v59  ;;  %v852_v62 = vadd.f32 %v8641_v55, %v687_v60  ;;  %v782_v63 = vpop.f32.mrb[1].mxu1 }
 0x11c   :  { %v871_v0 = vmax.f32 %v851_v58, 0.0  ;;  %v854_v1 = vadd.f32 %v8643_v56, %v782_v63 }
 0x11d   :  { %v873_v2 = vmax.f32 %v853_v61, 0.0  ;;  %v872_v4 = vmax.f32 %v852_v62, 0.0  ;;  %v691_v5 = vpop.f32.mrb[2].mxu0 }
 0x11e   :  { %v874_v6 = vmax.f32 %v854_v1, 0.0  ;;  %v855_v7 = vadd.f32 %v8635_v53, %v691_v5  ;;  %v786_v8 = vpop.f32.mrb[2].mxu1  ;;  %v693_v9 = vpop.f32.mrb[3].mxu0  ;;  %v5712_v5 = vunpack.c.l.bf16 %v5711_v57 }
 0x11f   :  { %v857_v10 = vadd.f32 %v8637_v54, %v786_v8  ;;  %v856_v11 = vadd.f32 %v8641_v55, %v693_v9  ;;  %v788_v12 = vpop.f32.mrb[3].mxu1  ;;  %v7806_v8 = vld [vmem:[%s10488_s2 + $0x4] ss:$12 sps:$4 sm:$0xff]   ;;  %v7833_v9 = vld [vmem:[%s10488_s2 + $0xc8] ss:$12 sps:$4 sm:$0xff]  }
 0x120   :  { %v875_v13 = vmax.f32 %v855_v7, 0.0  ;;  %v858_v14 = vadd.f32 %v8643_v56, %v788_v12  ;;  %v5346_v7 = vld [vmem:[%s10487_s22 + $0xc] sm:$0xff]   ;;  %v7809_v12 = vld [vmem:[%s10488_s2 + $0x1c] ss:$12 sps:$4 sm:$0xff]  }
 0x121   :  { %v877_v15 = vmax.f32 %v857_v10, 0.0  ;;  %v876_v16 = vmax.f32 %v856_v11, 0.0  ;;  %v697_v17 = vpop.f32.mrb[4].mxu0  ;;  %v1090_v10 = vunpack.c.l.bf16 %v5346_v7  ;;  %v7808_v11 = vld [vmem:[%s10488_s2] ss:$12 sps:$4 sm:$0xff]  }
 0x122   :  { %v8653_v18 = vpack.c.bf16 %v875_v13, %v871_v0  ;;  %v878_v19 = vmax.f32 %v858_v14, 0.0  ;;  %v859_v20 = vadd.f32 %v8635_v53, %v697_v17  ;;  %v792_v21 = vpop.f32.mrb[4].mxu1  ;;  %v699_v22 = vpop.f32.mrb[5].mxu0  ;;  %v1091_v13 = vunpack.c.h.bf16 %v5346_v7  ;;  %v5348_v14 = vld [vmem:[%s10487_s22 + $0x14] sm:$0x3] }
 0x123   :  { %v6745_v23 = vpack.c.bf16 %v877_v15, %v873_v2  ;;  %v6735_v24 = vpack.c.bf16 %v876_v16, %v872_v4  ;;  %v861_v25 = vadd.f32 %v8637_v54, %v792_v21  ;;  %v860_v26 = vadd.f32 %v8641_v55, %v699_v22  ;;  %v794_v27 = vpop.f32.mrb[5].mxu1  ;;  %v7811_v15 = vld [vmem:[%s10488_s2 + $0x18] ss:$12 sps:$4 sm:$0xff]   ;;  %v7812_v16 = vld [vmem:[%s10488_s2 + $0x34] ss:$12 sps:$4 sm:$0xff]  }
 0x124   :  { %v6743_v28 = vpack.c.bf16 %v878_v19, %v874_v6  ;;  %v879_v29 = vmax.f32 %v859_v20, 0.0  ;;  %v862_v30 = vadd.f32 %v8643_v56, %v794_v27  ;;  %v7834_v17 = vld [vmem:[%s10488_s2 + $0x8] ss:$12 sps:$4 sm:$0xff]   ;;  %v1092_v19 = vunpack.c.l.bf16 %v5348_v14  ;;  %v7814_v20 = vld [vmem:[%s10488_s2 + $0x30] ss:$12 sps:$4 sm:$0xff]  }
 0x125   :  { %v881_v31 = vmax.f32 %v861_v25, 0.0  ;;  %v880_v32 = vmax.f32 %v860_v26, 0.0  ;;  %v703_v33 = vpop.f32.mrb[6].mxu0  ;;  %6736 = vmatprep.subr.bf16.mxu0 %v6735_v24  ;;  %v7815_v21 = vld [vmem:[%s10488_s2 + $0x4c] ss:$12 sps:$4 sm:$0xff]  }
 0x126   :  { %v882_v34 = vmax.f32 %v862_v30, 0.0  ;;  %v863_v35 = vadd.f32 %v8635_v53, %v703_v33  ;;  %v798_v36 = vpop.f32.mrb[6].mxu1  ;;  %6744 = vmatprep.subr.bf16.mxu1 %v6743_v28  ;;  %v705_v37 = vpop.f32.mrb[7].mxu0  ;;  %6738 = vmatpush1.bf16.msra.mxu0 %v8653_v18  ;;  %v7839_v22 = vld [vmem:[%s10488_s2 + $0x20] ss:$12 sps:$4 sm:$0xff]  }
 0x127   :  { %v865_v38 = vadd.f32 %v8637_v54, %v798_v36  ;;  %v864_v39 = vadd.f32 %v8641_v55, %v705_v37  ;;  %v800_v40 = vpop.f32.mrb[7].mxu1  ;;  %6746 = vmatpush1.bf16.msra.mxu1 %v6745_v23  ;;  %v7818_v25 = vld [vmem:[%s10488_s2 + $0x64] ss:$12 sps:$4 sm:$0xff]   ;;  %v7824_v33 = vld [vmem:[%s10488_s2 + $0x94] ss:$12 sps:$4 sm:$0xff]  }
 0x128   :  { %v883_v41 = vmax.f32 %v863_v35, 0.0  ;;  %v866_v42 = vadd.f32 %v8643_v56, %v800_v40  ;;  %v7844_v26 = vld [vmem:[%s10488_s2 + $0x38] ss:$12 sps:$4 sm:$0xff]   ;;  %v7848_v27 = vld [vmem:[%s10488_s2 + $0x110] ss:$12 sps:$4 sm:$0xff]  }
 0x129   :  { %v885_v43 = vmax.f32 %v865_v38, 0.0  ;;  %v884_v44 = vmax.f32 %v864_v39, 0.0  ;;  %v709_v45 = vpop.f32.mrb[8].mxu0  ;;  %v7849_v30 = vld [vmem:[%s10488_s2 + $0x50] ss:$12 sps:$4 sm:$0xff]  }
 0x12a   :  { %v6741_v46 = vpack.c.bf16 %v883_v41, %v879_v29  ;;  %v886_v48 = vmax.f32 %v866_v42, 0.0  ;;  %v804_v50 = vpop.f32.mrb[8].mxu1  ;;  %v711_v52 = vpop.f32.mrb[9].mxu0  ;;  %v867_v63 = vadd.f32 %v8635_v53, %v709_v45  ;;  %v5713_v53 = vunpack.c.h.bf16 %v5711_v57  ;;  %v7821_v29 = vld [vmem:[%s10488_s2 + $0x7c] ss:$12 sps:$4 sm:$0xff]  }
 0x12b   :  { %v6749_v58 = vpack.c.bf16 %v885_v43, %v881_v31  ;;  %v6739_v59 = vpack.c.bf16 %v884_v44, %v880_v32  ;;  %v868_v60 = vadd.f32 %v8641_v55, %v711_v52  ;;  %v806_v61 = vpop.f32.mrb[9].mxu1  ;;  %v869_v1 = vadd.f32 %v8637_v54, %v804_v50  ;;  %v893_v54 = vld [vmem:[%s10487_s22 + $0x8] sm:$0x3]  ;;  %v7823_v32 = vld [vmem:[%s10488_s2 + $0x78] ss:$12 sps:$4 sm:$0xff]  }
 0x12c   :  { %v6747_v62 = vpack.c.bf16 %v886_v48, %v882_v34  ;;  %v870_v0 = vadd.f32 %v8643_v56, %v806_v61  ;;  %v887_v6 = vmax.f32 %v867_v63, 0.0  ;;  %v896_v56 = vunpack.c.l.bf16 %v893_v54  ;;  %v7853_v31 = vld [vmem:[%s10488_s2 + $0x128] ss:$12 sps:$4 sm:$0xff]   ;;  %v7826_v34 = vld [vmem:[%s10488_s2 + $0x90] ss:$12 sps:$4 sm:$0xff]  }
 0x12d   :  { %v888_v2 = vmax.f32 %v868_v60, 0.0  ;;  %6740 = vmatprep.subr.bf16.mxu0 %v6739_v59  ;;  %v889_v55 = vmax.f32 %v869_v1, 0.0  ;;  %v7827_v35 = vld [vmem:[%s10488_s2 + $0xac] ss:$12 sps:$4 sm:$0xff]   ;;  %v7829_v36 = vld [vmem:[%s10488_s2 + $0xa8] ss:$12 sps:$4 sm:$0xff]  }
 0x12e   :  { %v890_v4 = vmax.f32 %v870_v0, 0.0  ;;  %6748 = vmatprep.subr.bf16.mxu1 %v6747_v62  ;;  %6742 = vmatpush1.bf16.msra.mxu0 %v6741_v46  ;;  %v7830_v37 = vld [vmem:[%s10488_s2 + $0xc4] ss:$12 sps:$4 sm:$0xff]   ;;  %v7832_v38 = vld [vmem:[%s10488_s2 + $0xc0] ss:$12 sps:$4 sm:$0xff]  }
 0x12f   :  { %6750 = vmatpush1.bf16.msra.mxu1 %v6749_v58  ;;  %5336 = vmatprep.subr.msk.mxu0 %vm907_vm1, %v888_v2  ;;  %v7835_v39 = vld [vmem:[%s10488_s2 + $0xdc] ss:$12 sps:$4 sm:$0xff]   ;;  %v7837_v40 = vld [vmem:[%s10488_s2 + $0xd8] ss:$12 sps:$4 sm:$0xff]   ;;  %v7840_v41 = vld [vmem:[%s10488_s2 + $0xf4] ss:$12 sps:$4 sm:$0xff]  }
 0x130   :  { %5341 = vmatprep.subr.msk.mxu1 %vm907_vm1, %v890_v4  ;;  %v7842_v42 = vld [vmem:[%s10488_s2 + $0xf0] ss:$12 sps:$4 sm:$0xff]   ;;  %v7845_v43 = vld [vmem:[%s10488_s2 + $0x10c] ss:$12 sps:$4 sm:$0xff]   ;;  %v7847_v44 = vld [vmem:[%s10488_s2 + $0x108] ss:$12 sps:$4 sm:$0xff]  }
 0x131   :  { %v7850_v45 = vld [vmem:[%s10488_s2 + $0x124] ss:$12 sps:$4 sm:$0xff]   ;;  %v7854_v48 = vld [vmem:[%s10488_s2 + $0x68] ss:$12 sps:$4 sm:$0xff]   ;;  %v7858_v57 = vld [vmem:[%s10488_s2 + $0x140] ss:$12 sps:$4 sm:$0xff]  }
 0x132   :  { %5337 = vmatpush1.msk.msra.mxu0 %vm907_vm1, %v887_v6  ;;  %v7855_v50 = vld [vmem:[%s10488_s2 + $0x13c] ss:$12 sps:$4 sm:$0xff]   ;;  %v7857_v52 = vld [vmem:[%s10488_s2 + $0x138] ss:$12 sps:$4 sm:$0xff]  }
 0x133   :  { %5342 = vmatpush1.msk.msra.mxu1 %vm907_vm1, %v889_v55  ;;  %5338 = vmatmul.mubr.msk.f32.vlgmr.msra.gmra.mrb[10].mxu0 %vm897_vm2, %v5712_v5  ;;  %v7862_v60 = vld [vmem:[%s10488_s2 + $0x150] ss:$12 sps:$4 sm:$0xff]   ;;  %v7863_v61 = vld [vmem:[%s10488_s2 + $0x158] ss:$12 sps:$4 sm:$0xff]   ;;  %v7867_v1 = vld [vmem:[%s10488_s2 + $0x168] ss:$12 sps:$4 sm:$0xff]  }
 0x134   :  { %6752 = vmatprep.subr.bf16.mxu0 %v6735_v24  ;;  %6760 = vmatprep.subr.bf16.mxu1 %v6743_v28  ;;  %v7817_v24 = vld [vmem:[%s10488_s2 + $0x48] ss:$12 sps:$4 sm:$0xff]   ;;  %v7820_v28 = vld [vmem:[%s10488_s2 + $0x60] ss:$12 sps:$4 sm:$0xff]   ;;  %v7868_v0 = vld [vmem:[%s10488_s2 + $0x170] ss:$12 sps:$4 sm:$0xff]  }
 0x135   :  { %5343 = vmatmul.mubr.msk.f32.vlgmr.msra.gmra.mrb[10].mxu1 %vm897_vm2, %v5712_v5  ;;  %6754 = vmatpush1.bf16.msra.mxu0 %v8653_v18  ;;  %v7838_v18 = vld [vmem:[%s10488_s2 + $0xe0] ss:$12 sps:$4 sm:$0xff]   ;;  %v7873_v5 = vld [vmem:[%s10488_s2 + $0x248] ss:$12 sps:$4 sm:$0xff]  }
 0x136   :  { %6762 = vmatpush1.bf16.msra.mxu1 %v6745_v23  ;;  %6756 = vmatprep.subr.bf16.mxu0 %v6739_v59  ;;  %v7843_v23 = vld [vmem:[%s10488_s2 + $0xf8] ss:$12 sps:$4 sm:$0xff]   ;;  %v7860_v59 = vld [vmem:[%s10488_s2 + $0x154] ss:$12 sps:$4 sm:$0xff]  }
 0x137   :  { %6764 = vmatprep.subr.bf16.mxu1 %v6747_v62  ;;  %990 = vmatprep.mubr.f32.mxu0 %v8078_v3  ;;  %v7864_v62 = vld [vmem:[%s10488_s2 + $0x98] ss:$12 sps:$4 sm:$0xff]  }
 0x138   :  { %5339 = vmatmul.mubr.msk.f32.gmra.mrb[12].mxu0 %vm897_vm2, %v5713_v53  ;;  %1073 = vmatprep.mubr.f32.mxu1 %v8078_v3  ;;  %v7865_v63 = vld [vmem:[%s10488_s2 + $0x16c] ss:$12 sps:$4 sm:$0xff]  }
 0x139   :  { %6758 = vmatpush1.bf16.msra.mxu0 %v6741_v46  ;;  %996 = vmatprep.mubr.f32.mxu0 %v8078_v3  ;;  %v7852_v46 = vld [vmem:[%s10488_s2 + $0x120] ss:$12 sps:$4 sm:$0xff]  }
 0x13a   :  { %6766 = vmatpush1.bf16.msra.mxu1 %v6749_v58  ;;  %5349 = vmatprep.subr.msk.mxu0 %vm907_vm1, %v888_v2  ;;  %v7859_v58 = vld [vmem:[%s10488_s2 + $0x80] ss:$12 sps:$4 sm:$0xff]   ;;  %v7869_v2 = vld [vmem:[%s10488_s2 + $0xb0] ss:$12 sps:$4 sm:$0xff]  }
 0x13b   :  { %5354 = vmatprep.subr.msk.mxu1 %vm907_vm1, %v890_v4  ;;  %5344 = vmatmul.mubr.msk.f32.gmra.mrb[12].mxu1 %vm897_vm2, %v5713_v53  ;;  %v7870_v4 = vld [vmem:[%s10488_s2 + $0x184] ss:$12 sps:$4 sm:$0xff]  }
 0x13c   :  { %5340 = vmatmul.mubr.msk.f32.gmra.mrb[14].mxu0 %vm897_vm2, %v896_v56  ;;  %1079 = vmatprep.mubr.f32.mxu1 %v8078_v3 }
 0x13d   :  { %5350 = vmatpush1.msk.msra.mxu0 %vm907_vm1, %v887_v6  ;;  %1166 = vmatprep.mubr.f32.mxu0 %v8078_v3 }
 0x13e   :  { %5355 = vmatpush1.msk.msra.mxu1 %vm907_vm1, %v889_v55  ;;  %6768 = vmatprep.subr.bf16.mxu0 %v7806_v8 }
 0x13f   :  { %5345 = vmatmul.mubr.msk.f32.gmra.mrb[14].mxu1 %vm897_vm2, %v896_v56  ;;  %6896 = vmatprep.subr.bf16.mxu1 %v7833_v9 }
 0x140   :  { %5351 = vmatmul.mubr.msk.f32.vlgmr.msra.gmra.mrb[16].mxu0 %vm897_vm2, %v1090_v10  ;;  %1249 = vmatprep.mubr.f32.mxu1 %v8078_v3 }
 0x141   :  { %1172 = vmatprep.mubr.f32.mxu0 %v8078_v3  ;;  %6770 = vmatpush1.bf16.msra.mxu0 %v7808_v11 }
 0x142   :  { %6772 = vmatprep.subr.bf16.mxu0 %v7809_v12 }
 0x143   :  { %5356 = vmatmul.mubr.msk.f32.vlgmr.msra.gmra.mrb[16].mxu1 %vm897_vm2, %v1090_v10 }
 0x144   :  { %5352 = vmatmul.mubr.msk.f32.gmra.mrb[18].mxu0 %vm897_vm2, %v1091_v13  ;;  %1255 = vmatprep.mubr.f32.mxu1 %v8078_v3 }
 0x145   :  { %1178 = vmatprep.mubr.f32.mxu0 %v8078_v3  ;;  %6774 = vmatpush1.bf16.msra.mxu0 %v7811_v15 }
 0x146   :  { %6776 = vmatprep.subr.bf16.mxu0 %v7812_v16  ;;  %6898 = vmatpush3.bf16.msra.mxu1 %v7834_v17 }
 0x147   :  { %5357 = vmatmul.mubr.msk.f32.gmra.mrb[18].mxu1 %vm897_vm2, %v1091_v13  ;;  %6900 = vmatprep.subr.bf16.mxu1 %v7838_v18  ;;  %v7872_v18 = vld [vmem:[%s10488_s2 + $0x180] ss:$12 sps:$4 sm:$0xff]  }
 0x148   :  { %5353 = vmatmul.mubr.msk.f32.gmra.mrb[20].mxu0 %vm897_vm2, %v1092_v19  ;;  %1261 = vmatprep.mubr.f32.mxu1 %v8078_v3 }
 0x149   :  { %6778 = vmatpush1.bf16.msra.mxu0 %v7814_v20  ;;  %v7875_v20 = vld [vmem:[%s10488_s2 + $0x19c] ss:$12 sps:$4 sm:$0xff]  }
 0x14a   :  { %6780 = vmatprep.subr.bf16.mxu0 %v7815_v21  ;;  %6902 = vmatpush3.bf16.msra.mxu1 %v7839_v22  ;;  %v7878_v21 = vld [vmem:[%s10488_s2 + $0x260] ss:$12 sps:$4 sm:$0xff]  }
 0x14b   :  { %5358 = vmatmul.mubr.msk.f32.gmra.mrb[20].mxu1 %vm897_vm2, %v1092_v19  ;;  %6904 = vmatprep.subr.bf16.mxu1 %v7843_v23  ;;  %v7874_v19 = vld [vmem:[%s10488_s2 + $0x188] ss:$12 sps:$4 sm:$0xff]  }
 0x14d   :  { %6782 = vmatpush1.bf16.msra.mxu0 %v7817_v24 }
 0x14e   :  { %6784 = vmatprep.subr.bf16.mxu0 %v7818_v25  ;;  %6906 = vmatpush3.bf16.msra.mxu1 %v7844_v26 }
 0x14f   :  { %6908 = vmatprep.subr.bf16.mxu1 %v7848_v27 }
 0x151   :  { %6786 = vmatpush1.bf16.msra.mxu0 %v7820_v28 }
 0x152   :  { %6788 = vmatprep.subr.bf16.mxu0 %v7821_v29  ;;  %6910 = vmatpush3.bf16.msra.mxu1 %v7849_v30  ;;  %v7877_v30 = vld [vmem:[%s10488_s2 + $0x198] ss:$12 sps:$4 sm:$0xff]  }
 0x153   :  { %6912 = vmatprep.subr.bf16.mxu1 %v7853_v31  ;;  %v7879_v31 = vld [vmem:[%s10488_s2 + $0x1a0] ss:$12 sps:$4 sm:$0xff]  }
 0x155   :  { %6790 = vmatpush1.bf16.msra.mxu0 %v7823_v32  ;;  %v7880_v32 = vld [vmem:[%s10488_s2 + $0x1b4] ss:$12 sps:$4 sm:$0xff]  }
 0x156   :  { %6792 = vmatprep.subr.bf16.mxu0 %v7824_v33  ;;  %6914 = vmatpush3.bf16.msra.mxu1 %v7854_v48  ;;  %v7883_v33 = vld [vmem:[%s10488_s2 + $0x278] ss:$12 sps:$4 sm:$0xff]  }
 0x157   :  { %6916 = vmatprep.subr.bf16.mxu1 %v7858_v57  ;;  %v7887_v57 = vld [vmem:[%s10488_s2 + $0x1c8] ss:$12 sps:$4 sm:$0xff]  }
 0x159   :  { %6794 = vmatpush1.bf16.msra.mxu0 %v7826_v34 }
 0x15a   :  { %6796 = vmatprep.subr.bf16.mxu0 %v7827_v35  ;;  %6918 = vmatpush3.bf16.msra.mxu1 %v7859_v58  ;;  %v7889_v58 = vld [vmem:[%s10488_s2 + $0x1d0] ss:$12 sps:$4 sm:$0xff]  }
 0x15b   :  { %6920 = vmatprep.subr.bf16.mxu1 %v7863_v61  ;;  %v7892_v61 = vld [vmem:[%s10488_s2 + $0x1e0] ss:$12 sps:$4 sm:$0xff]  }
 0x15d   :  { %6798 = vmatpush1.bf16.msra.mxu0 %v7829_v36 }
 0x15e   :  { %6800 = vmatprep.subr.bf16.mxu0 %v7830_v37  ;;  %6922 = vmatpush3.bf16.msra.mxu1 %v7864_v62  ;;  %v7894_v62 = vld [vmem:[%s10488_s2 + $0x1e8] ss:$12 sps:$4 sm:$0xff]  }
 0x15f   :  { %6924 = vmatprep.subr.bf16.mxu1 %v7868_v0  ;;  %v7898_v0 = vld [vmem:[%s10488_s2 + $0x2c0] ss:$12 sps:$4 sm:$0xff]  }
 0x161   :  { %6802 = vmatpush1.bf16.msra.mxu0 %v7832_v38 }
 0x162   :  { %6804 = vmatprep.subr.bf16.mxu0 %v7835_v39  ;;  %6926 = vmatpush3.bf16.msra.mxu1 %v7869_v2  ;;  %v7899_v2 = vld [vmem:[%s10488_s2 + $0x200] ss:$12 sps:$4 sm:$0xff]  }
 0x163   :  { %6928 = vmatprep.subr.bf16.mxu1 %v7873_v5  ;;  %v7903_v5 = vld [vmem:[%s10488_s2 + $0x2d8] ss:$12 sps:$4 sm:$0xff]  }
 0x165   :  { %6806 = vmatpush1.bf16.msra.mxu0 %v7837_v40 }
 0x166   :  { %6808 = vmatprep.subr.bf16.mxu0 %v7840_v41 }
 0x169   :  { %6810 = vmatpush1.bf16.msra.mxu0 %v7842_v42  ;;  %v7882_v42 = vld [vmem:[%s10488_s2 + $0x1b0] ss:$12 sps:$4 sm:$0xff]  }
 0x16a   :  { %6812 = vmatprep.subr.bf16.mxu0 %v7845_v43  ;;  %v7884_v43 = vld [vmem:[%s10488_s2 + $0x1b8] ss:$12 sps:$4 sm:$0xff]  }
 0x16d   :  { %6814 = vmatpush1.bf16.msra.mxu0 %v7847_v44  ;;  %v7885_v44 = vld [vmem:[%s10488_s2 + $0x1cc] ss:$12 sps:$4 sm:$0xff]  }
 0x16e   :  { %6816 = vmatprep.subr.bf16.mxu0 %v7850_v45  ;;  %v7888_v45 = vld [vmem:[%s10488_s2 + $0x290] ss:$12 sps:$4 sm:$0xff]  }
 0x171   :  { %6818 = vmatpush1.bf16.msra.mxu0 %v7852_v46 }
 0x172   :  { %6820 = vmatprep.subr.bf16.mxu0 %v7855_v50 }
 0x175   :  { %6822 = vmatpush1.bf16.msra.mxu0 %v7857_v52 }
 0x176   :  { %6824 = vmatprep.subr.bf16.mxu0 %v7860_v59  ;;  %v7890_v59 = vld [vmem:[%s10488_s2 + $0x1e4] ss:$12 sps:$4 sm:$0xff]  }
 0x179   :  { %6826 = vmatpush1.bf16.msra.mxu0 %v7862_v60  ;;  %v7893_v60 = vld [vmem:[%s10488_s2 + $0x2a8] ss:$12 sps:$4 sm:$0xff]  }
 0x17a   :  { %6828 = vmatprep.subr.bf16.mxu0 %v7865_v63  ;;  %v7895_v63 = vld [vmem:[%s10488_s2 + $0x1fc] ss:$12 sps:$4 sm:$0xff]  }
 0x17d   :  { %6830 = vmatpush1.bf16.msra.mxu0 %v7867_v1  ;;  %v7897_v1 = vld [vmem:[%s10488_s2 + $0x1f8] ss:$12 sps:$4 sm:$0xff]  }
 0x17e   :  { %6832 = vmatprep.subr.bf16.mxu0 %v7870_v4  ;;  %v7900_v4 = vld [vmem:[%s10488_s2 + $0x214] ss:$12 sps:$4 sm:$0xff]  }
 0x206   :  { %v986_v6 = vpop.f32.mrb[10].mxu0 }
 0x207   :  { %v988_v55 = vpop.f32.mrb[11].mxu0 }
 0x208   :  { %v1069_v53 = vpop.f32.mrb[10].mxu1 }
 0x209   :  { %v1071_v54 = vpop.f32.mrb[11].mxu1 }
 0x20b   :  { %v992_v56 = vpop.f32.mrb[12].mxu0 }
 0x20c   :  { %v994_v7 = vpop.f32.mrb[13].mxu0 }
 0x20e   :  { %v1075_v8 = vpop.f32.mrb[12].mxu1 }
 0x20f   :  { %v998_v9 = vpop.f32.mrb[14].mxu0  ;;  %v1077_v10 = vpop.f32.mrb[13].mxu1 }
 0x210   :  { %v1000_v11 = vpop.f32.mrb[15].mxu0 }
 0x212   :  { %v1081_v12 = vpop.f32.mrb[14].mxu1 }
 0x213   :  { %v1168_v13 = vpop.f32.mrb[16].mxu0  ;;  %v1083_v14 = vpop.f32.mrb[15].mxu1 }
 0x214   :  { %v8861_v15 = vmax.f32 %v986_v6, %v1168_v13  ;;  %v1170_v16 = vpop.f32.mrb[17].mxu0  ;;  %v7902_v6 = vld [vmem:[%s10488_s2 + $0x210] ss:$12 sps:$4 sm:$0xff]  }
 0x215   :  { %v8863_v17 = vmax.f32 %v988_v55, %v1170_v16  ;;  %v7904_v55 = vld [vmem:[%s10488_s2 + $0x218] ss:$12 sps:$4 sm:$0xff]   ;;  %v7919_v13 = vld [vmem:[%s10488_s2 + $0x31c] ss:$12 sps:$4 sm:$0xff]  }
 0x216   :  { %v1251_v22 = vpop.f32.mrb[16].mxu1  ;;  %v7921_v16 = vld [vmem:[%s10488_s2 + $0x318] ss:$12 sps:$4 sm:$0xff]  }
 0x217   :  { %v1174_v23 = vpop.f32.mrb[18].mxu0  ;;  %1664 = vmatprep.mubr.f32.mxu0 %v8863_v17  ;;  %1830 = vmatprep.mubr.f32.mxu1 %v8863_v17  ;;  %v8879_v24 = vmax.f32 %v1069_v53, %v1251_v22  ;;  %v1253_v25 = vpop.f32.mrb[17].mxu1  ;;  %v7905_v53 = vld [vmem:[%s10488_s2 + $0x22c] ss:$12 sps:$4 sm:$0xff]  }
 0x218   :  { %v8881_v26 = vmax.f32 %v992_v56, %v1174_v23  ;;  %v1176_v27 = vpop.f32.mrb[19].mxu0  ;;  %1665 = vmatmul.mubr.f32.vlgmr.msra.gmra.mrb[22].mxu0 %v8861_v15  ;;  %1831 = vmatmul.mubr.f32.vlgmr.msra.gmra.mrb[22].mxu1 %v8861_v15  ;;  %v8885_v28 = vmax.f32 %v1071_v54, %v1253_v25  ;;  %v7908_v54 = vld [vmem:[%s10488_s2 + $0x2f0] ss:$12 sps:$4 sm:$0xff]   ;;  %v7907_v56 = vld [vmem:[%s10488_s2 + $0x228] ss:$12 sps:$4 sm:$0xff]  }
 0x219   :  { %v8887_v29 = vmax.f32 %v994_v7, %v1176_v27  ;;  %6834 = vmatpush1.bf16.msra.mxu0 %v7872_v18  ;;  %6930 = vmatpush3.bf16.msra.mxu1 %v7874_v19  ;;  %v7909_v7 = vld [vmem:[%s10488_s2 + $0x230] ss:$12 sps:$4 sm:$0xff]   ;;  %v7922_v18 = vld [vmem:[%s10488_s2 + $0x274] ss:$12 sps:$4 sm:$0xff]   ;;  %v7928_v22 = vld [vmem:[%s10488_s2 + $0x28c] ss:$12 sps:$4 sm:$0xff]  }
 0x21a   :  { %6836 = vmatprep.subr.bf16.mxu0 %v7875_v20  ;;  %6932 = vmatprep.subr.bf16.mxu1 %v7878_v21  ;;  %v1257_v34 = vpop.f32.mrb[18].mxu1  ;;  %v7925_v19 = vld [vmem:[%s10488_s2 + $0x334] ss:$12 sps:$4 sm:$0xff]   ;;  %v7924_v20 = vld [vmem:[%s10488_s2 + $0x270] ss:$12 sps:$4 sm:$0xff]  }
 0x21b   :  { %v1180_v35 = vpop.f32.mrb[20].mxu0  ;;  %1670 = vmatprep.mubr.f32.mxu0 %v8887_v29  ;;  %1835 = vmatprep.mubr.f32.mxu1 %v8887_v29  ;;  %v8903_v36 = vmax.f32 %v1075_v8, %v1257_v34  ;;  %v1259_v37 = vpop.f32.mrb[19].mxu1  ;;  %v7910_v8 = vld [vmem:[%s10488_s2 + $0x244] ss:$12 sps:$4 sm:$0xff]   ;;  %v7931_v23 = vld [vmem:[%s10488_s2 + $0x34c] ss:$12 sps:$4 sm:$0xff]  }
 0x21c   :  { %v8905_v38 = vmax.f32 %v998_v9, %v1180_v35  ;;  %v1182_v39 = vpop.f32.mrb[21].mxu0  ;;  %1671 = vmatmul.mubr.f32.gmra.mrb[24].mxu0 %v8881_v26  ;;  %1836 = vmatmul.mubr.f32.gmra.mrb[24].mxu1 %v8881_v26  ;;  %v8909_v40 = vmax.f32 %v1077_v10, %v1259_v37  ;;  %v7913_v9 = vld [vmem:[%s10488_s2 + $0x304] ss:$12 sps:$4 sm:$0xff]   ;;  %v7912_v10 = vld [vmem:[%s10488_s2 + $0x240] ss:$12 sps:$4 sm:$0xff]  }
 0x21d   :  { %v8911_v41 = vmax.f32 %v1000_v11, %v1182_v39  ;;  %6838 = vmatpush1.bf16.msra.mxu0 %v7877_v30  ;;  %6934 = vmatpush3.bf16.msra.mxu1 %v7879_v31  ;;  %v7915_v11 = vld [vmem:[%s10488_s2 + $0x300] ss:$12 sps:$4 sm:$0xff]   ;;  %v7927_v21 = vld [vmem:[%s10488_s2 + $0x330] ss:$12 sps:$4 sm:$0xff]   ;;  %v7930_v25 = vld [vmem:[%s10488_s2 + $0x288] ss:$12 sps:$4 sm:$0xff]  }
 0x21e   :  { %6840 = vmatprep.subr.bf16.mxu0 %v7880_v32  ;;  %6936 = vmatprep.subr.bf16.mxu1 %v7883_v33  ;;  %v1263_v46 = vpop.f32.mrb[20].mxu1  ;;  %v7933_v27 = vld [vmem:[%s10488_s2 + $0x348] ss:$12 sps:$4 sm:$0xff]   ;;  %v7934_v30 = vld [vmem:[%s10488_s2 + $0x2a4] ss:$12 sps:$4 sm:$0xff]  }
 0x21f   :  { %1676 = vmatprep.mubr.f32.mxu0 %v8911_v41  ;;  %1840 = vmatprep.mubr.f32.mxu1 %v8911_v41  ;;  %v8927_v48 = vmax.f32 %v1081_v12, %v1263_v46  ;;  %v1265_v50 = vpop.f32.mrb[21].mxu1  ;;  %v7916_v12 = vld [vmem:[%s10488_s2 + $0x25c] ss:$12 sps:$4 sm:$0xff]   ;;  %v7937_v31 = vld [vmem:[%s10488_s2 + $0x364] ss:$12 sps:$4 sm:$0xff]  }
 0x220   :  { %1677 = vmatmul.mubr.f32.gmra.mrb[26].mxu0 %v8905_v38  ;;  %1841 = vmatmul.mubr.f32.gmra.mrb[26].mxu1 %v8905_v38  ;;  %v8931_v52 = vmax.f32 %v1083_v14, %v1265_v50  ;;  %v7918_v14 = vld [vmem:[%s10488_s2 + $0x258] ss:$12 sps:$4 sm:$0xff]   ;;  %v7936_v32 = vld [vmem:[%s10488_s2 + $0x2a0] ss:$12 sps:$4 sm:$0xff]   ;;  %v7940_v34 = vld [vmem:[%s10488_s2 + $0x2bc] ss:$12 sps:$4 sm:$0xff]  }
 0x221   :  { %6842 = vmatpush1.bf16.msra.mxu0 %v7882_v42  ;;  %6938 = vmatpush3.bf16.msra.mxu1 %v7884_v43  ;;  %v7939_v33 = vld [vmem:[%s10488_s2 + $0x360] ss:$12 sps:$4 sm:$0xff]   ;;  %v7943_v35 = vld [vmem:[%s10488_s2 + $0x37c] ss:$12 sps:$4 sm:$0xff]   ;;  %v7942_v37 = vld [vmem:[%s10488_s2 + $0x2b8] ss:$12 sps:$4 sm:$0xff]  }
 0x222   :  { %6844 = vmatprep.subr.bf16.mxu0 %v7885_v44  ;;  %6940 = vmatprep.subr.bf16.mxu1 %v7888_v45  ;;  %v7945_v39 = vld [vmem:[%s10488_s2 + $0x378] ss:$12 sps:$4 sm:$0xff]   ;;  %v7946_v42 = vld [vmem:[%s10488_s2 + $0x2d4] ss:$12 sps:$4 sm:$0xff]   ;;  %v7948_v44 = vld [vmem:[%s10488_s2 + $0x2d0] ss:$12 sps:$4 sm:$0xff]  }
 0x223   :  { %1747 = vmatprep.mubr.f32.mxu0 %v8885_v28  ;;  %1910 = vmatprep.mubr.f32.mxu1 %v8885_v28  ;;  %v7949_v43 = vld [vmem:[%s10488_s2 + $0x394] ss:$12 sps:$4 sm:$0xff]   ;;  %v7951_v45 = vld [vmem:[%s10488_s2 + $0x390] ss:$12 sps:$4 sm:$0xff]   ;;  %v7952_v46 = vld [vmem:[%s10488_s2 + $0x2ec] ss:$12 sps:$4 sm:$0xff]  }
 0x224   :  { %v7955_v50 = vld [vmem:[%s10488_s2 + $0x3ac] ss:$12 sps:$4 sm:$0xff]  }
 0x225   :  { %6846 = vmatpush1.bf16.msra.mxu0 %v7887_v57  ;;  %6942 = vmatpush3.bf16.msra.mxu1 %v7889_v58  ;;  %v7954_v57 = vld [vmem:[%s10488_s2 + $0x2e8] ss:$12 sps:$4 sm:$0xff]  }
 0x226   :  { %6848 = vmatprep.subr.bf16.mxu0 %v7890_v59  ;;  %6944 = vmatprep.subr.bf16.mxu1 %v7893_v60  ;;  %v7957_v58 = vld [vmem:[%s10488_s2 + $0x3a8] ss:$12 sps:$4 sm:$0xff]   ;;  %v7958_v60 = vld [vmem:[%s10488_s2 + $0x3c4] ss:$12 sps:$4 sm:$0xff]  }
 0x227   :  { %v7961_v59 = vld [vmem:[%s10488_s2 + $0x3c8] ss:$12 sps:$4 sm:$0xff]  }
 0x229   :  { %6850 = vmatpush1.bf16.msra.mxu0 %v7892_v61  ;;  %6946 = vmatpush3.bf16.msra.mxu1 %v7894_v62  ;;  %v7962_v61 = vld [vmem:[%s10488_s2 + $0x308] ss:$12 sps:$4 sm:$0xff]   ;;  %v7960_v62 = vld [vmem:[%s10488_s2 + $0x3c0] ss:$12 sps:$4 sm:$0xff]  }
 0x22a   :  { %6852 = vmatprep.subr.bf16.mxu0 %v7895_v63  ;;  %6948 = vmatprep.subr.bf16.mxu1 %v7898_v0  ;;  %v7966_v63 = vld [vmem:[%s10488_s2 + $0x3e0] ss:$12 sps:$4 sm:$0xff]   ;;  %v7963_v0 = vld [vmem:[%s10488_s2 + $0x3dc] ss:$12 sps:$4 sm:$0xff]  }
 0x22d   :  { %6854 = vmatpush1.bf16.msra.mxu0 %v7897_v1  ;;  %6950 = vmatpush3.bf16.msra.mxu1 %v7899_v2  ;;  %v7967_v1 = vld [vmem:[%s10488_s2 + $0x320] ss:$12 sps:$4 sm:$0xff]   ;;  %v7965_v2 = vld [vmem:[%s10488_s2 + $0x3d8] ss:$12 sps:$4 sm:$0xff]  }
 0x22e   :  { %6856 = vmatprep.subr.bf16.mxu0 %v7900_v4  ;;  %6952 = vmatprep.subr.bf16.mxu1 %v7903_v5  ;;  %v7971_v4 = vld [vmem:[%s10488_s2 + $0x3f8] ss:$12 sps:$4 sm:$0xff]   ;;  %v7968_v5 = vld [vmem:[%s10488_s2 + $0x3f4] ss:$12 sps:$4 sm:$0xff]  }
 0x231   :  { %6858 = vmatpush1.bf16.msra.mxu0 %v7902_v6  ;;  %6954 = vmatpush3.bf16.msra.mxu1 %v7904_v55  ;;  %v7972_v6 = vld [vmem:[%s10488_s2 + $0x338] ss:$12 sps:$4 sm:$0xff]   ;;  %v7970_v55 = vld [vmem:[%s10488_s2 + $0x3f0] ss:$12 sps:$4 sm:$0xff]  }
 0x232   :  { %6860 = vmatprep.subr.bf16.mxu0 %v7905_v53  ;;  %6956 = vmatprep.subr.bf16.mxu1 %v7908_v54  ;;  %v7976_v53 = vld [vmem:[%s10488_s2 + $0x410] ss:$12 sps:$4 sm:$0xff]   ;;  %v7973_v54 = vld [vmem:[%s10488_s2 + $0x40c] ss:$12 sps:$4 sm:$0xff]  }
 0x235   :  { %6862 = vmatpush1.bf16.msra.mxu0 %v7907_v56  ;;  %6958 = vmatpush3.bf16.msra.mxu1 %v7909_v7  ;;  %v7977_v56 = vld [vmem:[%s10488_s2 + $0x350] ss:$12 sps:$4 sm:$0xff]   ;;  %v7975_v7 = vld [vmem:[%s10488_s2 + $0x408] ss:$12 sps:$4 sm:$0xff]  }
 0x236   :  { %6864 = vmatprep.subr.bf16.mxu0 %v7910_v8  ;;  %6960 = vmatprep.subr.bf16.mxu1 %v7913_v9  ;;  %v7981_v8 = vld [vmem:[%s10488_s2 + $0x428] ss:$12 sps:$4 sm:$0xff]   ;;  %v7978_v9 = vld [vmem:[%s10488_s2 + $0x424] ss:$12 sps:$4 sm:$0xff]  }
 0x238   :  { %1911 = vmatmul.mubr.f32.vlgmr.msra.gmra.mrb[28].mxu1 %v8879_v24 }
 0x239   :  { %6866 = vmatpush1.bf16.msra.mxu0 %v7912_v10  ;;  %1915 = vmatprep.mubr.f32.mxu1 %v8909_v40  ;;  %v7980_v10 = vld [vmem:[%s10488_s2 + $0x420] ss:$12 sps:$4 sm:$0xff]  }
 0x23a   :  { %6962 = vmatpush1.bf16.msra.mxu1 %v7915_v11  ;;  %6868 = vmatprep.subr.bf16.mxu0 %v7916_v12  ;;  %v7986_v11 = vld [vmem:[%s10488_s2 + $0x440] ss:$12 sps:$4 sm:$0xff]   ;;  %v7983_v12 = vld [vmem:[%s10488_s2 + $0x43c] ss:$12 sps:$4 sm:$0xff]  }
 0x23b   :  { %6964 = vmatprep.subr.bf16.mxu1 %v7919_v13  ;;  %v7987_v13 = vld [vmem:[%s10488_s2 + $0x380] ss:$12 sps:$4 sm:$0xff]  }
 0x23c   :  { %1916 = vmatmul.mubr.f32.gmra.mrb[30].mxu1 %v8903_v36 }
 0x23d   :  { %6870 = vmatpush1.bf16.msra.mxu0 %v7918_v14  ;;  %1920 = vmatprep.mubr.f32.mxu1 %v8931_v52  ;;  %v7985_v14 = vld [vmem:[%s10488_s2 + $0x438] ss:$12 sps:$4 sm:$0xff]  }
 0x23e   :  { %6966 = vmatpush1.bf16.msra.mxu1 %v7921_v16  ;;  %6872 = vmatprep.subr.bf16.mxu0 %v7922_v18  ;;  %v7991_v16 = vld [vmem:[%s10488_s2 + $0x458] ss:$12 sps:$4 sm:$0xff]   ;;  %v7988_v18 = vld [vmem:[%s10488_s2 + $0x454] ss:$12 sps:$4 sm:$0xff]  }
 0x23f   :  { %6968 = vmatprep.subr.bf16.mxu1 %v7925_v19  ;;  %v7992_v19 = vld [vmem:[%s10488_s2 + $0x398] ss:$12 sps:$4 sm:$0xff]  }
 0x240   :  { %1921 = vmatmul.mubr.f32.gmra.mrb[32].mxu1 %v8927_v48 }
 0x241   :  { %6874 = vmatpush1.bf16.msra.mxu0 %v7924_v20  ;;  %2311 = vmatprep.mubr.f32.mxu1 %v8863_v17  ;;  %v7990_v20 = vld [vmem:[%s10488_s2 + $0x450] ss:$12 sps:$4 sm:$0xff]  }
 0x242   :  { %6970 = vmatpush1.bf16.msra.mxu1 %v7927_v21  ;;  %6876 = vmatprep.subr.bf16.mxu0 %v7928_v22  ;;  %v7996_v21 = vld [vmem:[%s10488_s2 + $0x470] ss:$12 sps:$4 sm:$0xff]   ;;  %v7993_v22 = vld [vmem:[%s10488_s2 + $0x46c] ss:$12 sps:$4 sm:$0xff]  }
 0x243   :  { %6972 = vmatprep.subr.bf16.mxu1 %v7931_v23  ;;  %v7997_v23 = vld [vmem:[%s10488_s2 + $0x3b0] ss:$12 sps:$4 sm:$0xff]  }
 0x245   :  { %6878 = vmatpush1.bf16.msra.mxu0 %v7930_v25  ;;  %v7995_v25 = vld [vmem:[%s10488_s2 + $0x468] ss:$12 sps:$4 sm:$0xff]  }
 0x246   :  { %6974 = vmatpush1.bf16.msra.mxu1 %v7933_v27  ;;  %6880 = vmatprep.subr.bf16.mxu0 %v7934_v30  ;;  %v8001_v27 = vld [vmem:[%s10488_s2 + $0x548] ss:$12 sps:$4 sm:$0xff]   ;;  %v7998_v30 = vld [vmem:[%s10488_s2 + $0x484] ss:$12 sps:$4 sm:$0xff]  }
 0x247   :  { %6976 = vmatprep.subr.bf16.mxu1 %v7937_v31  ;;  %v8000_v31 = vld [vmem:[%s10488_s2 + $0x480] ss:$12 sps:$4 sm:$0xff]  }
 0x249   :  { %6882 = vmatpush1.bf16.msra.mxu0 %v7936_v32  ;;  %v8002_v32 = vld [vmem:[%s10488_s2 + $0x488] ss:$12 sps:$4 sm:$0xff]  }
 0x24a   :  { %6978 = vmatpush1.bf16.msra.mxu1 %v7939_v33  ;;  %6884 = vmatprep.subr.bf16.mxu0 %v7940_v34  ;;  %v8003_v33 = vld [vmem:[%s10488_s2 + $0x49c] ss:$12 sps:$4 sm:$0xff]   ;;  %v8006_v34 = vld [vmem:[%s10488_s2 + $0x560] ss:$12 sps:$4 sm:$0xff]  }
 0x24b   :  { %6980 = vmatprep.subr.bf16.mxu1 %v7943_v35  ;;  %v8005_v35 = vld [vmem:[%s10488_s2 + $0x498] ss:$12 sps:$4 sm:$0xff]  }
 0x24d   :  { %6886 = vmatpush1.bf16.msra.mxu0 %v7942_v37  ;;  %v8007_v37 = vld [vmem:[%s10488_s2 + $0x4a0] ss:$12 sps:$4 sm:$0xff]  }
 0x24e   :  { %6982 = vmatpush1.bf16.msra.mxu1 %v7945_v39  ;;  %6888 = vmatprep.subr.bf16.mxu0 %v7946_v42  ;;  %v8008_v39 = vld [vmem:[%s10488_s2 + $0x4b4] ss:$12 sps:$4 sm:$0xff]   ;;  %v8012_v42 = vld [vmem:[%s10488_s2 + $0x4b8] ss:$12 sps:$4 sm:$0xff]  }
 0x24f   :  { %6984 = vmatprep.subr.bf16.mxu1 %v7949_v43  ;;  %v8013_v43 = vld [vmem:[%s10488_s2 + $0x4cc] ss:$12 sps:$4 sm:$0xff]  }
 0x251   :  { %6890 = vmatpush1.bf16.msra.mxu0 %v7948_v44  ;;  %v8017_v44 = vld [vmem:[%s10488_s2 + $0x4d0] ss:$12 sps:$4 sm:$0xff]  }
 0x252   :  { %6986 = vmatpush1.bf16.msra.mxu1 %v7951_v45  ;;  %6892 = vmatprep.subr.bf16.mxu0 %v7952_v46  ;;  %v8018_v45 = vld [vmem:[%s10488_s2 + $0x4e4] ss:$12 sps:$4 sm:$0xff]   ;;  %v8022_v46 = vld [vmem:[%s10488_s2 + $0x4e8] ss:$12 sps:$4 sm:$0xff]  }
 0x253   :  { %6988 = vmatprep.subr.bf16.mxu1 %v7955_v50  ;;  %v8023_v50 = vld [vmem:[%s10488_s2 + $0x4fc] ss:$12 sps:$4 sm:$0xff]  }
 0x255   :  { %6894 = vmatpush1.bf16.msra.mxu0 %v7954_v57  ;;  %v8026_v57 = vld [vmem:[%s10488_s2 + $0x5c0] ss:$12 sps:$4 sm:$0xff]  }
 0x256   :  { %6990 = vmatpush1.bf16.msra.mxu1 %v7957_v58  ;;  %7088 = vmatprep.subr.bf16.mxu0 %v7961_v59  ;;  %v8025_v58 = vld [vmem:[%s10488_s2 + $0x4f8] ss:$12 sps:$4 sm:$0xff]   ;;  %v8027_v59 = vld [vmem:[%s10488_s2 + $0x500] ss:$12 sps:$4 sm:$0xff]  }
 0x257   :  { %6992 = vmatprep.subr.bf16.mxu1 %v7958_v60  ;;  %v8028_v60 = vld [vmem:[%s10488_s2 + $0x514] ss:$12 sps:$4 sm:$0xff]  }
 0x258   :  { %1748 = vmatmul.mubr.f32.vlgmr.msra.gmra.mrb[22].mxu0 %v8879_v24 }
 0x259   :  { %1753 = vmatprep.mubr.f32.mxu0 %v8909_v40  ;;  %7090 = vmatpush3.bf16.msra.mxu0 %v7962_v61  ;;  %v8031_v61 = vld [vmem:[%s10488_s2 + $0x5d8] ss:$12 sps:$4 sm:$0xff]  }
 0x25a   :  { %6994 = vmatpush1.bf16.msra.mxu1 %v7960_v62  ;;  %7092 = vmatprep.subr.bf16.mxu0 %v7966_v63  ;;  %v8030_v62 = vld [vmem:[%s10488_s2 + $0x510] ss:$12 sps:$4 sm:$0xff]   ;;  %v8032_v63 = vld [vmem:[%s10488_s2 + $0x518] ss:$12 sps:$4 sm:$0xff]  }
 0x25b   :  { %6996 = vmatprep.subr.bf16.mxu1 %v7963_v0  ;;  %v8033_v0 = vld [vmem:[%s10488_s2 + $0x52c] ss:$12 sps:$4 sm:$0xff]  }
 0x25c   :  { %1754 = vmatmul.mubr.f32.gmra.mrb[24].mxu0 %v8903_v36 }
 0x25d   :  { %1759 = vmatprep.mubr.f32.mxu0 %v8931_v52  ;;  %7094 = vmatpush3.bf16.msra.mxu0 %v7967_v1  ;;  %v8036_v1 = vld [vmem:[%s10488_s2 + $0x5f0] ss:$12 sps:$4 sm:$0xff]  }
 0x25e   :  { %6998 = vmatpush1.bf16.msra.mxu1 %v7965_v2  ;;  %7096 = vmatprep.subr.bf16.mxu0 %v7971_v4  ;;  %v8035_v2 = vld [vmem:[%s10488_s2 + $0x528] ss:$12 sps:$4 sm:$0xff]   ;;  %v8037_v4 = vld [vmem:[%s10488_s2 + $0x530] ss:$12 sps:$4 sm:$0xff]  }
 0x25f   :  { %7000 = vmatprep.subr.bf16.mxu1 %v7968_v5  ;;  %v8038_v5 = vld [vmem:[%s10488_s2 + $0x544] ss:$12 sps:$4 sm:$0xff]  }
 0x260   :  { %1760 = vmatmul.mubr.f32.gmra.mrb[26].mxu0 %v8927_v48 }
 0x261   :  { %7098 = vmatpush3.bf16.msra.mxu0 %v7972_v6  ;;  %2477 = vmatprep.mubr.f32.mxu0 %v8863_v17  ;;  %v7982_v17 = vld [vmem:[%s10488_s2 + $0x368] ss:$12 sps:$4 sm:$0xff]   ;;  %v8040_v6 = vld [vmem:[%s10488_s2 + $0x540] ss:$12 sps:$4 sm:$0xff]  }
 0x262   :  { %7002 = vmatpush1.bf16.msra.mxu1 %v7970_v55  ;;  %7100 = vmatprep.subr.bf16.mxu0 %v7976_v53  ;;  %v8041_v55 = vld [vmem:[%s10488_s2 + $0x55c] ss:$12 sps:$4 sm:$0xff]   ;;  %v8043_v53 = vld [vmem:[%s10488_s2 + $0x558] ss:$12 sps:$4 sm:$0xff]  }
 0x263   :  { %7004 = vmatprep.subr.bf16.mxu1 %v7973_v54  ;;  %v8044_v54 = vld [vmem:[%s10488_s2 + $0x574] ss:$12 sps:$4 sm:$0xff]  }
 0x265   :  { %7102 = vmatpush3.bf16.msra.mxu0 %v7977_v56  ;;  %v8046_v56 = vld [vmem:[%s10488_s2 + $0x570] ss:$12 sps:$4 sm:$0xff]  }
 0x266   :  { %7006 = vmatpush1.bf16.msra.mxu1 %v7975_v7  ;;  %7104 = vmatprep.subr.bf16.mxu0 %v7981_v8  ;;  %v8047_v7 = vld [vmem:[%s10488_s2 + $0x58c] ss:$12 sps:$4 sm:$0xff]   ;;  %v8049_v8 = vld [vmem:[%s10488_s2 + $0x588] ss:$12 sps:$4 sm:$0xff]  }
 0x267   :  { %7008 = vmatprep.subr.bf16.mxu1 %v7978_v9  ;;  %v8050_v9 = vld [vmem:[%s10488_s2 + $0x5a4] ss:$12 sps:$4 sm:$0xff]  }
 0x269   :  { %7106 = vmatpush3.bf16.msra.mxu0 %v7982_v17  ;;  %v8052_v17 = vld [vmem:[%s10488_s2 + $0x5a0] ss:$12 sps:$4 sm:$0xff]  }
 0x26a   :  { %7010 = vmatpush1.bf16.msra.mxu1 %v7980_v10  ;;  %7108 = vmatprep.subr.bf16.mxu0 %v7986_v11  ;;  %v8053_v10 = vld [vmem:[%s10488_s2 + $0x5bc] ss:$12 sps:$4 sm:$0xff]   ;;  %v8055_v11 = vld [vmem:[%s10488_s2 + $0x5b8] ss:$12 sps:$4 sm:$0xff]  }
 0x26b   :  { %7012 = vmatprep.subr.bf16.mxu1 %v7983_v12  ;;  %v8056_v12 = vld [vmem:[%s10488_s2 + $0x5d4] ss:$12 sps:$4 sm:$0xff]  }
 0x26d   :  { %7110 = vmatpush3.bf16.msra.mxu0 %v7987_v13  ;;  %v8058_v13 = vld [vmem:[%s10488_s2 + $0x5d0] ss:$12 sps:$4 sm:$0xff]  }
 0x26e   :  { %7014 = vmatpush1.bf16.msra.mxu1 %v7985_v14  ;;  %7112 = vmatprep.subr.bf16.mxu0 %v7991_v16  ;;  %v8059_v14 = vld [vmem:[%s10488_s2 + $0x5ec] ss:$12 sps:$4 sm:$0xff]   ;;  %v8061_v16 = vld [vmem:[%s10488_s2 + $0x5e8] ss:$12 sps:$4 sm:$0xff]  }
 0x26f   :  { %7016 = vmatprep.subr.bf16.mxu1 %v7988_v18  ;;  %v8079_v18 = vmov 0.0|0.0  }
 0x271   :  { %7114 = vmatpush3.bf16.msra.mxu0 %v7992_v19  ;;  %v5519_v19 = vld [vmem:[%s10489_s0 + $0x240] sm:$0xff] }
 0x272   :  { %7018 = vmatpush1.bf16.msra.mxu1 %v7990_v20  ;;  %7116 = vmatprep.subr.bf16.mxu0 %v7996_v21  ;;  %v5520_v20 = vld [vmem:[%s10489_s0 + $0x248] sm:$0xff]  ;;  %v5522_v21 = vld [vmem:[%s10489_s0 + $0x258] sm:$0xff] }
 0x273   :  { %7020 = vmatprep.subr.bf16.mxu1 %v7993_v22 }
 0x275   :  { %7118 = vmatpush3.bf16.msra.mxu0 %v7997_v23 }
 0x276   :  { %7022 = vmatpush1.bf16.msra.mxu1 %v7995_v25  ;;  %7120 = vmatprep.subr.bf16.mxu0 %v8001_v27 }
 0x277   :  { %7024 = vmatprep.subr.bf16.mxu1 %v7998_v30  ;;  %v5523_v30 = vld [vmem:[%s10489_s0 + $0x260] sm:$0xff] }
 0x278   :  { %2478 = vmatmul.mubr.f32.vlgmr.msra.gmra.mrb[28].mxu0 %v8861_v15 }
 0x279   :  { %2312 = vmatmul.mubr.f32.vlgmr.msra.gmra.mrb[34].mxu1 %v8861_v15  ;;  %2482 = vmatprep.mubr.f32.mxu0 %v8887_v29  ;;  %v8011_v15 = vld [vmem:[%s10488_s2 + $0x578] ss:$12 sps:$4 sm:$0xff]  }
 0x27a   :  { %2317 = vmatprep.mubr.f32.mxu1 %v8887_v29  ;;  %7026 = vmatpush1.bf16.msra.mxu1 %v8000_v31  ;;  %v8010_v29 = vld [vmem:[%s10488_s2 + $0x4b0] ss:$12 sps:$4 sm:$0xff]   ;;  %v5524_v31 = vld [vmem:[%s10489_s0 + $0x268] sm:$0xff] }
 0x27b   :  { %7122 = vmatpush3.bf16.msra.mxu0 %v8002_v32  ;;  %7028 = vmatprep.subr.bf16.mxu1 %v8003_v33  ;;  %v7190_v32 = vpack.c.bf16 %v5524_v31, %v5523_v30  ;;  %v5500_v30 = vld [vmem:[%s10489_s0 + $0x1a8] sm:$0xff] }
 0x27c   :  { %2483 = vmatmul.mubr.f32.gmra.mrb[30].mxu0 %v8881_v26  ;;  %7124 = vmatprep.subr.bf16.mxu0 %v8006_v34 }
 0x27d   :  { %2318 = vmatmul.mubr.f32.gmra.mrb[36].mxu1 %v8881_v26  ;;  %2487 = vmatprep.mubr.f32.mxu0 %v8911_v41  ;;  %v8016_v26 = vld [vmem:[%s10488_s2 + $0x590] ss:$12 sps:$4 sm:$0xff]  }
 0x27e   :  { %2323 = vmatprep.mubr.f32.mxu1 %v8911_v41  ;;  %7030 = vmatpush1.bf16.msra.mxu1 %v8005_v35  ;;  %v8015_v41 = vld [vmem:[%s10488_s2 + $0x4c8] ss:$12 sps:$4 sm:$0xff]  }
 0x27f   :  { %7126 = vmatpush3.bf16.msra.mxu0 %v8007_v37  ;;  %7032 = vmatprep.subr.bf16.mxu1 %v8008_v39  ;;  %v5503_v37 = vld [vmem:[%s10489_s0 + $0x1c0] sm:$0xff]  ;;  %v5504_v39 = vld [vmem:[%s10489_s0 + $0x1c8] sm:$0xff] }
 0x280   :  { %2488 = vmatmul.mubr.f32.gmra.mrb[32].mxu0 %v8905_v38  ;;  %7128 = vmatprep.subr.bf16.mxu0 %v8011_v15  ;;  %v5525_v15 = vld [vmem:[%s10489_s0 + $0x270] sm:$0xff] }
 0x281   :  { %2324 = vmatmul.mubr.f32.gmra.mrb[38].mxu1 %v8905_v38  ;;  %2557 = vmatprep.mubr.f32.mxu0 %v8885_v28  ;;  %v8021_v38 = vld [vmem:[%s10488_s2 + $0x5a8] ss:$12 sps:$4 sm:$0xff]  }
 0x282   :  { %7034 = vmatpush1.bf16.msra.mxu1 %v8010_v29  ;;  %2394 = vmatprep.mubr.f32.mxu1 %v8885_v28  ;;  %v8020_v28 = vld [vmem:[%s10488_s2 + $0x4e0] ss:$12 sps:$4 sm:$0xff]   ;;  %v7151_v29 = vpack.c.bf16 %v5504_v39, %v5503_v37 }
 0x283   :  { %7130 = vmatpush3.bf16.msra.mxu0 %v8012_v42  ;;  %7036 = vmatprep.subr.bf16.mxu1 %v8013_v43  ;;  %v5526_v42 = vld [vmem:[%s10489_s0 + $0x278] sm:$0xff]  ;;  %v5487_v43 = vld [vmem:[%s10489_s0 + $0x140] sm:$0xff] }
 0x284   :  { %7132 = vmatprep.subr.bf16.mxu0 %v8016_v26  ;;  %v5488_v26 = vld [vmem:[%s10489_s0 + $0x148] sm:$0xff] }
 0x286   :  { %7038 = vmatpush1.bf16.msra.mxu1 %v8015_v41  ;;  %v7193_v41 = vpack.c.bf16 %v5526_v42, %v5525_v15  ;;  %v5502_v42 = vld [vmem:[%s10489_s0 + $0x1b8] sm:$0xff] }
 0x287   :  { %7134 = vmatpush3.bf16.msra.mxu0 %v8017_v44  ;;  %7040 = vmatprep.subr.bf16.mxu1 %v8018_v45  ;;  %v7153_v44 = vpack.c.bf16 %v5488_v26, %v5487_v43  ;;  %v2598_v45 = vld [vmem:[%s10489_s0 + $0x80] sm:$0xff] }
 0x288   :  { %7136 = vmatprep.subr.bf16.mxu0 %v8021_v38  ;;  %v2599_v38 = vld [vmem:[%s10489_s0 + $0x88] sm:$0xff] }
 0x28a   :  { %7042 = vmatpush1.bf16.msra.mxu1 %v8020_v28  ;;  %v7195_v28 = vpack.c.bf16 %v2599_v38, %v2598_v45 }
 0x28b   :  { %7138 = vmatpush3.bf16.msra.mxu0 %v8022_v46  ;;  %7044 = vmatprep.subr.bf16.mxu1 %v8023_v50  ;;  %v5505_v46 = vld [vmem:[%s10489_s0 + $0x1d0] sm:$0xff]  ;;  %v5506_v50 = vld [vmem:[%s10489_s0 + $0x1d8] sm:$0xff] }
 0x28c   :  { %7140 = vmatprep.subr.bf16.mxu0 %v8026_v57  ;;  %v7155_v57 = vpack.c.bf16 %v5506_v50, %v5505_v46 }
 0x28e   :  { %7046 = vmatpush1.bf16.msra.mxu1 %v8025_v58  ;;  %v5489_v58 = vld [vmem:[%s10489_s0 + $0x150] sm:$0xff] }
 0x28f   :  { %7142 = vmatpush3.bf16.msra.mxu0 %v8027_v59  ;;  %7048 = vmatprep.subr.bf16.mxu1 %v8028_v60  ;;  %v5490_v59 = vld [vmem:[%s10489_s0 + $0x158] sm:$0xff] }
 0x290   :  { %7144 = vmatprep.subr.bf16.mxu0 %v8031_v61  ;;  %v7157_v60 = vpack.c.bf16 %v5490_v59, %v5489_v58  ;;  %v5507_v61 = vld [vmem:[%s10489_s0 + $0x1e0] sm:$0xff] }
 0x292   :  { %7050 = vmatpush1.bf16.msra.mxu1 %v8030_v62  ;;  %v5508_v62 = vld [vmem:[%s10489_s0 + $0x1e8] sm:$0xff] }
 0x293   :  { %7146 = vmatpush3.bf16.msra.mxu0 %v8032_v63  ;;  %7052 = vmatprep.subr.bf16.mxu1 %v8033_v0  ;;  %v7159_v63 = vpack.c.bf16 %v5508_v62, %v5507_v61  ;;  %v5491_v0 = vld [vmem:[%s10489_s0 + $0x160] sm:$0xff] }
 0x294   :  { %7148 = vmatprep.subr.bf16.mxu0 %v8036_v1  ;;  %v5492_v1 = vld [vmem:[%s10489_s0 + $0x168] sm:$0xff] }
 0x296   :  { %7054 = vmatpush1.bf16.msra.mxu1 %v8035_v2  ;;  %v7161_v2 = vpack.c.bf16 %v5492_v1, %v5491_v0 }
 0x297   :  { %7150 = vmatpush3.bf16.msra.mxu0 %v8037_v4  ;;  %7056 = vmatprep.subr.bf16.mxu1 %v8038_v5  ;;  %v5509_v4 = vld [vmem:[%s10489_s0 + $0x1f0] sm:$0xff]  ;;  %v5510_v5 = vld [vmem:[%s10489_s0 + $0x1f8] sm:$0xff] }
 0x298   :  { %7152 = vmatprep.subr.bf16.mxu0 %v7151_v29  ;;  %v5501_v29 = vld [vmem:[%s10489_s0 + $0x1b0] sm:$0xff] }
 0x299   :  { %v7181_v26 = vpack.c.bf16 %v5502_v42, %v5501_v29  ;;  %v2604_v29 = vld [vmem:[%s10489_s0 + $0xb0] sm:$0xff]  ;;  %v2605_v42 = vld [vmem:[%s10489_s0 + $0xb8] sm:$0xff] }
 0x29a   :  { %2558 = vmatmul.mubr.f32.vlgmr.msra.gmra.mrb[34].mxu0 %v8879_v24  ;;  %7058 = vmatpush1.bf16.msra.mxu1 %v8040_v6  ;;  %v7163_v6 = vpack.c.bf16 %v5510_v5, %v5509_v4 }
 0x29b   :  { %2562 = vmatprep.mubr.f32.mxu0 %v8909_v40  ;;  %7060 = vmatprep.subr.bf16.mxu1 %v8041_v55  ;;  %v5493_v55 = vld [vmem:[%s10489_s0 + $0x170] sm:$0xff] }
 0x29c   :  { %7154 = vmatpush3.bf16.msra.mxu0 %v7153_v44 }
 0x29d   :  { %7156 = vmatprep.subr.bf16.mxu0 %v7155_v57 }
 0x29e   :  { %2563 = vmatmul.mubr.f32.gmra.mrb[36].mxu0 %v8903_v36  ;;  %7062 = vmatpush1.bf16.msra.mxu1 %v8043_v53  ;;  %v5494_v53 = vld [vmem:[%s10489_s0 + $0x178] sm:$0xff] }
 0x29f   :  { %2567 = vmatprep.mubr.f32.mxu0 %v8931_v52  ;;  %7064 = vmatprep.subr.bf16.mxu1 %v8044_v54  ;;  %v7165_v54 = vpack.c.bf16 %v5494_v53, %v5493_v55 }
 0x2a0   :  { %7158 = vmatpush3.bf16.msra.mxu0 %v7157_v60 }
 0x2a1   :  { %7160 = vmatprep.subr.bf16.mxu0 %v7159_v63 }
 0x2a2   :  { %2568 = vmatmul.mubr.f32.gmra.mrb[38].mxu0 %v8927_v48  ;;  %7066 = vmatpush1.bf16.msra.mxu1 %v8046_v56  ;;  %v5511_v56 = vld [vmem:[%s10489_s0 + $0x200] sm:$0xff] }
 0x2a3   :  { %7068 = vmatprep.subr.bf16.mxu1 %v8047_v7  ;;  %v5512_v7 = vld [vmem:[%s10489_s0 + $0x208] sm:$0xff] }
 0x2a4   :  { %7162 = vmatpush3.bf16.msra.mxu0 %v7161_v2 }
 0x2a5   :  { %7164 = vmatprep.subr.bf16.mxu0 %v7163_v6 }
 0x2a6   :  { %7070 = vmatpush1.bf16.msra.mxu1 %v8049_v8  ;;  %v7167_v8 = vpack.c.bf16 %v5512_v7, %v5511_v56 }
 0x2a7   :  { %7072 = vmatprep.subr.bf16.mxu1 %v8050_v9  ;;  %v5495_v9 = vld [vmem:[%s10489_s0 + $0x180] sm:$0xff] }
 0x2a8   :  { %7166 = vmatpush3.bf16.msra.mxu0 %v7165_v54 }
 0x2a9   :  { %7168 = vmatprep.subr.bf16.mxu0 %v7167_v8  ;;  %v2582_v8 = vld [vmem:[%s10489_s0] sm:$0xff] }
 0x2aa   :  { %7074 = vmatpush1.bf16.msra.mxu1 %v8052_v17  ;;  %v5496_v17 = vld [vmem:[%s10489_s0 + $0x188] sm:$0xff] }
 0x2ab   :  { %7076 = vmatprep.subr.bf16.mxu1 %v8053_v10  ;;  %v7169_v10 = vpack.c.bf16 %v5496_v17, %v5495_v9  ;;  %v2583_v9 = vld [vmem:[%s10489_s0 + $0x8] sm:$0xff] }
 0x2ad   :  { %7170 = vmatpush3.bf16.msra.mxu0 %v7169_v10 }
 0x2ae   :  { %7078 = vmatpush1.bf16.msra.mxu1 %v8055_v11  ;;  %v5513_v11 = vld [vmem:[%s10489_s0 + $0x210] sm:$0xff] }
 0x2af   :  { %7080 = vmatprep.subr.bf16.mxu1 %v8056_v12  ;;  %v5514_v12 = vld [vmem:[%s10489_s0 + $0x218] sm:$0xff] }
 0x2b2   :  { %7082 = vmatpush1.bf16.msra.mxu1 %v8058_v13 }
 0x2b3   :  { %7084 = vmatprep.subr.bf16.mxu1 %v8059_v14  ;;  %v7171_v14 = vpack.c.bf16 %v5514_v12, %v5513_v11  ;;  %v2600_v12 = vld [vmem:[%s10489_s0 + $0x90] sm:$0xff] }
 0x2b5   :  { %7172 = vmatprep.subr.bf16.mxu0 %v7171_v14 }
 0x2b6   :  { %7086 = vmatpush1.bf16.msra.mxu1 %v8061_v16  ;;  %v5497_v16 = vld [vmem:[%s10489_s0 + $0x190] sm:$0xff] }
 0x2b7   :  { %7183 = vmatprep.subr.bf16.mxu1 %v8079_v18 }
 0x2b9   :  { %2395 = vmatmul.mubr.f32.vlgmr.msra.gmra.mrb[34].mxu1 %v8879_v24  ;;  %v7184_v24 = vpack.c.bf16 %v5520_v20, %v5519_v19  ;;  %v5498_v19 = vld [vmem:[%s10489_s0 + $0x198] sm:$0xff] }
 0x2ba   :  { %2400 = vmatprep.mubr.f32.mxu1 %v8909_v40 }
 0x2bb   :  { %7185 = vmatpush3.bf16.msra.mxu1 %v7184_v24  ;;  %v7173_v24 = vpack.c.bf16 %v5498_v19, %v5497_v16  ;;  %v7197_v16 = vpack.c.bf16 %v2583_v9, %v2582_v8 }
 0x2bc   :  { %7186 = vmatprep.subr.bf16.mxu1 %v8079_v18 }
 0x2bd   :  { %2401 = vmatmul.mubr.f32.gmra.mrb[36].mxu1 %v8903_v36  ;;  %7174 = vmatpush3.bf16.msra.mxu0 %v7173_v24 }
 0x2be   :  { %2406 = vmatprep.mubr.f32.mxu1 %v8931_v52 }
 0x2c1   :  { %2407 = vmatmul.mubr.f32.gmra.mrb[38].mxu1 %v8927_v48  ;;  %v5521_v48 = vld [vmem:[%s10489_s0 + $0x250] sm:$0xff] }
 0x2c2   :  { %v7187_v22 = vpack.c.bf16 %v5522_v21, %v5521_v48  ;;  %6351 = vmatprep.mubr.msk.f32.mxu1 %vm8080_vm3, %v8078_v3  ;;  %v5516_v48 = vld [vmem:[%s10489_s0 + $0x228] sm:$0xff] }
 0x2c4   :  { %7188 = vmatpush3.bf16.msra.mxu1 %v7187_v22 }
 0x2c5   :  { %7189 = vmatprep.subr.bf16.mxu1 %v8079_v18 }
 0x2c8   :  { %7191 = vmatpush3.bf16.msra.mxu1 %v7190_v32 }
 0x2c9   :  { %7192 = vmatprep.subr.bf16.mxu1 %v8079_v18 }
 0x2cc   :  { %7194 = vmatpush3.bf16.msra.mxu1 %v7193_v41 }
 0x2cd   :  { %7196 = vmatprep.subr.bf16.mxu1 %v7195_v28 }
 0x2eb   :  { %v5857_v36 = vpop.f32.mrb[22].mxu1 }
 0x2ec   :  { %v5858_v40 = vpop.f32.mrb[23].mxu1 }
 0x2ed   :  { %v9367_v52 = vadd.f32 %v5858_v40, %v5857_v36  ;;  %v5515_v40 = vld [vmem:[%s10489_s0 + $0x220] sm:$0xff] }
 0x2ef   :  { %v5860_v23 = vpop.f32.mrb[24].mxu1 }
 0x2f0   :  { %v5861_v25 = vpop.f32.mrb[25].mxu1 }
 0x2f1   :  { %v9375_v27 = vadd.f32 %v5861_v25, %v5860_v23  ;;  %v7175_v23 = vpack.c.bf16 %v5516_v48, %v5515_v40  ;;  %v5499_v25 = vld [vmem:[%s10489_s0 + $0x1a0] sm:$0xff]  ;;  %v2584_v48 = vld [vmem:[%s10489_s0 + $0x10] sm:$0xff] }
 0x2f2   :  { %v7177_v32 = vpack.c.bf16 %v5500_v30, %v5499_v25  ;;  %v2602_v25 = vld [vmem:[%s10489_s0 + $0xa0] sm:$0xff]  ;;  %v2603_v30 = vld [vmem:[%s10489_s0 + $0xa8] sm:$0xff] }
 0x2f3   :  { %v5863_v33 = vpop.f32.mrb[26].mxu1  ;;  %7176 = vmatprep.subr.bf16.mxu0 %v7175_v23 }
 0x2f4   :  { %v5864_v34 = vpop.f32.mrb[27].mxu1  ;;  %7178 = vmatpush3.bf16.msra.mxu0 %v7177_v32 }
 0x2f5   :  { %v9384_v35 = vadd.f32 %v5864_v34, %v5863_v33  ;;  %v5517_v34 = vld [vmem:[%s10489_s0 + $0x230] sm:$0xff] }
 0x30b   :  { %v5898_v13 = vpop.f32.mrb[28].mxu1 }
 0x30c   :  { %v5899_v20 = vpop.f32.mrb[29].mxu1 }
 0x30d   :  { %v5900_v36 = vadd.f32 %v5899_v20, %v5898_v13  ;;  %v2601_v13 = vld [vmem:[%s10489_s0 + $0x98] sm:$0xff] }
 0x30e   :  { %v7199_v40 = vpack.c.bf16 %v2601_v13, %v2600_v12  ;;  %v2595_v12 = vld [vmem:[%s10489_s0 + $0x68] sm:$0xff]  ;;  %v2612_v13 = vld [vmem:[%s10489_s0 + $0xf0] sm:$0xff] }
 0x30f   :  { %v1913_v21 = vadd.f32 %v5900_v36, %v9367_v52  ;;  %v5901_v22 = vpop.f32.mrb[30].mxu1  ;;  %v5518_v52 = vld [vmem:[%s10489_s0 + $0x238] sm:$0xff] }
 0x310   :  { %v5902_v31 = vpop.f32.mrb[31].mxu1  ;;  %v7179_v15 = vpack.c.bf16 %v5518_v52, %v5517_v34  ;;  %v7203_v52 = vpack.c.bf16 %v2603_v30, %v2602_v25 }
 0x311   :  { %v5903_v33 = vadd.f32 %v5902_v31, %v5901_v22 }
 0x312   :  { %7180 = vmatprep.subr.bf16.mxu0 %v7179_v15 }
 0x313   :  { %v1918_v37 = vadd.f32 %v5903_v33, %v9375_v27  ;;  %v5904_v39 = vpop.f32.mrb[32].mxu1  ;;  %7182 = vmatpush3.bf16.msra.mxu0 %v7181_v26 }
 0x314   :  { %v5905_v43 = vpop.f32.mrb[33].mxu1  ;;  %7227 = vmatprep.subr.bf16.mxu0 %v8079_v18 }
 0x315   :  { %v5906_v41 = vadd.f32 %v5905_v43, %v5904_v39  ;;  %v2587_v39 = vld [vmem:[%s10489_s0 + $0x28] sm:$0xff] }
 0x317   :  { %v1923_v44 = vadd.f32 %v5906_v41, %v9384_v35  ;;  %v7207_v41 = vpack.c.bf16 %v2605_v42, %v2604_v29 }
 0x32b   :  { %v9501_v27 = vpop.f32.mrb[22].mxu0 }
 0x32c   :  { %v9503_v45 = vpop.f32.mrb[23].mxu0 }
 0x32f   :  { %v9505_v38 = vpop.f32.mrb[24].mxu0 }
 0x330   :  { %v9507_v28 = vpop.f32.mrb[25].mxu0 }
 0x333   :  { %v9509_v46 = vpop.f32.mrb[26].mxu0 }
 0x334   :  { %v9511_v50 = vpop.f32.mrb[27].mxu0 }
 0x34b   :  { %v5939_v57 = vpop.f32.mrb[28].mxu0 }
 0x34c   :  { %v5940_v58 = vpop.f32.mrb[29].mxu0 }
 0x34d   :  { %v5941_v59 = vadd.f32 %v5940_v58, %v5939_v57  ;;  %v2589_v57 = vld [vmem:[%s10489_s0 + $0x38] sm:$0xff]  ;;  %v2606_v58 = vld [vmem:[%s10489_s0 + $0xc0] sm:$0xff] }
 0x34f   :  { %v5942_v60 = vpop.f32.mrb[30].mxu0 }
 0x350   :  { %v5943_v61 = vpop.f32.mrb[31].mxu0 }
 0x351   :  { %v5944_v35 = vadd.f32 %v5943_v61, %v5942_v60 }
 0x353   :  { %v5945_v62 = vpop.f32.mrb[32].mxu0 }
 0x354   :  { %v5946_v63 = vpop.f32.mrb[33].mxu0 }
 0x355   :  { %v5947_v0 = vadd.f32 %v5946_v63, %v5945_v62  ;;  %v2591_v62 = vld [vmem:[%s10489_s0 + $0x48] sm:$0xff]  ;;  %v2608_v63 = vld [vmem:[%s10489_s0 + $0xd0] sm:$0xff] }
 0x36d   :  { %v5980_v1 = vpop.f32.mrb[34].mxu0 }
 0x36e   :  { %v5981_v2 = vpop.f32.mrb[35].mxu0 }
 0x36f   :  { %v5982_v4 = vadd.f32 %v5981_v2, %v5980_v1 }
 0x371   :  { %v2560_v5 = vadd.f32 %v5982_v4, %v5941_v59  ;;  %v5983_v6 = vpop.f32.mrb[36].mxu0  ;;  %v2607_v59 = vld [vmem:[%s10489_s0 + $0xc8] sm:$0xff]  ;;  %v2592_v4 = vld [vmem:[%s10489_s0 + $0x50] sm:$0xff] }
 0x372   :  { %v5984_v55 = vpop.f32.mrb[37].mxu0  ;;  %v7211_v61 = vpack.c.bf16 %v2607_v59, %v2606_v58  ;;  %v5565_v58 = vld [vmem:[%s10489_s0 + $0x380] sm:$0xff] }
 0x373   :  { %v9513_v53 = vmax.f32 %v1913_v21, %v2560_v5  ;;  %v5985_v54 = vadd.f32 %v5984_v55, %v5983_v6  ;;  %v2585_v21 = vld [vmem:[%s10489_s0 + $0x18] sm:$0xff]  ;;  %v2610_v6 = vld [vmem:[%s10489_s0 + $0xe0] sm:$0xff]  ;;  %v2611_v55 = vld [vmem:[%s10489_s0 + $0xe8] sm:$0xff] }
 0x374   :  { %v7201_v33 = vpack.c.bf16 %v2585_v21, %v2584_v48  ;;  %v2593_v5 = vld [vmem:[%s10489_s0 + $0x58] sm:$0xff]  ;;  %v2614_v21 = vld [vmem:[%s10489_s0 + $0x100] sm:$0xff] }
 0x375   :  { %v2565_v56 = vadd.f32 %v5985_v54, %v5944_v35  ;;  %v5986_v7 = vpop.f32.mrb[38].mxu0  ;;  %v2679_v14 = vrot.slane %v9513_v53, 1  ;;  %v3075_v19 = vrot.slane %v9513_v53, 2  ;;  %v2590_v35 = vld [vmem:[%s10489_s0 + $0x40] sm:$0xff]  ;;  %v7217_v8 = vpack.c.bf16 %v2593_v5, %v2592_v4 }
 0x376   :  { %v5987_v17 = vpop.f32.mrb[39].mxu0  ;;  %v7213_v1 = vpack.c.bf16 %v2591_v62, %v2590_v35  ;;  %v2617_v35 = vld [vmem:[%s10489_s0 + $0x118] sm:$0xff] }
 0x377   :  { %v9521_v10 = vmax.f32 %v1918_v37, %v2565_v56  ;;  %v5988_v11 = vadd.f32 %v5987_v17, %v5986_v7  ;;  %v2586_v37 = vld [vmem:[%s10489_s0 + $0x20] sm:$0xff]  ;;  %v7219_v17 = vpack.c.bf16 %v2611_v55, %v2610_v6  ;;  %v5567_v6 = vld [vmem:[%s10489_s0 + $0x390] sm:$0xff]  ;;  %v5568_v55 = vld [vmem:[%s10489_s0 + $0x398] sm:$0xff] }
 0x378   :  { %v7205_v26 = vpack.c.bf16 %v2587_v39, %v2586_v37 }
 0x379   :  { %v2680_v20 = vrot.slane %v9521_v10, 1  ;;  %v3076_v24 = vrot.slane %v9521_v10, 2  ;;  %v2570_v36 = vadd.f32 %v5988_v11, %v5947_v0  ;;  %v2609_v0 = vld [vmem:[%s10489_s0 + $0xd8] sm:$0xff]  ;;  %v2594_v11 = vld [vmem:[%s10489_s0 + $0x60] sm:$0xff] }
 0x37a   :  { %v7215_v2 = vpack.c.bf16 %v2609_v0, %v2608_v63 }
 0x37b   :  { %v9539_v22 = vmax.f32 %v1923_v44, %v2570_v36  ;;  %v2681_v23 = vsel %vm2672_vm4, %v2679_v14, %v2680_v20  ;;  %v9549_v31 = vsel %vm3068_vm6, %v3075_v19, %v3076_v24  ;;  %v2588_v44 = vld [vmem:[%s10489_s0 + $0x30] sm:$0xff]  ;;  %v2597_v14 = vld [vmem:[%s10489_s0 + $0x78] sm:$0xff] }
 0x37c   :  { %6352 = vmatmul.mubr.msk.f32.vlgmr.msra.gmra.mrb[40].mxu1 %vm2694_vm5, %v2681_v23  ;;  %v7209_v60 = vpack.c.bf16 %v2589_v57, %v2588_v44  ;;  %v2615_v23 = vld [vmem:[%s10489_s0 + $0x108] sm:$0xff] }
 0x37d   :  { %7198 = vmatpush3.bf16.msra.mxu1 %v7197_v16  ;;  %6354 = vmatprep.mubr.msk.f32.mxu1 %vm8080_vm3, %v8078_v3  ;;  %v2686_v32 = vrot.slane %v9539_v22, 1  ;;  %v3082_v34 = vrot.slane %v9539_v22, 2 }
 0x37e   :  { %7200 = vmatprep.subr.bf16.mxu1 %v7199_v40 }
 0x37f   :  { %v2687_v15 = vsel %vm2672_vm4, %v2680_v20, %v2686_v32  ;;  %v9572_v43 = vsel %vm3068_vm6, %v3076_v24, %v3082_v34  ;;  %v7221_v24 = vpack.c.bf16 %v2595_v12, %v2594_v11  ;;  %v5569_v11 = vld [vmem:[%s10489_s0 + $0x3a0] sm:$0xff]  ;;  %v5570_v12 = vld [vmem:[%s10489_s0 + $0x3a8] sm:$0xff] }
 0x380   :  { %6355 = vmatmul.mubr.msk.f32.gmra.mrb[42].mxu1 %vm2694_vm5, %v2687_v15 }
 0x381   :  { %7202 = vmatpush3.bf16.msra.mxu1 %v7201_v33  ;;  %6357 = vmatprep.mubr.msk.f32.mxu1 %vm8080_vm3, %v8078_v3 }
 0x382   :  { %7204 = vmatprep.subr.bf16.mxu1 %v7203_v52 }
 0x384   :  { %6358 = vmatmul.mubr.msk.f32.gmra.mrb[44].mxu1 %vm2694_vm5, %v2686_v32 }
 0x385   :  { %7206 = vmatpush3.bf16.msra.mxu1 %v7205_v26  ;;  %v7228_v26 = vpack.c.bf16 %v2615_v23, %v2614_v21  ;;  %v5552_v21 = vld [vmem:[%s10489_s0 + $0x318] sm:$0xff] }
 0x386   :  { %7208 = vmatprep.subr.bf16.mxu1 %v7207_v41 }
 0x389   :  { %7210 = vmatpush3.bf16.msra.mxu1 %v7209_v60 }
 0x38a   :  { %7212 = vmatprep.subr.bf16.mxu1 %v7211_v61 }
 0x38c   :  { %v2396_v54 = vpop.f32.mrb[34].mxu1 }
 0x38d   :  { %7214 = vmatpush3.bf16.msra.mxu1 %v7213_v1  ;;  %v9615_v56 = vmax.f32 %v9501_v27, %v2396_v54  ;;  %v2398_v7 = vpop.f32.mrb[35].mxu1  ;;  %v2613_v27 = vld [vmem:[%s10489_s0 + $0xf8] sm:$0xff] }
 0x38e   :  { %v2574_v9 = vmax.f32 %v9503_v45, %v2398_v7  ;;  %7216 = vmatprep.subr.bf16.mxu1 %v7215_v2  ;;  %v2596_v45 = vld [vmem:[%s10489_s0 + $0x70] sm:$0xff]  ;;  %v7223_v40 = vpack.c.bf16 %v2613_v27, %v2612_v13  ;;  %v2618_v7 = vld [vmem:[%s10489_s0 + $0x120] sm:$0xff]  ;;  %v2621_v13 = vld [vmem:[%s10489_s0 + $0x138] sm:$0xff] }
 0x38f   :  { %v7225_v48 = vpack.c.bf16 %v2597_v14, %v2596_v45  ;;  %v2673_v25 = vrot.slane %v9615_v56, 1  ;;  %v5549_v27 = vld [vmem:[%s10489_s0 + $0x300] sm:$0xff]  ;;  %v5550_v45 = vld [vmem:[%s10489_s0 + $0x308] sm:$0xff]  ;;  %v7278_v14 = vpack.c.bf16 %v5570_v12, %v5569_v11 }
 0x390   :  { %v2402_v16 = vpop.f32.mrb[36].mxu1  ;;  %2931 = vmatprep.mubr.f32.mxu1 %v2574_v9  ;;  %v3072_v33 = vrot.slane %v2574_v9, 2 }
 0x391   :  { %7218 = vmatpush3.bf16.msra.mxu1 %v7217_v8  ;;  %v9637_v19 = vmax.f32 %v9505_v38, %v2402_v16  ;;  %v2404_v20 = vpop.f32.mrb[37].mxu1  ;;  %v3069_v38 = vrot.slane %v9615_v56, 2  ;;  %v2619_v8 = vld [vmem:[%s10489_s0 + $0x128] sm:$0xff] }
 0x392   :  { %v2577_v36 = vmax.f32 %v9507_v28, %v2404_v20  ;;  %7220 = vmatprep.subr.bf16.mxu1 %v7219_v17  ;;  %v2676_v28 = vrot.slane %v2574_v9, 1  ;;  %v7275_v9 = vpack.c.bf16 %v5568_v55, %v5567_v6  ;;  %v7234_v17 = vpack.c.bf16 %v2619_v8, %v2618_v7  ;;  %v5572_v20 = vld [vmem:[%s10489_s0 + $0x3b8] sm:$0xff]  ;;  %v5545_v7 = vld [vmem:[%s10489_s0 + $0x2e0] sm:$0xff]  ;;  %v5546_v8 = vld [vmem:[%s10489_s0 + $0x2e8] sm:$0xff] }
 0x393   :  { %v2674_v30 = vrot.slane %v9637_v19, 1  ;;  %v3070_v32 = vrot.slane %v9637_v19, 2  ;;  %v7265_v11 = vpack.c.bf16 %v5546_v8, %v5545_v7 }
 0x394   :  { %v2677_v52 = vrot.slane %v2577_v36, 1  ;;  %v3073_v37 = vrot.slane %v2577_v36, 2  ;;  %v2408_v39 = vpop.f32.mrb[38].mxu1 }
 0x395   :  { %7222 = vmatpush3.bf16.msra.mxu1 %v7221_v24  ;;  %v9651_v15 = vmax.f32 %v9509_v46, %v2408_v39  ;;  %v2410_v29 = vpop.f32.mrb[39].mxu1  ;;  %v2675_v42 = vsel %vm2672_vm4, %v2673_v25, %v2674_v30  ;;  %v9655_v41 = vsel %vm3068_vm6, %v3069_v38, %v3070_v32  ;;  %v5566_v46 = vld [vmem:[%s10489_s0 + $0x388] sm:$0xff]  ;;  %v7239_v24 = vpack.c.bf16 %v5550_v45, %v5549_v27  ;;  %v5537_v39 = vld [vmem:[%s10489_s0 + $0x2a0] sm:$0xff] }
 0x396   :  { %v9658_v44 = vmax.f32 %v9511_v50, %v2410_v29  ;;  %7224 = vmatprep.subr.bf16.mxu1 %v7223_v40  ;;  %v2678_v57 = vsel %vm2672_vm4, %v2676_v28, %v2677_v52  ;;  %v9668_v59 = vsel %vm3068_vm6, %v3072_v33, %v3073_v37  ;;  %v2616_v50 = vld [vmem:[%s10489_s0 + $0x110] sm:$0xff]  ;;  %v7272_v0 = vpack.c.bf16 %v5566_v46, %v5565_v58  ;;  %v5534_v40 = vld [vmem:[%s10489_s0 + $0x288] sm:$0xff]  ;;  %v5553_v28 = vld [vmem:[%s10489_s0 + $0x320] sm:$0xff] }
 0x397   :  { %v2682_v60 = vrot.slane %v9651_v15, 1  ;;  %v3078_v61 = vrot.slane %v9651_v15, 2  ;;  %2765 = vmatprep.mubr.f32.mxu0 %v2678_v57  ;;  %v7231_v5 = vpack.c.bf16 %v2617_v35, %v2616_v50  ;;  %v5554_v33 = vld [vmem:[%s10489_s0 + $0x328] sm:$0xff]  ;;  %v5539_v57 = vld [vmem:[%s10489_s0 + $0x2b0] sm:$0xff]  ;;  %v5540_v58 = vld [vmem:[%s10489_s0 + $0x2b8] sm:$0xff] }
 0x398   :  { %v2684_v62 = vrot.slane %v9658_v44, 1  ;;  %v3080_v63 = vrot.slane %v9658_v44, 2  ;;  %2766 = vmatmul.mubr.f32.vlgmr.msra.gmra.mrb[40].mxu0 %v2675_v42  ;;  %v5538_v29 = vld [vmem:[%s10489_s0 + $0x2a8] sm:$0xff]  ;;  %v5556_v42 = vld [vmem:[%s10489_s0 + $0x338] sm:$0xff]  ;;  %v5541_v50 = vld [vmem:[%s10489_s0 + $0x2c0] sm:$0xff] }
 0x399   :  { %7226 = vmatpush3.bf16.msra.mxu1 %v7225_v48  ;;  %7229 = vmatpush3.bf16.msra.mxu0 %v7228_v26  ;;  %v2683_v1 = vsel %vm2672_vm4, %v2674_v30, %v2682_v60  ;;  %v9684_v2 = vsel %vm3068_vm6, %v3070_v32, %v3078_v61  ;;  %v5551_v48 = vld [vmem:[%s10489_s0 + $0x310] sm:$0xff]  ;;  %v5536_v32 = vld [vmem:[%s10489_s0 + $0x298] sm:$0xff]  ;;  %v7249_v26 = vpack.c.bf16 %v5538_v29, %v5537_v39  ;;  %v5558_v46 = vld [vmem:[%s10489_s0 + $0x348] sm:$0xff] }
 0x39a   :  { %7271 = vmatprep.subr.bf16.mxu1 %v8079_v18  ;;  %v2685_v4 = vsel %vm2672_vm4, %v2677_v52, %v2684_v62  ;;  %7230 = vmatprep.subr.bf16.mxu0 %v8079_v18  ;;  %v9698_v54 = vsel %vm3068_vm6, %v3073_v37, %v3080_v63  ;;  %v7243_v38 = vpack.c.bf16 %v5552_v21, %v5551_v48  ;;  %v5535_v30 = vld [vmem:[%s10489_s0 + $0x290] sm:$0xff]  ;;  %v5542_v35 = vld [vmem:[%s10489_s0 + $0x2c8] sm:$0xff] }
 0x39b   :  { %2770 = vmatprep.mubr.f32.mxu0 %v2685_v4  ;;  %v7245_v52 = vpack.c.bf16 %v5536_v32, %v5535_v30  ;;  %v7247_v37 = vpack.c.bf16 %v5554_v33, %v5553_v28  ;;  %v5543_v4 = vld [vmem:[%s10489_s0 + $0x2d0] sm:$0xff]  ;;  %v9865_v45 = vld [vmem:[%s10457_s7] ss:$8 sps:$4 sm:$0xff]  }
 0x39c   :  { %2932 = vmatmul.mubr.f32.vlgmr.msra.gmra.mrb[46].mxu1 %v9615_v56  ;;  %2771 = vmatmul.mubr.f32.gmra.mrb[42].mxu0 %v2683_v1  ;;  %v2620_v56 = vld [vmem:[%s10489_s0 + $0x130] sm:$0xff] }
 0x39d   :  { %2936 = vmatprep.mubr.f32.mxu1 %v2577_v36  ;;  %7273 = vmatpush3.bf16.msra.mxu1 %v7272_v0  ;;  %v7237_v16 = vpack.c.bf16 %v2621_v13, %v2620_v56  ;;  %v5533_v36 = vld [vmem:[%s10489_s0 + $0x280] sm:$0xff]  ;;  %v7257_v0 = vpack.c.bf16 %v5542_v35, %v5541_v50  ;;  %v5547_v56 = vld [vmem:[%s10489_s0 + $0x2f0] sm:$0xff]  ;;  %v5548_v13 = vld [vmem:[%s10489_s0 + $0x2f8] sm:$0xff] }
 0x39e   :  { %7232 = vmatpush3.bf16.msra.mxu0 %v7231_v5  ;;  %2775 = vmatprep.mubr.f32.mxu0 %v2684_v62  ;;  %v7241_v25 = vpack.c.bf16 %v5534_v40, %v5533_v36  ;;  %v5559_v62 = vld [vmem:[%s10489_s0 + $0x350] sm:$0xff]  ;;  %v5562_v5 = vld [vmem:[%s10489_s0 + $0x368] sm:$0xff]  ;;  %v7269_v27 = vpack.c.bf16 %v5548_v13, %v5547_v56 }
 0x39f   :  { %7274 = vmatprep.subr.bf16.mxu1 %v8079_v18  ;;  %7233 = vmatprep.subr.bf16.mxu0 %v8079_v18 }
 0x3a0   :  { %2937 = vmatmul.mubr.f32.gmra.mrb[48].mxu1 %v9637_v19  ;;  %2776 = vmatmul.mubr.f32.gmra.mrb[44].mxu0 %v2682_v60  ;;  %v5571_v19 = vld [vmem:[%s10489_s0 + $0x3b0] sm:$0xff]  ;;  %v7253_v60 = vpack.c.bf16 %v5540_v58, %v5539_v57 }
 0x3a1   :  { %2941 = vmatprep.mubr.f32.mxu1 %v9658_v44  ;;  %7276 = vmatpush3.bf16.msra.mxu1 %v7275_v9  ;;  %v7281_v23 = vpack.c.bf16 %v5572_v20, %v5571_v19  ;;  %v5563_v9 = vld [vmem:[%s10489_s0 + $0x370] sm:$0xff]  ;;  %v5806_v44 = vld [vmem:[%s10458_s8 + $0x8] sm:$0xff]  }
 0x3a2   :  { %7235 = vmatpush3.bf16.msra.mxu0 %v7234_v17  ;;  %7277 = vmatprep.subr.bf16.mxu1 %v8079_v18  ;;  %v5564_v17 = vld [vmem:[%s10489_s0 + $0x378] sm:$0xff] }
 0x3a3   :  { %7236 = vmatprep.subr.bf16.mxu0 %v8079_v18  ;;  %6376 = vmatprep.mubr.msk.f32.mxu0 %vm8080_vm3, %v8078_v3  ;;  %v7267_v12 = vpack.c.bf16 %v5564_v17, %v5563_v9 }
 0x3a4   :  { %2942 = vmatmul.mubr.f32.gmra.mrb[50].mxu1 %v9651_v15  ;;  %v5807_v15 = vld [vmem:[%s10458_s8 + $0x10] sm:$0xff]  }
 0x3a5   :  { %7279 = vmatpush3.bf16.msra.mxu1 %v7278_v14  ;;  %6401 = vmatprep.mubr.msk.f32.mxu1 %vm8080_vm3, %v8078_v3  ;;  %v3274_v14 = vunpack.c.l.bf16 %v9865_v45 }
 0x3a6   :  { %7238 = vmatpush3.bf16.msra.mxu0 %v7237_v16  ;;  %7280 = vmatprep.subr.bf16.mxu1 %v8079_v18  ;;  %v5811_v16 = vld [vmem:[%s10458_s8 + $0x30] sm:$0xff]  }
 0x3a7   :  { %7240 = vmatprep.subr.bf16.mxu0 %v7239_v24 }
 0x3a9   :  { %6377 = vmatmul.mubr.msk.f32.vlgmr.msra.gmra.mrb[46].mxu0 %vm2694_vm5, %v9513_v53  ;;  %7282 = vmatpush3.bf16.msra.mxu1 %v7281_v23  ;;  %v5555_v53 = vld [vmem:[%s10489_s0 + $0x330] sm:$0xff] }
 0x3aa   :  { %7242 = vmatpush3.bf16.msra.mxu0 %v7241_v25  ;;  %6379 = vmatprep.mubr.msk.f32.mxu0 %vm8080_vm3, %v8078_v3 }
 0x3ab   :  { %7244 = vmatprep.subr.bf16.mxu0 %v7243_v38 }
 0x3ac   :  { %6402 = vmatmul.mubr.msk.f32.vlgmr.msra.gmra.mrb[52].mxu1 %vm2694_vm5, %v9549_v31  ;;  %v7251_v31 = vpack.c.bf16 %v5556_v42, %v5555_v53 }
 0x3ad   :  { %6380 = vmatmul.mubr.msk.f32.gmra.mrb[48].mxu0 %vm2694_vm5, %v9521_v10  ;;  %6404 = vmatprep.mubr.msk.f32.mxu1 %vm8080_vm3, %v8078_v3  ;;  %v5557_v10 = vld [vmem:[%s10489_s0 + $0x340] sm:$0xff] }
 0x3ae   :  { %7246 = vmatpush3.bf16.msra.mxu0 %v7245_v52  ;;  %6382 = vmatprep.mubr.msk.f32.mxu0 %vm8080_vm3, %v8078_v3 }
 0x3af   :  { %7248 = vmatprep.subr.bf16.mxu0 %v7247_v37 }
 0x3b0   :  { %6405 = vmatmul.mubr.msk.f32.gmra.mrb[54].mxu1 %vm2694_vm5, %v9572_v43  ;;  %v7255_v43 = vpack.c.bf16 %v5558_v46, %v5557_v10 }
 0x3b1   :  { %6383 = vmatmul.mubr.msk.f32.gmra.mrb[50].mxu0 %vm2694_vm5, %v9539_v22  ;;  %6407 = vmatprep.mubr.msk.f32.mxu1 %vm8080_vm3, %v8078_v3  ;;  %v5544_v22 = vld [vmem:[%s10489_s0 + $0x2d8] sm:$0xff] }
 0x3b2   :  { %7250 = vmatpush3.bf16.msra.mxu0 %v7249_v26  ;;  %3160 = vmatprep.mubr.f32.mxu0 %v9668_v59  ;;  %v5560_v59 = vld [vmem:[%s10489_s0 + $0x358] sm:$0xff]  ;;  %v7261_v6 = vpack.c.bf16 %v5544_v22, %v5543_v4 }
 0x3b3   :  { %7252 = vmatprep.subr.bf16.mxu0 %v7251_v31  ;;  %v7259_v1 = vpack.c.bf16 %v5560_v59, %v5559_v62 }
 0x3b4   :  { %6408 = vmatmul.mubr.msk.f32.gmra.mrb[56].mxu1 %vm2694_vm5, %v3082_v34  ;;  %v5561_v34 = vld [vmem:[%s10489_s0 + $0x360] sm:$0xff] }
 0x3b5   :  { %v7263_v55 = vpack.c.bf16 %v5562_v5, %v5561_v34  ;;  %6416 = vmatprep.mubr.msk.f32.mxu1 %vm3276_vm7, %v3274_v14 }
 0x3b6   :  { %7254 = vmatpush3.bf16.msra.mxu0 %v7253_v60 }
 0x3b7   :  { %7256 = vmatprep.subr.bf16.mxu0 %v7255_v43 }
 0x3ba   :  { %7258 = vmatpush3.bf16.msra.mxu0 %v7257_v0 }
 0x3bb   :  { %7260 = vmatprep.subr.bf16.mxu0 %v7259_v1 }
 0x3be   :  { %7262 = vmatpush3.bf16.msra.mxu0 %v7261_v6 }
 0x3bf   :  { %7264 = vmatprep.subr.bf16.mxu0 %v7263_v55 }
 0x3c2   :  { %7266 = vmatpush3.bf16.msra.mxu0 %v7265_v11 }
 0x3c3   :  { %7268 = vmatprep.subr.bf16.mxu0 %v7267_v12 }
 0x3c6   :  { %7270 = vmatpush3.bf16.msra.mxu0 %v7269_v27 }
 0x3c9   :  { %3161 = vmatmul.mubr.f32.vlgmr.msra.gmra.mrb[52].mxu0 %v9655_v41  ;;  %v5715_v41 = vld [vmem:[%s10458_s8] sm:$0xff]  }
 0x3ca   :  { %3165 = vmatprep.mubr.f32.mxu0 %v9698_v54  ;;  %7292 = vmatprep.subr.bf16.mxu0 %v5715_v41 }
 0x3cb   :  { %7294 = vmatpush3.bf16.msra.mxu0 %v5715_v41 }
 0x3cc   :  { %7296 = vmatprep.subr.bf16.mxu0 %v5806_v44 }
 0x3cd   :  { %3166 = vmatmul.mubr.f32.gmra.mrb[54].mxu0 %v9684_v2  ;;  %v5810_v2 = vld [vmem:[%s10458_s8 + $0x28] sm:$0xff]  }
 0x3ce   :  { %3170 = vmatprep.mubr.f32.mxu0 %v3080_v63  ;;  %v5809_v63 = vld [vmem:[%s10458_s8 + $0x20] sm:$0xff]  }
 0x3cf   :  { %7298 = vmatpush3.bf16.msra.mxu0 %v5806_v44 }
 0x3d0   :  { %7300 = vmatprep.subr.bf16.mxu0 %v5807_v15 }
 0x3d1   :  { %3171 = vmatmul.mubr.f32.gmra.mrb[56].mxu0 %v3078_v61  ;;  %v5808_v61 = vld [vmem:[%s10458_s8 + $0x18] sm:$0xff]  }
 0x3d3   :  { %7302 = vmatpush3.bf16.msra.mxu0 %v5807_v15  ;;  %v5576_v15 = vld [vmem:[%s10459_s6] ss:$0 sm:$0xff] }
 0x3d4   :  { %7304 = vmatprep.subr.bf16.mxu0 %v5808_v61 }
 0x3d7   :  { %7306 = vmatpush3.bf16.msra.mxu0 %v5808_v61 }
 0x3d8   :  { %7308 = vmatprep.subr.bf16.mxu0 %v5809_v63 }
 0x3db   :  { %7310 = vmatpush3.bf16.msra.mxu0 %v5809_v63 }
 0x3dc   :  { %7312 = vmatprep.subr.bf16.mxu0 %v5810_v2 }
 0x3df   :  { %7314 = vmatpush3.bf16.msra.mxu0 %v5810_v2 }
 0x3e0   :  { %7316 = vmatprep.subr.bf16.mxu0 %v5811_v16 }
 0x3e3   :  { %7318 = vmatpush3.bf16.msra.mxu0 %v5811_v16 }
 0x44f   :  { %v2847_v54 = vpop.f32.mrb[40].mxu1 }
 0x450   :  { %v6353_v19 = vpop.f32.mrb[41].mxu1 }
 0x453   :  { %v2852_v20 = vpop.f32.mrb[42].mxu1 }
 0x454   :  { %v6356_v24 = vpop.f32.mrb[43].mxu1 }
 0x457   :  { %v2857_v36 = vpop.f32.mrb[44].mxu1 }
 0x458   :  { %v6359_v40 = vpop.f32.mrb[45].mxu1 }
 0x46b   :  { %v6021_v48 = vpop.f32.mrb[40].mxu0 }
 0x46c   :  { %v6022_v21 = vpop.f32.mrb[41].mxu0 }
 0x46d   :  { %v6023_v23 = vadd.f32 %v6022_v21, %v6021_v48 }
 0x46f   :  { %v2848_v25 = vadd.f32 %v6023_v23, %v2847_v54  ;;  %v6073_v38 = vpop.f32.mrb[46].mxu1  ;;  %v6024_v30 = vpop.f32.mrb[42].mxu0 }
 0x470   :  { %v6074_v32 = vpop.f32.mrb[47].mxu1  ;;  %v6025_v28 = vpop.f32.mrb[43].mxu0 }
 0x471   :  { %v6075_v33 = vadd.f32 %v6074_v32, %v6073_v38  ;;  %v6026_v52 = vadd.f32 %v6025_v28, %v6024_v30  ;;  %v3364_v32 = vunpack.c.h.bf16 %v9865_v45  ;;  %v5581_v28 = vld [vmem:[%s10457_s7 + $0xc] sm:$0x3] }
 0x472   :  { %v5814_v45 = vld [vmem:[%s10458_s8 + $0x48] sm:$0xff]  }
 0x473   :  { %v2853_v37 = vadd.f32 %v6026_v52, %v2852_v20  ;;  %v6076_v39 = vpop.f32.mrb[48].mxu1  ;;  %v6027_v29 = vpop.f32.mrb[44].mxu0  ;;  %v2934_v53 = vadd.f32 %v6075_v33, %v2848_v25  ;;  %v3273_v25 = vld [vmem:[%s10457_s7 + $0x4] sm:$0x3]  ;;  %v3365_v33 = vunpack.c.l.bf16 %v5581_v28 }
 0x474   :  { %v6077_v42 = vpop.f32.mrb[49].mxu1  ;;  %v6028_v26 = vpop.f32.mrb[45].mxu0  ;;  %v3275_v30 = vunpack.c.l.bf16 %v3273_v25  ;;  %v5813_v52 = vld [vmem:[%s10458_s8 + $0x40] sm:$0xff]  }
 0x475   :  { %v6078_v31 = vadd.f32 %v6077_v42, %v6076_v39  ;;  %v6029_v57 = vadd.f32 %v6028_v26, %v6027_v29  ;;  %v5816_v39 = vld [vmem:[%s10458_s8 + $0x58] sm:$0xff]   ;;  %v5817_v29 = vld [vmem:[%s10458_s8 + $0x60] sm:$0xff]   ;;  %v5819_v42 = vld [vmem:[%s10458_s8 + $0x70] sm:$0xff]  }
 0x476   :  { %v5812_v26 = vld [vmem:[%s10458_s8 + $0x38] sm:$0xff]   ;;  %v3674_v28 = vld [vmem:[%s10460_s9 + $0x40] sm:$0xff] }
 0x477   :  { %v2858_v58 = vadd.f32 %v6029_v57, %v2857_v36  ;;  %v6079_v10 = vpop.f32.mrb[50].mxu1  ;;  %v2939_v46 = vadd.f32 %v6078_v31, %v2853_v37  ;;  %v5815_v37 = vld [vmem:[%s10458_s8 + $0x50] sm:$0xff]   ;;  %v5820_v31 = vld [vmem:[%s10458_s8 + $0x78] sm:$0xff]   ;;  %7320 = vmatprep.subr.bf16.mxu0 %v5812_v26  ;;  %v5601_v57 = vld [vmem:[%s10460_s9 + $0x60] sm:$0xff] }
 0x478   :  { %v6080_v60 = vpop.f32.mrb[51].mxu1  ;;  %7322 = vmatpush3.bf16.msra.mxu0 %v5812_v26  ;;  %v5619_v26 = vld [vmem:[%s10460_s9 + $0xd0] sm:$0xff] }
 0x479   :  { %v6081_v43 = vadd.f32 %v6080_v60, %v6079_v10 }
 0x47b   :  { %v2944_v50 = vadd.f32 %v6081_v43, %v2858_v58  ;;  %v5602_v58 = vld [vmem:[%s10460_s9 + $0x68] sm:$0xff] }
 0x47c   :  { %v3013_v35 = vpop.f32.mrb[46].mxu0  ;;  %v7355_v10 = vpack.c.bf16 %v5602_v58, %v5601_v57  ;;  %v5621_v58 = vld [vmem:[%s10460_s9 + $0xe0] sm:$0xff] }
 0x47d   :  { %v3014_v62 = vadd.f32 %v3013_v35, %v2934_v53  ;;  %v6378_v59 = vpop.f32.mrb[47].mxu0  ;;  %v5818_v53 = vld [vmem:[%s10458_s8 + $0x68] sm:$0xff]   ;;  %v5604_v35 = vld [vmem:[%s10460_s9 + $0x78] sm:$0xff] }
 0x47e   :  { %7356 = vmatprep.subr.bf16.mxu0 %v7355_v10 }
 0x47f   :  { %v3242_v0 = vpop.f32.mrb[52].mxu1 }
 0x480   :  { %v3018_v1 = vpop.f32.mrb[48].mxu0  ;;  %v6403_v4 = vpop.f32.mrb[53].mxu1 }
 0x481   :  { %v3019_v22 = vadd.f32 %v3018_v1, %v2939_v46  ;;  %v6381_v34 = vpop.f32.mrb[49].mxu0  ;;  %v5605_v4 = vld [vmem:[%s10460_s9 + $0x80] sm:$0xff] }
 0x483   :  { %v3247_v5 = vpop.f32.mrb[54].mxu1 }
 0x484   :  { %v3023_v6 = vpop.f32.mrb[50].mxu0  ;;  %v6406_v55 = vpop.f32.mrb[55].mxu1 }
 0x485   :  { %v3024_v7 = vadd.f32 %v3023_v6, %v2944_v50  ;;  %v6384_v8 = vpop.f32.mrb[51].mxu0  ;;  %v5603_v50 = vld [vmem:[%s10460_s9 + $0x70] sm:$0xff]  ;;  %v5608_v6 = vld [vmem:[%s10460_s9 + $0x98] sm:$0xff] }
 0x486   :  { %v7359_v1 = vpack.c.bf16 %v5604_v35, %v5603_v50  ;;  %v5610_v8 = vld [vmem:[%s10460_s9 + $0xa8] sm:$0xff]  ;;  %v5625_v35 = vld [vmem:[%s10460_s9 + $0x100] sm:$0xff] }
 0x487   :  { %v3252_v9 = vpop.f32.mrb[56].mxu1 }
 0x488   :  { %v6409_v17 = vpop.f32.mrb[57].mxu1 }
 0x489   :  { %v5611_v17 = vld [vmem:[%s10460_s9 + $0xb0] sm:$0xff] }
 0x49c   :  { %v6125_v11 = vpop.f32.mrb[52].mxu0 }
 0x49d   :  { %v6126_v12 = vpop.f32.mrb[53].mxu0 }
 0x49e   :  { %v6127_v56 = vadd.f32 %v6126_v12, %v6125_v11  ;;  %v5612_v11 = vld [vmem:[%s10460_s9 + $0xb8] sm:$0xff] }
 0x49f   :  { %v7375_v12 = vpack.c.bf16 %v5612_v11, %v5611_v17 }
 0x4a0   :  { %v3243_v13 = vadd.f32 %v6127_v56, %v3242_v0  ;;  %v6128_v27 = vpop.f32.mrb[54].mxu0  ;;  %v3666_v56 = vld [vmem:[%s10460_s9] sm:$0xff] }
 0x4a1   :  { %v6129_v14 = vpop.f32.mrb[55].mxu0 }
 0x4a2   :  { %v3256_v41 = vadd.f32 %v3243_v13, %v3014_v62  ;;  %v6130_v44 = vadd.f32 %v6129_v14, %v6128_v27  ;;  %v3667_v13 = vld [vmem:[%s10460_s9 + $0x8] sm:$0xff] }
 0x4a3   :  { %v7379_v27 = vpack.c.bf16 %v3667_v13, %v3666_v56  ;;  %v5779_v13 = vld [vmem:[%s10463_s12] sm:$0xff]  }
 0x4a4   :  { %v3248_v61 = vadd.f32 %v6130_v44, %v3247_v5  ;;  %v6131_v63 = vpop.f32.mrb[56].mxu0  ;;  %v3266_v54 = vadd.f32 %v5576_v15, %v3256_v41  ;;  %v5607_v5 = vld [vmem:[%s10460_s9 + $0x90] sm:$0xff] }
 0x4a5   :  { %v6132_v2 = vpop.f32.mrb[57].mxu0  ;;  %v7367_v55 = vpack.c.bf16 %v5608_v6, %v5607_v5 }
 0x4a6   :  { %v3257_v16 = vadd.f32 %v3248_v61, %v3019_v22  ;;  %v6133_v19 = vadd.f32 %v6132_v2, %v6131_v63  ;;  %v3269_v36 = vmax.f32 %v3266_v54, 0.0  ;;  %v5606_v22 = vld [vmem:[%s10460_s9 + $0x88] sm:$0xff] }
 0x4a7   :  { %v7363_v34 = vpack.c.bf16 %v5606_v22, %v5605_v4  ;;  %v5631_v22 = vld [vmem:[%s10461_s10] ss:$0 sm:$0xff] }
 0x4a8   :  { %v3267_v20 = vadd.f32 %v5576_v15, %v3257_v16  ;;  %v3253_v24 = vadd.f32 %v6133_v19, %v3252_v9  ;;  %v3668_v16 = vld [vmem:[%s10460_s9 + $0x10] sm:$0xff]  ;;  %v3669_v19 = vld [vmem:[%s10460_s9 + $0x18] sm:$0xff] }
 0x4aa   :  { %v3270_v40 = vmax.f32 %v3267_v20, 0.0  ;;  %v3258_v48 = vadd.f32 %v3253_v24, %v3024_v7  ;;  %v5609_v7 = vld [vmem:[%s10460_s9 + $0xa0] sm:$0xff] }
 0x4ab   :  { %v7371_v9 = vpack.c.bf16 %v5610_v8, %v5609_v7 }
 0x4ac   :  { %v3268_v21 = vadd.f32 %v5576_v15, %v3258_v48  ;;  %v7283_v23 = vpack.c.bf16 %v3270_v40, %v3269_v36  ;;  %v7383_v40 = vpack.c.bf16 %v3669_v19, %v3668_v16  ;;  %v4282_v16 = vld [vmem:[%s10464_s13 + $0x8] sm:$0xff] }
 0x4ae   :  { %v3271_v38 = vmax.f32 %v3268_v21, 0.0  ;;  %7284 = vmatprep.subr.bf16.mxu1 %v7283_v23  ;;  %v3670_v21 = vld [vmem:[%s10460_s9 + $0x20] sm:$0xff] }
 0x4af   :  { %7286 = vmatpush3.bf16.msra.mxu1 %v7283_v23 }
 0x4b0   :  { %6414 = vmatprep.subr.msk.mxu1 %vm907_vm1, %v3271_v38 }
 0x4b3   :  { %6415 = vmatpush3.msk.msra.mxu1 %vm907_vm1, %v3271_v38 }
 0x4b4   :  { %7288 = vmatprep.subr.bf16.mxu1 %v7283_v23  ;;  %6417 = vmatmul.mubr.msk.f32.vlgmr.msra.gmra.mrb[58].mxu1 %vm3276_vm7, %v3275_v30  ;;  %v3673_v30 = vld [vmem:[%s10460_s9 + $0x38] sm:$0xff] }
 0x4b5   :  { %7290 = vmatpush3.bf16.msra.mxu1 %v7283_v23  ;;  %6425 = vmatprep.mubr.msk.f32.mxu1 %vm3276_vm7, %v3364_v32  ;;  %v3671_v23 = vld [vmem:[%s10460_s9 + $0x28] sm:$0xff] }
 0x4b6   :  { %6423 = vmatprep.subr.msk.mxu1 %vm907_vm1, %v3271_v38  ;;  %v7387_v25 = vpack.c.bf16 %v3671_v23, %v3670_v21 }
 0x4b9   :  { %6424 = vmatpush3.msk.msra.mxu1 %vm907_vm1, %v3271_v38  ;;  %v3672_v38 = vld [vmem:[%s10460_s9 + $0x30] sm:$0xff] }
 0x4ba   :  { %6426 = vmatmul.mubr.msk.f32.vlgmr.msra.gmra.mrb[60].mxu1 %vm3276_vm7, %v3365_v33  ;;  %7324 = vmatprep.subr.bf16.mxu1 %v5813_v52  ;;  %v7391_v32 = vpack.c.bf16 %v3673_v30, %v3672_v38  ;;  %v3675_v33 = vld [vmem:[%s10460_s9 + $0x48] sm:$0xff] }
 0x4bb   :  { %7326 = vmatpush3.bf16.msra.mxu1 %v5813_v52  ;;  %v7395_v52 = vpack.c.bf16 %v3675_v33, %v3674_v28  ;;  %v4601_v28 = vld [vmem:[%s10466_s16 + $0x18] sm:$0xff] }
 0x4bc   :  { %7328 = vmatprep.subr.bf16.mxu1 %v5814_v45 }
 0x4bf   :  { %7330 = vmatpush3.bf16.msra.mxu1 %v5814_v45  ;;  %v3676_v45 = vld [vmem:[%s10460_s9 + $0x50] sm:$0xff] }
 0x4c0   :  { %7332 = vmatprep.subr.bf16.mxu1 %v5815_v37 }
 0x4c3   :  { %7334 = vmatpush3.bf16.msra.mxu1 %v5815_v37  ;;  %v3677_v37 = vld [vmem:[%s10460_s9 + $0x58] sm:$0xff] }
 0x4c4   :  { %7336 = vmatprep.subr.bf16.mxu1 %v5816_v39 }
 0x4c7   :  { %7338 = vmatpush3.bf16.msra.mxu1 %v5816_v39  ;;  %v7399_v39 = vpack.c.bf16 %v3677_v37, %v3676_v45  ;;  %v4598_v37 = vld [vmem:[%s10466_s16] sm:$0xff] }
 0x4c8   :  { %7340 = vmatprep.subr.bf16.mxu1 %v5817_v29 }
 0x4cb   :  { %7342 = vmatpush3.bf16.msra.mxu1 %v5817_v29  ;;  %v5617_v29 = vld [vmem:[%s10460_s9 + $0xc0] sm:$0xff] }
 0x4cc   :  { %7344 = vmatprep.subr.bf16.mxu1 %v5818_v53 }
 0x4cf   :  { %7346 = vmatpush3.bf16.msra.mxu1 %v5818_v53  ;;  %v5618_v53 = vld [vmem:[%s10460_s9 + $0xc8] sm:$0xff] }
 0x4d0   :  { %7348 = vmatprep.subr.bf16.mxu1 %v5819_v42 }
 0x4d3   :  { %7350 = vmatpush3.bf16.msra.mxu1 %v5819_v42  ;;  %v7403_v42 = vpack.c.bf16 %v5618_v53, %v5617_v29  ;;  %v4603_v53 = vld [vmem:[%s10466_s16 + $0x28] sm:$0xff] }
 0x4d4   :  { %7352 = vmatprep.subr.bf16.mxu1 %v5820_v31 }
 0x4d7   :  { %7354 = vmatpush3.bf16.msra.mxu1 %v5820_v31  ;;  %v5620_v31 = vld [vmem:[%s10460_s9 + $0xd8] sm:$0xff] }
 0x4d8   :  { %7427 = vmatprep.subr.bf16.mxu1 %v8079_v18  ;;  %v7407_v57 = vpack.c.bf16 %v5620_v31, %v5619_v26 }
 0x587   :  { %v6418_v46 = vpop.f32.mrb[58].mxu1 }
 0x588   :  { %v3352_v60 = vpop.f32.mrb[59].mxu1 }
 0x58d   :  { %v6427_v43 = vpop.f32.mrb[60].mxu1 }
 0x58e   :  { %v3448_v62 = vmax.f32 %v6418_v46, %v6427_v43  ;;  %v3438_v59 = vpop.f32.mrb[61].mxu1  ;;  %v5624_v43 = vld [vmem:[%s10460_s9 + $0xf8] sm:$0xff] }
 0x58f   :  { %v3447_v0 = vmax.f32 %v3352_v60, %v3438_v59  ;;  %v5623_v60 = vld [vmem:[%s10460_s9 + $0xf0] sm:$0xff] }
 0x590   :  { %v7415_v50 = vpack.c.bf16 %v5624_v43, %v5623_v60  ;;  %v4607_v60 = vld [vmem:[%s10466_s16 + $0x48] sm:$0xff]  ;;  %v4609_v43 = vld [vmem:[%s10466_s16 + $0x58] sm:$0xff] }
 0x591   :  { %6460 = vmatprep.mubr.f32.mxu0 %v3447_v0  ;;  %6495 = vmatprep.mubr.f32.mxu1 %v3447_v0  ;;  %v5627_v0 = vld [vmem:[%s10460_s9 + $0x110] sm:$0xff] }
 0x592   :  { %6461 = vmatmul.mubr.f32.vlgmr.msra.gmra.mrb[58].mxu0 %v3448_v62  ;;  %6496 = vmatmul.mubr.f32.vlgmr.msra.gmra.mrb[62].mxu1 %v3448_v62  ;;  %v5626_v62 = vld [vmem:[%s10460_s9 + $0x108] sm:$0xff] }
 0x593   :  { %7358 = vmatpush3.bf16.msra.mxu0 %v7355_v10  ;;  %6583 = vmatprep.mubr.msk.f32.mxu1 %vm8080_vm3, %v8078_v3  ;;  %v5622_v10 = vld [vmem:[%s10460_s9 + $0xe8] sm:$0xff]  ;;  %v7419_v59 = vpack.c.bf16 %v5626_v62, %v5625_v35  ;;  %v4606_v35 = vld [vmem:[%s10466_s16 + $0x40] sm:$0xff]  ;;  %v4608_v62 = vld [vmem:[%s10466_s16 + $0x50] sm:$0xff] }
 0x594   :  { %7360 = vmatprep.subr.bf16.mxu0 %v7359_v1  ;;  %v7411_v46 = vpack.c.bf16 %v5622_v10, %v5621_v58  ;;  %v4602_v58 = vld [vmem:[%s10466_s16 + $0x20] sm:$0xff]  ;;  %v4604_v10 = vld [vmem:[%s10466_s16 + $0x30] sm:$0xff] }
 0x597   :  { %7362 = vmatpush3.bf16.msra.mxu0 %v7359_v1  ;;  %v5628_v1 = vld [vmem:[%s10460_s9 + $0x118] sm:$0xff] }
 0x598   :  { %7364 = vmatprep.subr.bf16.mxu0 %v7363_v34  ;;  %v7423_v4 = vpack.c.bf16 %v5628_v1, %v5627_v0  ;;  %v4611_v0 = vld [vmem:[%s10466_s16 + $0x68] sm:$0xff]  ;;  %v4613_v1 = vld [vmem:[%s10466_s16 + $0x78] sm:$0xff] }
 0x59b   :  { %7366 = vmatpush3.bf16.msra.mxu0 %v7363_v34 }
 0x59c   :  { %7368 = vmatprep.subr.bf16.mxu0 %v7367_v55 }
 0x59f   :  { %7370 = vmatpush3.bf16.msra.mxu0 %v7367_v55 }
 0x5a0   :  { %7372 = vmatprep.subr.bf16.mxu0 %v7371_v9 }
 0x5a3   :  { %7374 = vmatpush3.bf16.msra.mxu0 %v7371_v9  ;;  %v3963_v9 = vld [vmem:[%s10462_s11] sm:$0x3] }
 0x5a4   :  { %7376 = vmatprep.subr.bf16.mxu0 %v7375_v12  ;;  %v3964_v11 = vunpack.c.l.bf16 %v3963_v9 }
 0x5a7   :  { %7378 = vmatpush3.bf16.msra.mxu0 %v7375_v12  ;;  %v5634_v12 = vld [vmem:[%s10462_s11 + $0x2] sm:$0x3] }
 0x5a8   :  { %7380 = vmatprep.subr.bf16.mxu0 %v7379_v27  ;;  %v4044_v56 = vunpack.c.l.bf16 %v5634_v12 }
 0x665   :  { %v6462_v14 = vpop.f32.mrb[58].mxu0  ;;  %v6497_v41 = vpop.f32.mrb[62].mxu1 }
 0x666   :  { %v9979_v44 = vmax.f32 %v6462_v14, %v6497_v41  ;;  %v3547_v15 = vpop.f32.mrb[59].mxu0  ;;  %v3655_v61 = vpop.f32.mrb[63].mxu1 }
 0x667   :  { %v3664_v63 = vmax.f32 %v3547_v15, %v3655_v61  ;;  %v5822_v61 = vld [vmem:[%s10463_s12 + $0x10] sm:$0xff]  }
 0x668   :  { %v3694_v2 = vrot.slane %v9979_v44, 1  ;;  %v3869_v54 = vrot.slane %v9979_v44, 2 }
 0x669   :  { %v3693_v20 = vrot.slane %v3664_v63, 1  ;;  %v3868_v24 = vrot.slane %v3664_v63, 2 }
 0x66b   :  { %v3695_v36 = vsel %vm2672_vm4, %v3693_v20, %v3694_v2  ;;  %v3870_v48 = vsel %vm3068_vm6, %v3868_v24, %v3869_v54 }
 0x66c   :  { %6522 = vmatprep.mubr.msk.f32.mxu0 %vm3696_vm8, %v3695_v36  ;;  %v5644_v36 = vld [vmem:[%s10464_s13 + $0x10] sm:$0xff] }
 0x66d   :  { %6523 = vmatmul.mubr.msk.f32.vlgmr.msra.gmra.mrb[60].mxu0 %vm3696_vm8, %v3694_v2  ;;  %v5823_v2 = vld [vmem:[%s10463_s12 + $0x18] sm:$0xff]  }
 0x66e   :  { %7382 = vmatpush3.bf16.msra.mxu0 %v7379_v27  ;;  %6549 = vmatprep.mubr.msk.f32.mxu0 %vm3696_vm8, %v3664_v63  ;;  %v5821_v27 = vld [vmem:[%s10463_s12 + $0x8] sm:$0xff]  }
 0x66f   :  { %7384 = vmatprep.subr.bf16.mxu0 %v7383_v40 }
 0x672   :  { %7386 = vmatpush3.bf16.msra.mxu0 %v7383_v40  ;;  %v5645_v40 = vld [vmem:[%s10464_s13 + $0x18] sm:$0xff] }
 0x673   :  { %7388 = vmatprep.subr.bf16.mxu0 %v7387_v25  ;;  %v7451_v21 = vpack.c.bf16 %v5645_v40, %v5644_v36  ;;  %v5662_v36 = vld [vmem:[%s10466_s16 + $0xc0] sm:$0xff]  ;;  %v5664_v40 = vld [vmem:[%s10466_s16 + $0xd0] sm:$0xff] }
 0x676   :  { %7390 = vmatpush3.bf16.msra.mxu0 %v7387_v25 }
 0x677   :  { %7392 = vmatprep.subr.bf16.mxu0 %v7391_v32 }
 0x67a   :  { %7394 = vmatpush3.bf16.msra.mxu0 %v7391_v32  ;;  %v4599_v32 = vld [vmem:[%s10466_s16 + $0x8] sm:$0xff] }
 0x67b   :  { %7396 = vmatprep.subr.bf16.mxu0 %v7395_v52  ;;  %v7453_v45 = vpack.c.bf16 %v4601_v28, %v4599_v32  ;;  %v5799_v32 = vld [vmem:[%s10468_s18] sm:$0xff]  }
 0x67c   :  { %v5694_v28 = vld [vmem:[%s10469_s19 + $0x180] sm:$0xff] }
 0x67e   :  { %7398 = vmatpush3.bf16.msra.mxu0 %v7395_v52 }
 0x67f   :  { %7400 = vmatprep.subr.bf16.mxu0 %v7399_v39 }
 0x682   :  { %7402 = vmatpush3.bf16.msra.mxu0 %v7399_v39  ;;  %v4600_v39 = vld [vmem:[%s10466_s16 + $0x10] sm:$0xff] }
 0x683   :  { %7404 = vmatprep.subr.bf16.mxu0 %v7403_v42  ;;  %v7455_v31 = vpack.c.bf16 %v4600_v39, %v4598_v37  ;;  %v5696_v37 = vld [vmem:[%s10469_s19 + $0x190] sm:$0xff]  ;;  %v5697_v39 = vld [vmem:[%s10469_s19 + $0x198] sm:$0xff] }
 0x685   :  { %6550 = vmatmul.mubr.msk.f32.vlgmr.msra.gmra.mrb[60].mxu0 %vm3696_vm8, %v9979_v44 }
 0x686   :  { %7406 = vmatpush3.bf16.msra.mxu0 %v7403_v42  ;;  %6576 = vmatprep.mubr.msk.f32.mxu0 %vm3696_vm8, %v3870_v48  ;;  %v4605_v42 = vld [vmem:[%s10466_s16 + $0x38] sm:$0xff] }
 0x687   :  { %7408 = vmatprep.subr.bf16.mxu0 %v7407_v57 }
 0x68a   :  { %7410 = vmatpush3.bf16.msra.mxu0 %v7407_v57  ;;  %v7457_v57 = vpack.c.bf16 %v4605_v42, %v4603_v53  ;;  %v5800_v53 = vunpack.c.l.bf16 %v5799_v32 }
 0x68b   :  { %7412 = vmatprep.subr.bf16.mxu0 %v7411_v46 }
 0x68e   :  { %7414 = vmatpush3.bf16.msra.mxu0 %v7411_v46  ;;  %v7459_v46 = vpack.c.bf16 %v4604_v10, %v4602_v58  ;;  %v5680_v58 = vld [vmem:[%s10469_s19 + $0x110] sm:$0xff]  ;;  %v5681_v10 = vld [vmem:[%s10469_s19 + $0x118] sm:$0xff] }
 0x68f   :  { %7416 = vmatprep.subr.bf16.mxu0 %v7415_v50 }
 0x692   :  { %7418 = vmatpush3.bf16.msra.mxu0 %v7415_v50  ;;  %v7461_v50 = vpack.c.bf16 %v4609_v43, %v4607_v60  ;;  %v5699_v60 = vld [vmem:[%s10469_s19 + $0x1a8] sm:$0xff]  ;;  %v5801_v43 = vunpack.c.h.bf16 %v5799_v32  ;;  %v4976_v32 = vld [vmem:[%s10469_s19 + $0x20] sm:$0xff] }
 0x693   :  { %7420 = vmatprep.subr.bf16.mxu0 %v7419_v59 }
 0x696   :  { %7422 = vmatpush3.bf16.msra.mxu0 %v7419_v59  ;;  %v7463_v59 = vpack.c.bf16 %v4608_v62, %v4606_v35  ;;  %v5682_v62 = vld [vmem:[%s10469_s19 + $0x120] sm:$0xff] }
 0x697   :  { %7424 = vmatprep.subr.bf16.mxu0 %v7423_v4 }
 0x69a   :  { %7426 = vmatpush3.bf16.msra.mxu0 %v7423_v4  ;;  %v7465_v4 = vpack.c.bf16 %v4613_v1, %v4611_v0  ;;  %v5700_v0 = vld [vmem:[%s10469_s19 + $0x1b0] sm:$0xff]  ;;  %v5701_v1 = vld [vmem:[%s10469_s19 + $0x1b8] sm:$0xff] }
 0x69d   :  { %6577 = vmatmul.mubr.msk.f32.vlgmr.msra.gmra.mrb[60].mxu0 %vm3696_vm8, %v3869_v54  ;;  %v4281_v54 = vld [vmem:[%s10464_s13] sm:$0xff] }
 0x69e   :  { %4939 = vmatprep.mubr.f32.mxu0 %v8078_v3  ;;  %v7448_v19 = vpack.c.bf16 %v4282_v16, %v4281_v54  ;;  %v5660_v54 = vld [vmem:[%s10466_s16 + $0xb0] sm:$0xff]  ;;  %v5663_v16 = vld [vmem:[%s10466_s16 + $0xc8] sm:$0xff] }
 0x770   :  { %v6578_v34 = vpop.f32.mrb[60].mxu0 }
 0x771   :  { %v3960_v5 = vadd.f32 %v6578_v34, %v5631_v22  ;;  %v3941_v6 = vpop.f32.mrb[61].mxu0  ;;  %v4612_v34 = vld [vmem:[%s10466_s16 + $0x70] sm:$0xff] }
 0x772   :  { %v3959_v55 = vadd.f32 %v5631_v22, %v3941_v6  ;;  %v4610_v22 = vld [vmem:[%s10466_s16 + $0x60] sm:$0xff]  ;;  %v5655_v6 = vld [vmem:[%s10466_s16 + $0x88] sm:$0xff] }
 0x773   :  { %v3962_v7 = vmax.f32 %v3960_v5, 0.0  ;;  %v7467_v5 = vpack.c.bf16 %v4612_v34, %v4610_v22  ;;  %v7529_v22 = vpack.c.bf16 %v5701_v1, %v5700_v0  ;;  %v5684_v34 = vld [vmem:[%s10469_s19 + $0x130] sm:$0xff]  ;;  %v5707_v0 = vld [vmem:[%s10469_s19 + $0x1e8] sm:$0xff]  ;;  %v5000_v1 = vld [vmem:[%s10469_s19 + $0xe0] sm:$0xff] }
 0x774   :  { %v3961_v8 = vmax.f32 %v3959_v55, 0.0  ;;  %v5657_v55 = vld [vmem:[%s10466_s16 + $0x98] sm:$0xff] }
 0x776   :  { %v7428_v17 = vpack.c.bf16 %v3962_v7, %v3961_v8  ;;  %v7469_v7 = vpack.c.bf16 %v5657_v55, %v5655_v6  ;;  %v5702_v6 = vld [vmem:[%s10469_s19 + $0x1c0] sm:$0xff]  ;;  %v5703_v55 = vld [vmem:[%s10469_s19 + $0x1c8] sm:$0xff] }
 0x778   :  { %7430 = vmatpush3.bf16.msk.msra.mxu1 %vm7429_vm10, %v7428_v17 }
 0x779   :  { %7431 = vmatprep.subr.bf16.mxu1 %v8079_v18 }
 0x77b   :  { %6584 = vmatmul.mubr.msk.f32.vlgmr.msra.gmra.mrb[64].mxu1 %vm3965_vm11, %v3964_v11  ;;  %v5652_v11 = vld [vmem:[%s10467_s14] ss:$0 sm:$0xff] }
 0x77c   :  { %7434 = vmatpush3.bf16.msk.msra.mxu1 %vm7429_vm10, %v7428_v17  ;;  %6590 = vmatprep.mubr.msk.f32.mxu1 %vm8080_vm3, %v8078_v3 }
 0x77d   :  { %7435 = vmatprep.subr.bf16.mxu1 %v8079_v18 }
 0x77f   :  { %6591 = vmatmul.mubr.msk.f32.vlgmr.msra.gmra.mrb[66].mxu1 %vm3965_vm11, %v4044_v56 }
 0x780   :  { %7437 = vmatpush3.bf16.msra.mxu1 %v5779_v13  ;;  %6601 = vmatprep.mubr.msk.f32.mxu1 %vm8080_vm3, %v8078_v3  ;;  %v5654_v13 = vld [vmem:[%s10466_s16 + $0x80] sm:$0xff] }
 0x781   :  { %7438 = vmatprep.subr.bf16.mxu1 %v8079_v18 }
 0x784   :  { %7440 = vmatpush3.bf16.msra.mxu1 %v5821_v27  ;;  %v5656_v27 = vld [vmem:[%s10466_s16 + $0x90] sm:$0xff] }
 0x785   :  { %7441 = vmatprep.subr.bf16.mxu1 %v8079_v18 }
 0x84e   :  { %v4038_v14 = vpop.f32.mrb[64].mxu1 }
 0x84f   :  { %v6585_v41 = vpop.f32.mrb[65].mxu1 }
 0x850   :  { %v5661_v41 = vld [vmem:[%s10466_s16 + $0xb8] sm:$0xff] }
 0x852   :  { %v4114_v44 = vpop.f32.mrb[66].mxu1 }
 0x853   :  { %v4118_v15 = vmax.f32 %v4038_v14, %v4114_v44  ;;  %v6592_v63 = vpop.f32.mrb[67].mxu1  ;;  %v5659_v14 = vld [vmem:[%s10466_s16 + $0xa8] sm:$0xff] }
 0x854   :  { %v7473_v63 = vpack.c.bf16 %v5661_v41, %v5659_v14  ;;  %v5686_v14 = vld [vmem:[%s10469_s19 + $0x140] sm:$0xff]  ;;  %v5687_v41 = vld [vmem:[%s10469_s19 + $0x148] sm:$0xff] }
 0x855   :  { %6602 = vmatmul.mubr.msk.f32.vlgmr.msra.gmra.mrb[68].mxu1 %vm4127_vm12, %v4118_v15 }
 0x856   :  { %7443 = vmatpush3.bf16.msra.mxu1 %v5822_v61  ;;  %6612 = vmatprep.mubr.msk.f32.mxu1 %vm8080_vm3, %v8078_v3 }
 0x857   :  { %7444 = vmatprep.subr.bf16.mxu1 %v8079_v18 }
 0x85a   :  { %7446 = vmatpush3.bf16.msra.mxu1 %v5823_v2  ;;  %v5658_v2 = vld [vmem:[%s10466_s16 + $0xa0] sm:$0xff] }
 0x85b   :  { %7447 = vmatprep.subr.bf16.mxu1 %v8079_v18 }
 0x85d   :  { %6613 = vmatmul.mubr.msk.f32.vlgmr.msra.gmra.mrb[70].mxu1 %vm4127_vm12, %v4118_v15  ;;  %v7471_v15 = vpack.c.bf16 %v5656_v27, %v5654_v13  ;;  %v7533_v13 = vpack.c.bf16 %v5703_v55, %v5702_v6  ;;  %v4991_v27 = vld [vmem:[%s10469_s19 + $0x98] sm:$0xff] }
 0x85e   :  { %6619 = vmatprep.mubr.msk.f32.mxu1 %vm8080_vm3, %v8078_v3  ;;  %7449 = vmatpush3.bf16.msra.mxu1 %v7448_v19  ;;  %v5665_v19 = vld [vmem:[%s10466_s16 + $0xd8] sm:$0xff] }
 0x85f   :  { %7450 = vmatprep.subr.bf16.mxu1 %v8079_v18  ;;  %v5795_v18 = vld [vmem:[%s10465_s15] sm:$0xff]  }
 0x860   :  { %v5797_v33 = vunpack.c.h.bf16 %v5795_v18  ;;  %v5796_v26 = vunpack.c.l.bf16 %v5795_v18  ;;  %v5666_v18 = vld [vmem:[%s10466_s16 + $0xe0] sm:$0xff] }
 0x928   :  { %v4197_v20 = vpop.f32.mrb[68].mxu1 }
 0x929   :  { %v6603_v24 = vpop.f32.mrb[69].mxu1 }
 0x92a   :  { %v7477_v24 = vpack.c.bf16 %v5665_v19, %v5663_v16 }
 0x930   :  { %v4276_v48 = vpop.f32.mrb[70].mxu1 }
 0x931   :  { %v4280_v23 = vmax.f32 %v4197_v20, %v4276_v48  ;;  %v6614_v25 = vpop.f32.mrb[71].mxu1  ;;  %v7475_v20 = vpack.c.bf16 %v5660_v54, %v5658_v2  ;;  %v5667_v48 = vld [vmem:[%s10466_s16 + $0xe8] sm:$0xff]  ;;  %v5705_v2 = vld [vmem:[%s10469_s19 + $0x1d8] sm:$0xff] }
 0x933   :  { %6620 = vmatmul.mubr.msk.f32.vlgmr.msra.gmra.mrb[72].mxu1 %vm4283_vm13, %v4280_v23 }
 0x934   :  { %7452 = vmatpush3.bf16.msra.mxu1 %v7451_v21  ;;  %6626 = vmatprep.mubr.msk.f32.mxu1 %vm8080_vm3, %v8078_v3  ;;  %v5669_v21 = vld [vmem:[%s10466_s16 + $0xf8] sm:$0xff] }
 0x935   :  { %6629 = vmatprep.subr.mxu1 %v8078_v3  ;;  %v7481_v25 = vpack.c.bf16 %v5669_v21, %v5667_v48  ;;  %v4993_v48 = vld [vmem:[%s10469_s19 + $0xa8] sm:$0xff] }
 0x937   :  { %6627 = vmatmul.mubr.msk.f32.vlgmr.msra.gmra.mrb[74].mxu1 %vm4283_vm13, %v4280_v23  ;;  %v7479_v23 = vpack.c.bf16 %v5664_v40, %v5662_v36  ;;  %v4992_v36 = vld [vmem:[%s10469_s19 + $0xa0] sm:$0xff]  ;;  %v7535_v40 = vpack.c.bf16 %v5687_v41, %v5686_v14  ;;  %v5003_v14 = vld [vmem:[%s10469_s19 + $0xf8] sm:$0xff] }
 0x938   :  { %6631 = vmatprep.mubr.msk.f32.mxu1 %vm8080_vm3, %v8078_v3 }
 0xa06   :  { %v4353_v38 = vpop.f32.mrb[72].mxu1 }
 0xa07   :  { %v6621_v30 = vpop.f32.mrb[73].mxu1 }
 0xa0a   :  { %v4426_v52 = vpop.f32.mrb[74].mxu1 }
 0xa0b   :  { %v6628_v29 = vpop.f32.mrb[75].mxu1  ;;  %6630 = vmatpush3.msk.msra.mxu1 %vm4439_vm14, %v4426_v52  ;;  %v5678_v52 = vld [vmem:[%s10469_s19 + $0x100] sm:$0xff] }
 0xa0c   :  { %6632 = vmatmul.mubr.msk.f32.vlgmr.msra.gmra.mrb[76].mxu1 %vm4435_vm15, %v5797_v33  ;;  %6634 = vmatprep.subr.mxu1 %v8078_v3  ;;  %v5695_v33 = vld [vmem:[%s10469_s19 + $0x188] sm:$0xff] }
 0xa0d   :  { %6635 = vmatpush3.msk.msra.mxu1 %vm4439_vm14, %v4353_v38  ;;  %6636 = vmatprep.mubr.msk.f32.mxu1 %vm8080_vm3, %v8078_v3  ;;  %v5668_v38 = vld [vmem:[%s10466_s16 + $0xf0] sm:$0xff]  ;;  %v7517_v42 = vpack.c.bf16 %v5695_v33, %v5694_v28  ;;  %v4977_v28 = vld [vmem:[%s10469_s19 + $0x28] sm:$0xff] }
 0xa0e   :  { %7454 = vmatprep.subr.bf16.mxu1 %v7453_v45  ;;  %v7483_v30 = vpack.c.bf16 %v5668_v38, %v5666_v18  ;;  %v5679_v45 = vld [vmem:[%s10469_s19 + $0x108] sm:$0xff] }
 0xa10   :  { %6637 = vmatmul.mubr.msk.f32.vlgmr.msra.gmra.mrb[78].mxu1 %vm4435_vm15, %v5796_v26 }
 0xa11   :  { %7456 = vmatpush1.bf16.msra.mxu1 %v7455_v31  ;;  %4681 = vmatprep.mubr.f32.mxu1 %v8078_v3  ;;  %v7519_v31 = vpack.c.bf16 %v5679_v45, %v5678_v52  ;;  %v4994_v52 = vld [vmem:[%s10469_s19 + $0xb0] sm:$0xff]  ;;  %v7495_v45 = vpack.c.bf16 %v4977_v28, %v4976_v32 }
 0xa12   :  { %7458 = vmatprep.subr.bf16.mxu1 %v7457_v57  ;;  %v7521_v57 = vpack.c.bf16 %v5697_v39, %v5696_v37  ;;  %v4978_v39 = vld [vmem:[%s10469_s19 + $0x30] sm:$0xff] }
 0xa15   :  { %7460 = vmatpush1.bf16.msra.mxu1 %v7459_v46  ;;  %v5698_v46 = vld [vmem:[%s10469_s19 + $0x1a0] sm:$0xff] }
 0xa16   :  { %7462 = vmatprep.subr.bf16.mxu1 %v7461_v50  ;;  %v7523_v50 = vpack.c.bf16 %v5681_v10, %v5680_v58  ;;  %v7525_v35 = vpack.c.bf16 %v5699_v60, %v5698_v46  ;;  %v4981_v58 = vld [vmem:[%s10469_s19 + $0x48] sm:$0xff]  ;;  %v4998_v46 = vld [vmem:[%s10469_s19 + $0xd0] sm:$0xff]  ;;  %v4999_v60 = vld [vmem:[%s10469_s19 + $0xd8] sm:$0xff] }
 0xa19   :  { %7464 = vmatpush1.bf16.msra.mxu1 %v7463_v59  ;;  %v5683_v59 = vld [vmem:[%s10469_s19 + $0x128] sm:$0xff] }
 0xa1a   :  { %7466 = vmatprep.subr.bf16.mxu1 %v7465_v4  ;;  %v7527_v4 = vpack.c.bf16 %v5683_v59, %v5682_v62  ;;  %v5706_v59 = vld [vmem:[%s10469_s19 + $0x1e0] sm:$0xff] }
 0xa1d   :  { %7468 = vmatpush1.bf16.msra.mxu1 %v7467_v5  ;;  %v5685_v5 = vld [vmem:[%s10469_s19 + $0x138] sm:$0xff] }
 0xa1e   :  { %7470 = vmatprep.subr.bf16.mxu1 %v7469_v7  ;;  %v5824_v7 = vld [vmem:[%s10468_s18 + $0x8] sm:$0xff]  }
 0xa1f   :  { %v5805_v18 = vunpack.c.h.bf16 %v5824_v7 }
 0xadf   :  { %v4509_v8 = vpop.f32.mrb[76].mxu1 }
 0xae0   :  { %v6633_v9 = vpop.f32.mrb[77].mxu1 }
 0xae1   :  { %v4989_v9 = vld [vmem:[%s10469_s19 + $0x88] sm:$0xff] }
 0xae3   :  { %v4585_v17 = vpop.f32.mrb[78].mxu1 }
 0xae4   :  { %v4586_v12 = vadd.f32 %v4585_v17, %v4509_v8  ;;  %v6638_v56 = vpop.f32.mrb[79].mxu1  ;;  %v4988_v8 = vld [vmem:[%s10469_s19 + $0x80] sm:$0xff]  ;;  %v7531_v17 = vpack.c.bf16 %v5685_v5, %v5684_v34  ;;  %v5691_v34 = vld [vmem:[%s10469_s19 + $0x168] sm:$0xff] }
 0xae5   :  { %v4990_v56 = vld [vmem:[%s10469_s19 + $0x90] sm:$0xff]  ;;  %v5001_v5 = vld [vmem:[%s10469_s19 + $0xe8] sm:$0xff] }
 0xae6   :  { %v4596_v44 = vadd.f32 %v5652_v11, %v4586_v12  ;;  %v4972_v11 = vld [vmem:[%s10469_s19] sm:$0xff]  ;;  %v4973_v12 = vld [vmem:[%s10469_s19 + $0x8] sm:$0xff]  ;;  %v7489_v19 = vpack.c.bf16 %v4991_v27, %v4990_v56  ;;  %v7509_v55 = vpack.c.bf16 %v5001_v5, %v5000_v1  ;;  %v5693_v27 = vld [vmem:[%s10469_s19 + $0x178] sm:$0xff] }
 0xae7   :  { %v7487_v16 = vpack.c.bf16 %v4973_v12, %v4972_v11  ;;  %v5709_v11 = vld [vmem:[%s10469_s19 + $0x1f8] sm:$0xff]  ;;  %v5002_v12 = vld [vmem:[%s10469_s19 + $0xf0] sm:$0xff] }
 0xae8   :  { %v4597_v61 = vmax.f32 %v4596_v44, 0.0 }
 0xaea   :  { %5653 = vmatmul.mubr.msk.f32.vlgmr.msra.gmra.mrb[80].mxu1 %vm2694_vm5, %v4597_v61 }
 0xaeb   :  { %7472 = vmatpush1.bf16.msra.mxu1 %v7471_v15  ;;  %4769 = vmatprep.mubr.f32.mxu1 %v8078_v3  ;;  %v5804_v15 = vunpack.c.l.bf16 %v5824_v7  ;;  %v4984_v7 = vld [vmem:[%s10469_s19 + $0x60] sm:$0xff] }
 0xaec   :  { %7474 = vmatprep.subr.bf16.mxu1 %v7473_v63  ;;  %v5704_v63 = vld [vmem:[%s10469_s19 + $0x1d0] sm:$0xff] }
 0xaed   :  { %v7537_v21 = vpack.c.bf16 %v5705_v2, %v5704_v63 }
 0xaef   :  { %7476 = vmatpush1.bf16.msra.mxu1 %v7475_v20  ;;  %v4974_v20 = vld [vmem:[%s10469_s19 + $0x10] sm:$0xff] }
 0xaf0   :  { %7478 = vmatprep.subr.bf16.mxu1 %v7477_v24  ;;  %v4975_v24 = vld [vmem:[%s10469_s19 + $0x18] sm:$0xff] }
 0xaf1   :  { %v7491_v38 = vpack.c.bf16 %v4975_v24, %v4974_v20  ;;  %v4952_v20 = vld [vmem:[%s10470_s17] sm:$0x3] }
 0xaf2   :  { %v4957_v24 = vrot.slane %v4952_v20, %v833_v49 }
 0xaf3   :  { %7480 = vmatpush1.bf16.msra.mxu1 %v7479_v23  ;;  %v5688_v23 = vld [vmem:[%s10469_s19 + $0x150] sm:$0xff] }
 0xaf4   :  { %7482 = vmatprep.subr.bf16.mxu1 %v7481_v25  ;;  %v5689_v25 = vld [vmem:[%s10469_s19 + $0x158] sm:$0xff] }
 0xaf5   :  { %v7539_v33 = vpack.c.bf16 %v5689_v25, %v5688_v23 }
 0xaf7   :  { %7484 = vmatpush1.bf16.msra.mxu1 %v7483_v30  ;;  %v7493_v30 = vpack.c.bf16 %v4993_v48, %v4992_v36 }
 0xafa   :  { %5670 = vmatmul.mubr.msk.f32.vlgmr.msra.gmra.mrb[82].mxu1 %vm2694_vm5, %v4597_v61  ;;  %v7485_v61 = vpack.c.bf16 %v4989_v9, %v4988_v8  ;;  %v4985_v8 = vld [vmem:[%s10469_s19 + $0x68] sm:$0xff] }
 0xafb   :  { %4856 = vmatprep.mubr.f32.mxu1 %v8078_v3  ;;  %v7511_v9 = vpack.c.bf16 %v4985_v8, %v4984_v7 }
 0xbbd   :  { %v4683_v29 = vpop.f32.mrb[80].mxu1 }
 0xbbe   :  { %v4685_v26 = vpop.f32.mrb[81].mxu1 }
 0xbbf   :  { %4875 = vmatprep.subr.mxu0 %v4685_v26 }
 0xbc0   :  { %4876 = vmatpush1.msra.mxu0 %v4683_v29  ;;  %v4979_v29 = vld [vmem:[%s10469_s19 + $0x38] sm:$0xff] }
 0xbc1   :  { %5675 = vmatmul.mubr.msk.f32.vlgmr.msra.gmra.mrb[62].mxu0 %vm4785_vm0, %v5800_v53  ;;  %7518 = vmatprep.subr.bf16.mxu0 %v7517_v42  ;;  %v4996_v53 = vld [vmem:[%s10469_s19 + $0xc0] sm:$0xff]  ;;  %v4997_v42 = vld [vmem:[%s10469_s19 + $0xc8] sm:$0xff]  ;;  %v7499_v26 = vpack.c.bf16 %v4979_v29, %v4978_v39 }
 0xbc2   :  { %4945 = vmatprep.mubr.f32.mxu0 %v8078_v3  ;;  %7520 = vmatpush3.bf16.msra.mxu0 %v7519_v31  ;;  %v7501_v31 = vpack.c.bf16 %v4997_v42, %v4996_v53  ;;  %v5677_v39 = vld [vmem:[%s10471_s20] ss:$0 sm:$0xff]  ;;  %s8082_s20 = smov 64  }
 0xbc3   :  { %7522 = vmatprep.subr.bf16.mxu0 %v7521_v57  ;;  %v4980_v57 = vld [vmem:[%s10469_s19 + $0x40] sm:$0xff] }
 0xbc4   :  { %v7503_v10 = vpack.c.bf16 %v4981_v58, %v4980_v57 }
 0xbc5   :  { %5676 = vmatmul.mubr.msk.f32.gmra.mrb[64].mxu0 %vm4785_vm0, %v5801_v43  ;;  %v7505_v43 = vpack.c.bf16 %v4999_v60, %v4998_v46 }
 0xbc6   :  { %7524 = vmatpush3.bf16.msra.mxu0 %v7523_v50  ;;  %v4982_v50 = vld [vmem:[%s10469_s19 + $0x50] sm:$0xff] }
 0xbc7   :  { %7526 = vmatprep.subr.bf16.mxu0 %v7525_v35  ;;  %v4983_v35 = vld [vmem:[%s10469_s19 + $0x58] sm:$0xff] }
 0xbc8   :  { %v7507_v62 = vpack.c.bf16 %v4983_v35, %v4982_v50 }
 0xbca   :  { %7528 = vmatpush3.bf16.msra.mxu0 %v7527_v4  ;;  %v7541_v4 = vpack.c.bf16 %v5707_v0, %v5706_v59 }
 0xbcb   :  { %7530 = vmatprep.subr.bf16.mxu0 %v7529_v22  ;;  %v5690_v22 = vld [vmem:[%s10469_s19 + $0x160] sm:$0xff] }
 0xbcc   :  { %v7543_v6 = vpack.c.bf16 %v5691_v34, %v5690_v22 }
 0xbcd   :  { %v4771_v44 = vpop.f32.mrb[82].mxu1 }
 0xbce   :  { %v4773_v54 = vpop.f32.mrb[83].mxu1  ;;  %7532 = vmatpush3.bf16.msra.mxu0 %v7531_v17  ;;  %v5708_v17 = vld [vmem:[%s10469_s19 + $0x1f0] sm:$0xff] }
 0xbcf   :  { %4792 = vmatprep.subr.mxu1 %v4773_v54  ;;  %7534 = vmatprep.subr.bf16.mxu0 %v7533_v13  ;;  %v7545_v56 = vpack.c.bf16 %v5709_v11, %v5708_v17  ;;  %v5692_v13 = vld [vmem:[%s10469_s19 + $0x170] sm:$0xff] }
 0xbd0   :  { %4793 = vmatpush1.msra.mxu1 %v4771_v44  ;;  %v7547_v41 = vpack.c.bf16 %v5693_v27, %v5692_v13  ;;  %v7513_v44 = vpack.c.bf16 %v5003_v14, %v5002_v12 }
 0xbd1   :  { %5673 = vmatmul.mubr.msk.f32.vlgmr.msra.gmra.mrb[84].mxu1 %vm4785_vm0, %v5804_v15  ;;  %7486 = vmatprep.subr.bf16.mxu1 %v7485_v61  ;;  %v4986_v15 = vld [vmem:[%s10469_s19 + $0x70] sm:$0xff]  ;;  %v4987_v61 = vld [vmem:[%s10469_s19 + $0x78] sm:$0xff] }
 0xbd2   :  { %4862 = vmatprep.mubr.f32.mxu1 %v8078_v3  ;;  %7488 = vmatpush3.bf16.msra.mxu1 %v7487_v16  ;;  %v4995_v3 = vld [vmem:[%s10469_s19 + $0xb8] sm:$0xff]  ;;  %v7515_v63 = vpack.c.bf16 %v4987_v61, %v4986_v15 }
 0xbd3   :  { %7490 = vmatprep.subr.bf16.mxu1 %v7489_v19  ;;  %7536 = vmatpush3.bf16.msra.mxu0 %v7535_v40  ;;  %v7497_v37 = vpack.c.bf16 %v4995_v3, %v4994_v52  ;;  %v4961_v40 = vrot.slane %v4952_v20, %v837_v51 }
 0xbd4   :  { %7538 = vmatprep.subr.bf16.mxu0 %v7537_v21 }
 0xbd5   :  { %5674 = vmatmul.mubr.msk.f32.gmra.mrb[86].mxu1 %vm4785_vm0, %v5805_v18 }
 0xbd6   :  { %7492 = vmatpush3.bf16.msra.mxu1 %v7491_v38 }
 0xbd7   :  { %7494 = vmatprep.subr.bf16.mxu1 %v7493_v30  ;;  %7540 = vmatpush3.bf16.msra.mxu0 %v7539_v33 }
 0xbd8   :  { %7542 = vmatprep.subr.bf16.mxu0 %v7541_v4 }
 0xbda   :  { %7496 = vmatpush3.bf16.msra.mxu1 %v7495_v45 }
 0xbdb   :  { %7498 = vmatprep.subr.bf16.mxu1 %v7497_v37  ;;  %7544 = vmatpush3.bf16.msra.mxu0 %v7543_v6 }
 0xbdc   :  { %7546 = vmatprep.subr.bf16.mxu0 %v7545_v56 }
 0xbde   :  { %7500 = vmatpush3.bf16.msra.mxu1 %v7499_v26 }
 0xbdf   :  { %7502 = vmatprep.subr.bf16.mxu1 %v7501_v31  ;;  %7548 = vmatpush3.bf16.msra.mxu0 %v7547_v41 }
 0xbe2   :  { %7504 = vmatpush3.bf16.msra.mxu1 %v7503_v10 }
 0xbe3   :  { %7506 = vmatprep.subr.bf16.mxu1 %v7505_v43 }
 0xbe6   :  { %7508 = vmatpush3.bf16.msra.mxu1 %v7507_v62 }
 0xbe7   :  { %7510 = vmatprep.subr.bf16.mxu1 %v7509_v55 }
 0xbea   :  { %7512 = vmatpush3.bf16.msra.mxu1 %v7511_v9 }
 0xbeb   :  { %7514 = vmatprep.subr.bf16.mxu1 %v7513_v44 }
 0xbee   :  { %7516 = vmatpush3.bf16.msra.mxu1 %v7515_v63 }
 0xc94   :  { %v4941_v2 = vpop.f32.mrb[62].mxu0 }
 0xc95   :  { %v4943_v54 = vpop.f32.mrb[63].mxu0 }
 0xc98   :  { %v4947_v16 = vpop.f32.mrb[64].mxu0 }
 0xc99   :  { %v4949_v19 = vpop.f32.mrb[65].mxu0 }
 0xca4   :  { %v4858_v36 = vpop.f32.mrb[84].mxu1 }
 0xca5   :  { %v4942_v48 = vadd.f32 %v4941_v2, %v4858_v36  ;;  %v4860_v21 = vpop.f32.mrb[85].mxu1 }
 0xca6   :  { %v4944_v23 = vadd.f32 %v4943_v54, %v4860_v21 }
 0xca7   :  { %v4964_v25 = vadd.f32 %v4957_v24, %v4942_v48 }
 0xca8   :  { %v4965_v18 = vadd.f32 %v4961_v40, %v4944_v23  ;;  %v4864_v38 = vpop.f32.mrb[86].mxu1 }
 0xca9   :  { %v4948_v30 = vadd.f32 %v4947_v16, %v4864_v38  ;;  %v4866_v32 = vpop.f32.mrb[87].mxu1  ;;  %v4968_v52 = vmax.f32 %v4964_v25, 0.0 }
 0xcaa   :  { %v4969_v28 = vmax.f32 %v4965_v18, 0.0  ;;  %v4950_v33 = vadd.f32 %v4949_v19, %v4866_v32 }
 0xcab   :  { %v4966_v3 = vadd.f32 %v4957_v24, %v4948_v30 }
 0xcac   :  { %v4967_v45 = vadd.f32 %v4961_v40, %v4950_v33  ;;  %5183 = vmatprep.mubr.f32.mxu0 %v4969_v28  ;;  %5075 = vmatprep.mubr.f32.mxu1 %v4969_v28 }
 0xcad   :  { %5184 = vmatmul.mubr.f32.vlgmr.msra.gmra.mrb[66].mxu0 %v4968_v52  ;;  %5076 = vmatmul.mubr.f32.vlgmr.msra.gmra.mrb[88].mxu1 %v4968_v52  ;;  %v4970_v47 = vmax.f32 %v4966_v3, 0.0 }
 0xcae   :  { %v4971_v49 = vmax.f32 %v4967_v45, 0.0 }
 0xcb0   :  { %5188 = vmatprep.mubr.f32.mxu0 %v4971_v49  ;;  %5080 = vmatprep.mubr.f32.mxu1 %v4971_v49 }
 0xcb1   :  { %5189 = vmatmul.mubr.f32.gmra.mrb[68].mxu0 %v4970_v47  ;;  %5081 = vmatmul.mubr.f32.gmra.mrb[90].mxu1 %v4970_v47 }
 0xd80   :  { %v6329_v51 = vpop.f32.mrb[66].mxu0  ;;  %v6291_v37 = vpop.f32.mrb[88].mxu1 }
 0xd81   :  { %v6330_v29 = vpop.f32.mrb[67].mxu0  ;;  %v6292_v53 = vpop.f32.mrb[89].mxu1 }
 0xd82   :  { %v6331_v42 = vadd.f32 %v6330_v29, %v6329_v51  ;;  %v6293_v26 = vadd.f32 %v6292_v53, %v6291_v37 }
 0xd84   :  { %v5186_v31 = vadd.f32 %v6331_v42, %v5677_v39  ;;  %v6332_v57 = vpop.f32.mrb[68].mxu0  ;;  %v5078_v58 = vadd.f32 %v6293_v26, %v5677_v39  ;;  %v6294_v10 = vpop.f32.mrb[90].mxu1 }
 0xd85   :  { %v6333_v46 = vpop.f32.mrb[69].mxu0  ;;  %v6295_v60 = vpop.f32.mrb[91].mxu1 }
 0xd86   :  { %v5206_v43 = vsub.f32 0.0, %v5186_v31  ;;  %v6334_v50 = vadd.f32 %v6333_v46, %v6332_v57  ;;  %v6296_v35 = vadd.f32 %v6295_v60, %v6294_v10  ;;  %v5194_v8 = vsub.f32 0.0, %v5078_v58 }
 0xd88   :  { %v5208_v62 = vmul.f32 1.442695, %v5206_v43  ;;  %v5191_v59 = vadd.f32 %v6334_v50, %v5677_v39  ;;  %v5083_v0 = vadd.f32 %v6296_v35, %v5677_v39  ;;  %v5196_v9 = vmul.f32 1.442695, %v5194_v8 }
 0xd8a   :  { %8062 = vpow2.f32 %v5208_v62  ;;  %v5207_v1 = vsub.f32 0.0, %v5191_v59  ;;  %v5195_v17 = vsub.f32 0.0, %v5083_v0 }
 0xd8c   :  { %v5210_v4 = vmul.f32 1.442695, %v5207_v1  ;;  %v5198_v11 = vmul.f32 1.442695, %v5195_v17 }
 0xd8e   :  { %8064 = vpow2.f32 %v5210_v4 }
 0xd94   :  { %v8063_v22 = vpop.eup %8062 }
 0xd95   :  { %v5212_v34 = vadd.f32 1.0, %v8063_v22 }
 0xd97   :  { %8066 = vrcp.f32 %v5212_v34 }
 0xd98   :  { %v8065_v5 = vpop.eup %8064 }
 0xd99   :  { %v5213_v6 = vadd.f32 1.0, %v8065_v5 }
 0xd9b   :  { %8068 = vrcp.f32 %v5213_v6 }
 0xd9c   :  { %8070 = vpow2.f32 %v5196_v9 }
 0xd9d   :  { %8072 = vpow2.f32 %v5198_v11 }
 0xda1   :  { %v8067_v55 = vpop.eup %8066 }
 0xda2   :  { %5220 = vrot.lane.b32.xlu0 %v8067_v55, %s8082_s20 }
 0xda5   :  { %v8069_v7 = vpop.eup %8068 }
 0xda6   :  { %5222 = vrot.lane.b32.xlu0 %v8069_v7, %s8082_s20  ;;  %v8071_v12 = vpop.eup %8070 }
 0xda7   :  { %v5200_v56 = vadd.f32 1.0, %v8071_v12  ;;  %v8073_v13 = vpop.eup %8072 }
 0xda8   :  { %v5201_v27 = vadd.f32 1.0, %v8073_v13 }
 0xda9   :  { %8074 = vrcp.f32 %v5200_v56 }
 0xdaa   :  { %8076 = vrcp.f32 %v5201_v27 }
 0xdb3   :  { %v8075_v14 = vpop.eup %8074 }
 0xdb4   :  { %v8077_v15 = vpop.eup %8076 }
 0xe14   :  { %v5221_v41 = vpop.permute.xlu0 %5220 }
 0xe15   :  { %v5226_v44 = vsel %vm2694_vm5, %v8075_v14, %v5221_v41 }
 0xe16   :  { %5228 = vst [vmem:[%s10472_s21] sm:$0xff] %v5226_v44 }
 0xe18   :  { %v5223_v61 = vpop.permute.xlu0 %5222 }
 0xe19   :  { %v5227_v63 = vsel %vm2694_vm5, %v8077_v15, %v5223_v61 }
 0xe1a   :  { %5229 = vst [vmem:[%s10472_s21 + $0x8] sm:$0xff] %v5227_v63 }

</bundles_post_ra>
